<compile_context>
chip_gen: v7x
topology: tpu7x:2x2x1
jax: 0.10.0
libtpu: 0.0.40
codegen_flags: <defaults>
</compile_context>

<pallas_src>
import functools

import jax
import jax.numpy as jnp
from jax import lax
from jax.experimental import pallas as pl
from jax.experimental.pallas import tpu as pltpu

BN_EPS = 1e-5
OUT_PAD = 128  # lane-dense output width (final fc padded to 128 lanes)


def _round_up(v, m):
    return ((v + m - 1) // m) * m


# ---------------------------------------------------------------------------
# Parameters (PyTorch conventions) and one-time preparation / unrolling.
# ---------------------------------------------------------------------------

def _rand_bn(key, c):
    k1, k2, k3, k4 = jax.random.split(key, 4)
    gamma = jax.random.uniform(k1, (c,), jnp.float32, 0.5, 1.5)
    beta = jax.random.uniform(k2, (c,), jnp.float32, -0.3, 0.3)
    mean = jax.random.uniform(k3, (c,), jnp.float32, -0.3, 0.3)
    var = jax.random.uniform(k4, (c,), jnp.float32, 0.5, 1.5)
    return (gamma, beta, mean, var)


def init_raw_params(key, channels=(16, 32, 64, 128), out_dim=2):
    """PyTorch-convention params (Conv1d: (Cout, Cin, K); Linear: (out, in)).

    BatchNorm affine / running stats are randomized (instead of the PyTorch
    defaults gamma=1, beta=0, mean=0, var=1) so the BN folding is actually
    exercised by the correctness checks.
    """
    def uniform(k, shape, bound):
        return jax.random.uniform(k, shape, jnp.float32, -bound, bound)

    keys = iter(jax.random.split(key, 64))
    c0 = channels[0]
    raw = {"channels": tuple(channels)}
    raw["in_w"] = uniform(next(keys), (c0, 1, 1), 1.0)      # Conv1d(1, c0, k=1)
    raw["in_b"] = uniform(next(keys), (c0,), 1.0)
    blocks = []
    for i in range(len(channels) - 1):
        cin, cout = channels[i], channels[i + 1]
        b3 = (cin * 3) ** -0.5
        b3b = (cout * 3) ** -0.5
        b1x = cin ** -0.5
        blocks.append({
            "w1": uniform(next(keys), (cout, cin, 3), b3),
            "b1": uniform(next(keys), (cout,), b3),
            "bn1": _rand_bn(next(keys), cout),
            "w2": uniform(next(keys), (cout, cout, 3), b3b),
            "b2": uniform(next(keys), (cout,), b3b),
            "bn2": _rand_bn(next(keys), cout),
            "ws": uniform(next(keys), (cout, cin, 1), b1x),
            "bs": uniform(next(keys), (cout,), b1x),
            "bns": _rand_bn(next(keys), cout),
        })
    raw["blocks"] = blocks
    c_last = channels[-1]
    raw["fc_w"] = uniform(next(keys), (out_dim, c_last), c_last ** -0.5)
    raw["fc_b"] = uniform(next(keys), (out_dim,), c_last ** -0.5)
    return raw


def _fold_bn(w, b, bn):
    """Fold an eval-mode BatchNorm1d into the preceding Conv1d."""
    gamma, beta, mean, var = bn
    s = gamma / jnp.sqrt(var + BN_EPS)
    return w * s[:, None, None], b * s + (beta - mean * s)


def _pos_matrix(length, stride, tap):
    """(stride*length, length) selector with 1 at (stride*(l+tap-1), l) when valid."""
    l = jnp.arange(length)
    src = l + tap - 1
    valid = (src >= 0) & (src < length)
    rows = jnp.arange(stride * length)[:, None]
    return ((rows == stride * src[None, :]) & valid[None, :]).astype(jnp.float32)


def prepare_params(raw, seq_len, *, use_bf16=True):
    """Fold BN and unroll every conv / avg-pool / fc into dense matrices.

    Activation layout in the kernel: (batch_rows, L*C) with lane index l*C + c.
    After MaxPool1d(2) the pooled value of new position l' sits at lane
    (2*l')*C + c; the next conv matrix reads exactly those lanes (stride 2) and
    has zero rows for the stale odd-position lanes.
    """
    channels = raw["channels"]
    out_dim = raw["fc_b"].shape[0]
    n_blocks = len(channels) - 1
    assert seq_len % (2 ** (n_blocks - 1)) == 0, "seq_len must survive the max-pools"
    mm_dtype = jnp.bfloat16 if use_bf16 else jnp.float32

    mats = []
    L = seq_len
    # input projection Conv1d(1, c0, k=1): lanes (L,) -> (L*c0,)
    m_in = jnp.kron(jnp.eye(L, dtype=jnp.float32), raw["in_w"][:, 0, 0][None, :])
    v_in = jnp.tile(raw["in_b"], L)[None, :]
    mats += [m_in.astype(mm_dtype), v_in]

    stride = 1          # 1: compact input layout; 2: pooled (stride-2) layout
    pool_shift = []
    for i in range(n_blocks):
        cin, cout = channels[i], channels[i + 1]
        blk = raw["blocks"][i]
        w1, b1 = _fold_bn(blk["w1"], blk["b1"], blk["bn1"])
        w2, b2 = _fold_bn(blk["w2"], blk["b2"], blk["bn2"])
        ws, bs = _fold_bn(blk["ws"], blk["bs"], blk["bns"])
        m1 = sum(jnp.kron(_pos_matrix(L, stride, k), w1[:, :, k].T) for k in range(3))
        m2 = sum(jnp.kron(_pos_matrix(L, 1, k), w2[:, :, k].T) for k in range(3))
        msc = jnp.kron(_pos_matrix(L, stride, 1), ws[:, :, 0].T)
        v1 = jnp.tile(b1, L)[None, :]
        v2 = jnp.tile(b2, L)[None, :]
        vsc = jnp.tile(bs, L)[None, :]
        mats += [m1.astype(mm_dtype), v1, m2.astype(mm_dtype), v2,
                 msc.astype(mm_dtype), vsc]
        if i < n_blocks - 1:
            pool_shift.append(cout)   # MaxPool1d(2): lane shift of one position
            stride, L = 2, L // 2

    # global average pool + fc, padded to a lane-dense OUT_PAD-wide output
    m_fc = jnp.kron(jnp.ones((L, 1), jnp.float32), raw["fc_w"].T) / float(L)
    m_fc = jnp.pad(m_fc, ((0, 0), (0, OUT_PAD - out_dim)))
    v_fc = jnp.pad(raw["fc_b"], (0, OUT_PAD - out_dim))[None, :]
    mats += [m_fc.astype(mm_dtype), v_fc]

    return {
        "mats": tuple(mats),
        "n_blocks": n_blocks,
        "pool_shift": tuple(pool_shift),
        "seq_len": seq_len,
        "out_dim": out_dim,
        "mm_dtype": mm_dtype,
    }


# ---------------------------------------------------------------------------
# Shared forward math (works on Refs inside the kernel and on arrays outside).
# ---------------------------------------------------------------------------

def _unrolled_forward(x, mats, n_blocks, pool_shift, mm_dtype):
    """x: (rows, L0) f32.  mats: alternating (matrix, bias) refs or arrays."""
    def mm(a, w):   # bf16 (or f32) MXU matmul, f32 accumulation
        return jnp.dot(a.astype(mm_dtype), w[...],
                       preferred_element_type=jnp.float32)

    h = mm(x, mats[0]) + mats[1][...]               # input_proj Conv1d(1->c0, k=1)
    idx = 2
    for i in range(n_blocks):
        m1, v1, m2, v2, msc, vsc = mats[idx:idx + 6]
        idx += 6
        y = jnp.maximum(mm(h, m1) + v1[...], 0.0)   # Conv1d(k=3)+BN+ReLU (+Dropout=id)
        y = mm(y, m2) + v2[...]                     # Conv1d(k=3)+BN
        sc = mm(h, msc) + vsc[...]                  # shortcut Conv1d(k=1)+BN
        h = jnp.maximum(y + sc, 0.0)                # residual add + ReLU
        if i < n_blocks - 1:                        # MaxPool1d(kernel=2, stride=2)
            c = pool_shift[i]
            shifted = jnp.concatenate(
                [h[:, c:], jnp.zeros_like(h[:, :c])], axis=1)
            h = jnp.maximum(h, shifted)             # valid on even-position lanes
    return mm(h, mats[idx]) + mats[idx + 1][...]    # global avg pool + fc (folded)


# ---------------------------------------------------------------------------
# Pallas kernel + wrapper.
# ---------------------------------------------------------------------------

def _advanced_cnn_kernel(x_ref, *refs, n_blocks, pool_shift, mm_dtype):
    o_ref = refs[-1]
    out = _unrolled_forward(x_ref[...].astype(jnp.float32), refs[:-1],
                            n_blocks, pool_shift, mm_dtype)
    o_ref[...] = out.astype(o_ref.dtype)


def advanced_cnn_forward(x, prep, *, tile_batch=256):
    mats = prep["mats"]
    seq_len = prep["seq_len"]
    batch, in_len = x.shape
    assert in_len == seq_len

    tb = _round_up(min(tile_batch, _round_up(batch, 8)), 8)
    b_pad = _round_up(batch, tb)
    if b_pad != batch:
        x = jnp.pad(x, ((0, b_pad - batch), (0, 0)))

    kernel = functools.partial(
        _advanced_cnn_kernel,
        n_blocks=prep["n_blocks"],
        pool_shift=prep["pool_shift"],
        mm_dtype=prep["mm_dtype"],
    )

    def resident(a):        # weights stay pinned in VMEM across grid steps
        return pl.BlockSpec(a.shape, lambda i: (0, 0))

    flops = 2 * b_pad * sum(int(m.shape[0]) * int(m.shape[1]) for m in mats[0::2])
    bytes_accessed = int(
        x.size * x.dtype.itemsize + b_pad * OUT_PAD * 4
        + sum(m.size * m.dtype.itemsize for m in mats))

    out = pl.pallas_call(
        kernel,
        out_shape=jax.ShapeDtypeStruct((b_pad, OUT_PAD), jnp.float32),
        grid=(b_pad // tb,),
        in_specs=[pl.BlockSpec((tb, seq_len), lambda i: (i, 0))]
                 + [resident(m) for m in mats],
        out_specs=pl.BlockSpec((tb, OUT_PAD), lambda i: (i, 0)),
        compiler_params=pltpu.CompilerParams(
            dimension_semantics=("parallel",),      # megacore: shard batch tiles
            vmem_limit_bytes=32 * 1024 * 1024,
        ),
        cost_estimate=pl.CostEstimate(
            flops=flops, transcendentals=0, bytes_accessed=bytes_accessed),
    )(x, *mats)
    return out[:batch, :prep["out_dim"]]


# ---------------------------------------------------------------------------
# Pure-JAX (un-folded, f32) reference matching the PyTorch eval-mode forward.
# ---------------------------------------------------------------------------

def torch_reference_forward(x, raw):
    prec = lax.Precision.HIGHEST

    def conv1d(h, w, b, pad):
        y = lax.conv_general_dilated(
            h, w, window_strides=(1,), padding=[(pad, pad)],
            dimension_numbers=("NCH", "OIH", "NCH"), precision=prec)
        return y + b[None, :, None]

    def bn(h, p):
        gamma, beta, mean, var = p
        s = gamma / jnp.sqrt(var + BN_EPS)
        return h * s[None, :, None] + (beta - mean * s)[None, :, None]

    h = x[:, None, :]                                    # unsqueeze(1)
    h = conv1d(h, raw["in_w"], raw["in_b"], 0)           # input_proj
    n_blocks = len(raw["blocks"])
    for i, blk in enumerate(raw["blocks"]):
        identity = h
        y = jnp.maximum(bn(conv1d(h, blk["w1"], blk["b1"], 1), blk["bn1"]), 0.0)
        y = bn(conv1d(y, blk["w2"], blk["b2"], 1), blk["bn2"])     # Dropout = id
        sc = bn(conv1d(identity, blk["ws"], blk["bs"], 0), blk["bns"])
        h = jnp.maximum(y + sc, 0.0)
        if i < n_blocks - 1:                             # F.max_pool1d(x, 2)
            b_, c_, l_ = h.shape
            lp = l_ // 2
            h = jnp.max(h[:, :, :2 * lp].reshape(b_, c_, lp, 2), axis=-1)
    h = jnp.mean(h, axis=-1)                             # AdaptiveAvgPool1d(1) + view
    return jnp.dot(h, raw["fc_w"].T, precision=prec) + raw["fc_b"]


if __name__ == "__main__":
    key = jax.random.PRNGKey(0)
    k_x1, k_x2, k_p = jax.random.split(key, 3)

    batch, in_dim, out_dim = 8, 16, 2
    channels = (16, 32, 64, 128)
    x = jax.random.normal(k_x1, (batch, in_dim), jnp.float32)
    raw = init_raw_params(k_p, channels=channels, out_dim=out_dim)

    # 1) Validate BN-folding + conv-unrolling math in f32 (no Pallas involved).
    prep_f32 = prepare_params(raw, in_dim, use_bf16=False)
    with jax.default_matmul_precision("highest"):
        ref = torch_reference_forward(x, raw)
        unrolled_f32 = _unrolled_forward(
            x, prep_f32["mats"], prep_f32["n_blocks"], prep_f32["pool_shift"],
            jnp.float32)[:, :out_dim]
    assert jnp.allclose(unrolled_f32, ref, atol=1e-3, rtol=1e-3), "unrolling mismatch"

    # 2) Pallas kernel (bf16 MXU inputs) vs matched-precision pure-JAX math.
    prep = prepare_params(raw, in_dim, use_bf16=True)
    out = jax.block_until_ready(advanced_cnn_forward(x, prep, tile_batch=256))
    ref_matched = _unrolled_forward(
        x, prep["mats"], prep["n_blocks"], prep["pool_shift"],
        prep["mm_dtype"])[:, :out_dim]
    assert out.shape == (batch, out_dim), out.shape
    assert jnp.allclose(out, ref_matched, atol=1e-3, rtol=1e-3), "kernel mismatch"
    assert jnp.allclose(out, ref, atol=1e-1, rtol=1e-1), "kernel far from f32 reference"

    # 3) Exercise the batch grid (multiple tiles + batch padding).
    x2 = jax.random.normal(k_x2, (200, in_dim), jnp.float32)
    out2 = jax.block_until_ready(advanced_cnn_forward(x2, prep, tile_batch=64))
    ref2 = _unrolled_forward(
        x2, prep["mats"], prep["n_blocks"], prep["pool_shift"],
        prep["mm_dtype"])[:, :out_dim]
    assert out2.shape == (200, out_dim)
    assert jnp.allclose(out2, ref2, atol=1e-3, rtol=1e-3), "tiled kernel mismatch"

    print("KERNEL_OK")
</pallas_src>

<mosaic_0001>
module attributes {stable_mosaic.version = 11 : i64} {
  func.func @_advanced_cnn_kernel(%arg0: i32, %arg1: memref<8x16xf32, #tpu.memory_space<vmem>>, %arg2: memref<16x256xbf16, #tpu.memory_space<vmem>>, %arg3: memref<1x256xf32, #tpu.memory_space<vmem>>, %arg4: memref<256x512xbf16, #tpu.memory_space<vmem>>, %arg5: memref<1x512xf32, #tpu.memory_space<vmem>>, %arg6: memref<512x512xbf16, #tpu.memory_space<vmem>>, %arg7: memref<1x512xf32, #tpu.memory_space<vmem>>, %arg8: memref<256x512xbf16, #tpu.memory_space<vmem>>, %arg9: memref<1x512xf32, #tpu.memory_space<vmem>>, %arg10: memref<512x512xbf16, #tpu.memory_space<vmem>>, %arg11: memref<1x512xf32, #tpu.memory_space<vmem>>, %arg12: memref<512x512xbf16, #tpu.memory_space<vmem>>, %arg13: memref<1x512xf32, #tpu.memory_space<vmem>>, %arg14: memref<512x512xbf16, #tpu.memory_space<vmem>>, %arg15: memref<1x512xf32, #tpu.memory_space<vmem>>, %arg16: memref<512x512xbf16, #tpu.memory_space<vmem>>, %arg17: memref<1x512xf32, #tpu.memory_space<vmem>>, %arg18: memref<512x512xbf16, #tpu.memory_space<vmem>>, %arg19: memref<1x512xf32, #tpu.memory_space<vmem>>, %arg20: memref<512x512xbf16, #tpu.memory_space<vmem>>, %arg21: memref<1x512xf32, #tpu.memory_space<vmem>>, %arg22: memref<512x128xbf16, #tpu.memory_space<vmem>>, %arg23: memref<1x128xf32, #tpu.memory_space<vmem>>, %arg24: memref<8x128xf32, #tpu.memory_space<vmem>>) attributes {dimension_semantics = [#tpu.dimension_semantics<parallel>], iteration_bounds = array<i64: 1>, scalar_prefetch = 0 : i64, scratch_operands = 0 : i64, tpu.core_type = #tpu.core_type<tc>, window_params = [{transform_indices = @transform_0, window_bounds = array<i64: 8, 16>}, {pipeline_mode = #tpu.pipeline_mode<synchronous>, transform_indices = @transform_1, window_bounds = array<i64: 16, 256>}, {pipeline_mode = #tpu.pipeline_mode<synchronous>, transform_indices = @transform_2, window_bounds = array<i64: 1, 256>}, {pipeline_mode = #tpu.pipeline_mode<synchronous>, transform_indices = @transform_3, window_bounds = array<i64: 256, 512>}, {pipeline_mode = #tpu.pipeline_mode<synchronous>, transform_indices = @transform_4, window_bounds = array<i64: 1, 512>}, {pipeline_mode = #tpu.pipeline_mode<synchronous>, transform_indices = @transform_5, window_bounds = array<i64: 512, 512>}, {pipeline_mode = #tpu.pipeline_mode<synchronous>, transform_indices = @transform_6, window_bounds = array<i64: 1, 512>}, {pipeline_mode = #tpu.pipeline_mode<synchronous>, transform_indices = @transform_7, window_bounds = array<i64: 256, 512>}, {pipeline_mode = #tpu.pipeline_mode<synchronous>, transform_indices = @transform_8, window_bounds = array<i64: 1, 512>}, {pipeline_mode = #tpu.pipeline_mode<synchronous>, transform_indices = @transform_9, window_bounds = array<i64: 512, 512>}, {pipeline_mode = #tpu.pipeline_mode<synchronous>, transform_indices = @transform_10, window_bounds = array<i64: 1, 512>}, {pipeline_mode = #tpu.pipeline_mode<synchronous>, transform_indices = @transform_11, window_bounds = array<i64: 512, 512>}, {pipeline_mode = #tpu.pipeline_mode<synchronous>, transform_indices = @transform_12, window_bounds = array<i64: 1, 512>}, {pipeline_mode = #tpu.pipeline_mode<synchronous>, transform_indices = @transform_13, window_bounds = array<i64: 512, 512>}, {pipeline_mode = #tpu.pipeline_mode<synchronous>, transform_indices = @transform_14, window_bounds = array<i64: 1, 512>}, {pipeline_mode = #tpu.pipeline_mode<synchronous>, transform_indices = @transform_15, window_bounds = array<i64: 512, 512>}, {pipeline_mode = #tpu.pipeline_mode<synchronous>, transform_indices = @transform_16, window_bounds = array<i64: 1, 512>}, {pipeline_mode = #tpu.pipeline_mode<synchronous>, transform_indices = @transform_17, window_bounds = array<i64: 512, 512>}, {pipeline_mode = #tpu.pipeline_mode<synchronous>, transform_indices = @transform_18, window_bounds = array<i64: 1, 512>}, {pipeline_mode = #tpu.pipeline_mode<synchronous>, transform_indices = @transform_19, window_bounds = array<i64: 512, 512>}, {pipeline_mode = #tpu.pipeline_mode<synchronous>, transform_indices = @transform_20, window_bounds = array<i64: 1, 512>}, {pipeline_mode = #tpu.pipeline_mode<synchronous>, transform_indices = @transform_21, window_bounds = array<i64: 512, 128>}, {pipeline_mode = #tpu.pipeline_mode<synchronous>, transform_indices = @transform_22, window_bounds = array<i64: 1, 128>}, {transform_indices = @transform_23, window_bounds = array<i64: 8, 128>}]} {
    %c0 = arith.constant 0 : index
    %c0_0 = arith.constant 0 : index
    %0 = vector.load %arg1[%c0, %c0_0] : memref<8x16xf32, #tpu.memory_space<vmem>>, vector<8x16xf32>
    %1 = arith.truncf %0 : vector<8x16xf32> to vector<8x16xbf16>
    %c0_1 = arith.constant 0 : index
    %c0_2 = arith.constant 0 : index
    %2 = vector.load %arg2[%c0_1, %c0_2] : memref<16x256xbf16, #tpu.memory_space<vmem>>, vector<16x256xbf16>
    %cst = arith.constant dense<0.000000e+00> : vector<8x256xf32>
    %3 = tpu.matmul %1, %2, %cst {dimension_numbers = #tpu.dot_dimension_numbers<[1], [0], [0], [1], [0, 0, 1, 1], [], []>} : vector<8x16xbf16>, vector<16x256xbf16>, vector<8x256xf32> -> vector<8x256xf32>
    %c0_3 = arith.constant 0 : index
    %c0_4 = arith.constant 0 : index
    %4 = vector.load %arg3[%c0_3, %c0_4] : memref<1x256xf32, #tpu.memory_space<vmem>>, vector<1x256xf32>
    %5 = vector.broadcast %4 : vector<1x256xf32> to vector<8x256xf32>
    %6 = arith.addf %3, %5 : vector<8x256xf32>
    %7 = arith.truncf %6 : vector<8x256xf32> to vector<8x256xbf16>
    %c0_5 = arith.constant 0 : index
    %c0_6 = arith.constant 0 : index
    %8 = vector.load %arg4[%c0_5, %c0_6] : memref<256x512xbf16, #tpu.memory_space<vmem>>, vector<256x512xbf16>
    %cst_7 = arith.constant dense<0.000000e+00> : vector<8x512xf32>
    %9 = tpu.matmul %7, %8, %cst_7 {dimension_numbers = #tpu.dot_dimension_numbers<[1], [0], [0], [1], [0, 0, 1, 1], [], []>} : vector<8x256xbf16>, vector<256x512xbf16>, vector<8x512xf32> -> vector<8x512xf32>
    %c0_8 = arith.constant 0 : index
    %c0_9 = arith.constant 0 : index
    %10 = vector.load %arg5[%c0_8, %c0_9] : memref<1x512xf32, #tpu.memory_space<vmem>>, vector<1x512xf32>
    %11 = vector.broadcast %10 : vector<1x512xf32> to vector<8x512xf32>
    %12 = arith.addf %9, %11 : vector<8x512xf32>
    %cst_10 = arith.constant 0.000000e+00 : f32
    %13 = vector.broadcast %cst_10 : f32 to vector<8x512xf32>
    %14 = arith.maximumf %12, %13 : vector<8x512xf32>
    %15 = arith.truncf %14 : vector<8x512xf32> to vector<8x512xbf16>
    %c0_11 = arith.constant 0 : index
    %c0_12 = arith.constant 0 : index
    %16 = vector.load %arg6[%c0_11, %c0_12] : memref<512x512xbf16, #tpu.memory_space<vmem>>, vector<512x512xbf16>
    %cst_13 = arith.constant dense<0.000000e+00> : vector<8x512xf32>
    %17 = tpu.matmul %15, %16, %cst_13 {dimension_numbers = #tpu.dot_dimension_numbers<[1], [0], [0], [1], [0, 0, 1, 1], [], []>} : vector<8x512xbf16>, vector<512x512xbf16>, vector<8x512xf32> -> vector<8x512xf32>
    %c0_14 = arith.constant 0 : index
    %c0_15 = arith.constant 0 : index
    %18 = vector.load %arg7[%c0_14, %c0_15] : memref<1x512xf32, #tpu.memory_space<vmem>>, vector<1x512xf32>
    %19 = vector.broadcast %18 : vector<1x512xf32> to vector<8x512xf32>
    %20 = arith.addf %17, %19 : vector<8x512xf32>
    %21 = arith.truncf %6 : vector<8x256xf32> to vector<8x256xbf16>
    %c0_16 = arith.constant 0 : index
    %c0_17 = arith.constant 0 : index
    %22 = vector.load %arg8[%c0_16, %c0_17] : memref<256x512xbf16, #tpu.memory_space<vmem>>, vector<256x512xbf16>
    %cst_18 = arith.constant dense<0.000000e+00> : vector<8x512xf32>
    %23 = tpu.matmul %21, %22, %cst_18 {dimension_numbers = #tpu.dot_dimension_numbers<[1], [0], [0], [1], [0, 0, 1, 1], [], []>} : vector<8x256xbf16>, vector<256x512xbf16>, vector<8x512xf32> -> vector<8x512xf32>
    %c0_19 = arith.constant 0 : index
    %c0_20 = arith.constant 0 : index
    %24 = vector.load %arg9[%c0_19, %c0_20] : memref<1x512xf32, #tpu.memory_space<vmem>>, vector<1x512xf32>
    %25 = vector.broadcast %24 : vector<1x512xf32> to vector<8x512xf32>
    %26 = arith.addf %23, %25 : vector<8x512xf32>
    %27 = arith.addf %20, %26 : vector<8x512xf32>
    %cst_21 = arith.constant 0.000000e+00 : f32
    %28 = vector.broadcast %cst_21 : f32 to vector<8x512xf32>
    %29 = arith.maximumf %27, %28 : vector<8x512xf32>
    %30 = vector.extract_strided_slice %29 {offsets = [0, 32], sizes = [8, 480], strides = [1, 1]} : vector<8x512xf32> to vector<8x480xf32>
    %cst_22 = arith.constant 0.000000e+00 : f32
    %31 = vector.broadcast %cst_22 : f32 to vector<8x32xf32>
    %32 = tpu.concatenate %30, %31 in 1 : vector<8x480xf32>, vector<8x32xf32> -> vector<8x512xf32>
    %33 = arith.maximumf %29, %32 : vector<8x512xf32>
    %34 = arith.truncf %33 : vector<8x512xf32> to vector<8x512xbf16>
    %c0_23 = arith.constant 0 : index
    %c0_24 = arith.constant 0 : index
    %35 = vector.load %arg10[%c0_23, %c0_24] : memref<512x512xbf16, #tpu.memory_space<vmem>>, vector<512x512xbf16>
    %cst_25 = arith.constant dense<0.000000e+00> : vector<8x512xf32>
    %36 = tpu.matmul %34, %35, %cst_25 {dimension_numbers = #tpu.dot_dimension_numbers<[1], [0], [0], [1], [0, 0, 1, 1], [], []>} : vector<8x512xbf16>, vector<512x512xbf16>, vector<8x512xf32> -> vector<8x512xf32>
    %c0_26 = arith.constant 0 : index
    %c0_27 = arith.constant 0 : index
    %37 = vector.load %arg11[%c0_26, %c0_27] : memref<1x512xf32, #tpu.memory_space<vmem>>, vector<1x512xf32>
    %38 = vector.broadcast %37 : vector<1x512xf32> to vector<8x512xf32>
    %39 = arith.addf %36, %38 : vector<8x512xf32>
    %cst_28 = arith.constant 0.000000e+00 : f32
    %40 = vector.broadcast %cst_28 : f32 to vector<8x512xf32>
    %41 = arith.maximumf %39, %40 : vector<8x512xf32>
    %42 = arith.truncf %41 : vector<8x512xf32> to vector<8x512xbf16>
    %c0_29 = arith.constant 0 : index
    %c0_30 = arith.constant 0 : index
    %43 = vector.load %arg12[%c0_29, %c0_30] : memref<512x512xbf16, #tpu.memory_space<vmem>>, vector<512x512xbf16>
    %cst_31 = arith.constant dense<0.000000e+00> : vector<8x512xf32>
    %44 = tpu.matmul %42, %43, %cst_31 {dimension_numbers = #tpu.dot_dimension_numbers<[1], [0], [0], [1], [0, 0, 1, 1], [], []>} : vector<8x512xbf16>, vector<512x512xbf16>, vector<8x512xf32> -> vector<8x512xf32>
    %c0_32 = arith.constant 0 : index
    %c0_33 = arith.constant 0 : index
    %45 = vector.load %arg13[%c0_32, %c0_33] : memref<1x512xf32, #tpu.memory_space<vmem>>, vector<1x512xf32>
    %46 = vector.broadcast %45 : vector<1x512xf32> to vector<8x512xf32>
    %47 = arith.addf %44, %46 : vector<8x512xf32>
    %48 = arith.truncf %33 : vector<8x512xf32> to vector<8x512xbf16>
    %c0_34 = arith.constant 0 : index
    %c0_35 = arith.constant 0 : index
    %49 = vector.load %arg14[%c0_34, %c0_35] : memref<512x512xbf16, #tpu.memory_space<vmem>>, vector<512x512xbf16>
    %cst_36 = arith.constant dense<0.000000e+00> : vector<8x512xf32>
    %50 = tpu.matmul %48, %49, %cst_36 {dimension_numbers = #tpu.dot_dimension_numbers<[1], [0], [0], [1], [0, 0, 1, 1], [], []>} : vector<8x512xbf16>, vector<512x512xbf16>, vector<8x512xf32> -> vector<8x512xf32>
    %c0_37 = arith.constant 0 : index
    %c0_38 = arith.constant 0 : index
    %51 = vector.load %arg15[%c0_37, %c0_38] : memref<1x512xf32, #tpu.memory_space<vmem>>, vector<1x512xf32>
    %52 = vector.broadcast %51 : vector<1x512xf32> to vector<8x512xf32>
    %53 = arith.addf %50, %52 : vector<8x512xf32>
    %54 = arith.addf %47, %53 : vector<8x512xf32>
    %cst_39 = arith.constant 0.000000e+00 : f32
    %55 = vector.broadcast %cst_39 : f32 to vector<8x512xf32>
    %56 = arith.maximumf %54, %55 : vector<8x512xf32>
    %57 = vector.extract_strided_slice %56 {offsets = [0, 64], sizes = [8, 448], strides = [1, 1]} : vector<8x512xf32> to vector<8x448xf32>
    %cst_40 = arith.constant 0.000000e+00 : f32
    %58 = vector.broadcast %cst_40 : f32 to vector<8x64xf32>
    %59 = tpu.concatenate %57, %58 in 1 : vector<8x448xf32>, vector<8x64xf32> -> vector<8x512xf32>
    %60 = arith.maximumf %56, %59 : vector<8x512xf32>
    %61 = arith.truncf %60 : vector<8x512xf32> to vector<8x512xbf16>
    %c0_41 = arith.constant 0 : index
    %c0_42 = arith.constant 0 : index
    %62 = vector.load %arg16[%c0_41, %c0_42] : memref<512x512xbf16, #tpu.memory_space<vmem>>, vector<512x512xbf16>
    %cst_43 = arith.constant dense<0.000000e+00> : vector<8x512xf32>
    %63 = tpu.matmul %61, %62, %cst_43 {dimension_numbers = #tpu.dot_dimension_numbers<[1], [0], [0], [1], [0, 0, 1, 1], [], []>} : vector<8x512xbf16>, vector<512x512xbf16>, vector<8x512xf32> -> vector<8x512xf32>
    %c0_44 = arith.constant 0 : index
    %c0_45 = arith.constant 0 : index
    %64 = vector.load %arg17[%c0_44, %c0_45] : memref<1x512xf32, #tpu.memory_space<vmem>>, vector<1x512xf32>
    %65 = vector.broadcast %64 : vector<1x512xf32> to vector<8x512xf32>
    %66 = arith.addf %63, %65 : vector<8x512xf32>
    %cst_46 = arith.constant 0.000000e+00 : f32
    %67 = vector.broadcast %cst_46 : f32 to vector<8x512xf32>
    %68 = arith.maximumf %66, %67 : vector<8x512xf32>
    %69 = arith.truncf %68 : vector<8x512xf32> to vector<8x512xbf16>
    %c0_47 = arith.constant 0 : index
    %c0_48 = arith.constant 0 : index
    %70 = vector.load %arg18[%c0_47, %c0_48] : memref<512x512xbf16, #tpu.memory_space<vmem>>, vector<512x512xbf16>
    %cst_49 = arith.constant dense<0.000000e+00> : vector<8x512xf32>
    %71 = tpu.matmul %69, %70, %cst_49 {dimension_numbers = #tpu.dot_dimension_numbers<[1], [0], [0], [1], [0, 0, 1, 1], [], []>} : vector<8x512xbf16>, vector<512x512xbf16>, vector<8x512xf32> -> vector<8x512xf32>
    %c0_50 = arith.constant 0 : index
    %c0_51 = arith.constant 0 : index
    %72 = vector.load %arg19[%c0_50, %c0_51] : memref<1x512xf32, #tpu.memory_space<vmem>>, vector<1x512xf32>
    %73 = vector.broadcast %72 : vector<1x512xf32> to vector<8x512xf32>
    %74 = arith.addf %71, %73 : vector<8x512xf32>
    %75 = arith.truncf %60 : vector<8x512xf32> to vector<8x512xbf16>
    %c0_52 = arith.constant 0 : index
    %c0_53 = arith.constant 0 : index
    %76 = vector.load %arg20[%c0_52, %c0_53] : memref<512x512xbf16, #tpu.memory_space<vmem>>, vector<512x512xbf16>
    %cst_54 = arith.constant dense<0.000000e+00> : vector<8x512xf32>
    %77 = tpu.matmul %75, %76, %cst_54 {dimension_numbers = #tpu.dot_dimension_numbers<[1], [0], [0], [1], [0, 0, 1, 1], [], []>} : vector<8x512xbf16>, vector<512x512xbf16>, vector<8x512xf32> -> vector<8x512xf32>
    %c0_55 = arith.constant 0 : index
    %c0_56 = arith.constant 0 : index
    %78 = vector.load %arg21[%c0_55, %c0_56] : memref<1x512xf32, #tpu.memory_space<vmem>>, vector<1x512xf32>
    %79 = vector.broadcast %78 : vector<1x512xf32> to vector<8x512xf32>
    %80 = arith.addf %77, %79 : vector<8x512xf32>
    %81 = arith.addf %74, %80 : vector<8x512xf32>
    %cst_57 = arith.constant 0.000000e+00 : f32
    %82 = vector.broadcast %cst_57 : f32 to vector<8x512xf32>
    %83 = arith.maximumf %81, %82 : vector<8x512xf32>
    %84 = arith.truncf %83 : vector<8x512xf32> to vector<8x512xbf16>
    %c0_58 = arith.constant 0 : index
    %c0_59 = arith.constant 0 : index
    %85 = vector.load %arg22[%c0_58, %c0_59] : memref<512x128xbf16, #tpu.memory_space<vmem>>, vector<512x128xbf16>
    %cst_60 = arith.constant dense<0.000000e+00> : vector<8x128xf32>
    %86 = tpu.matmul %84, %85, %cst_60 {dimension_numbers = #tpu.dot_dimension_numbers<[1], [0], [0], [1], [0, 0, 1, 1], [], []>} : vector<8x512xbf16>, vector<512x128xbf16>, vector<8x128xf32> -> vector<8x128xf32>
    %c0_61 = arith.constant 0 : index
    %c0_62 = arith.constant 0 : index
    %87 = vector.load %arg23[%c0_61, %c0_62] : memref<1x128xf32, #tpu.memory_space<vmem>>, vector<1x128xf32>
    %88 = vector.broadcast %87 : vector<1x128xf32> to vector<8x128xf32>
    %89 = arith.addf %86, %88 : vector<8x128xf32>
    %c0_63 = arith.constant 0 : index
    %c0_64 = arith.constant 0 : index
    %90 = vector.load %arg24[%c0_63, %c0_64] : memref<8x128xf32, #tpu.memory_space<vmem>>, vector<8x128xf32>
    tpu.vector_store %arg24[%c0_63, %c0_64], %89 {strides = array<i32>} : memref<8x128xf32, #tpu.memory_space<vmem>>, vector<8x128xf32>,
    return
  }
  func.func @transform_0(%arg0: i32) -> (i32, i32) {
    %c0_i32 = arith.constant 0 : i32
    %c0_i32_0 = arith.constant 0 : i32
    return %arg0, %c0_i32 : i32, i32
  }
  func.func @transform_1(%arg0: i32) -> (i32, i32) {
    %c0_i32 = arith.constant 0 : i32
    %c0_i32_0 = arith.constant 0 : i32
    %c0_i32_1 = arith.constant 0 : i32
    return %c0_i32, %c0_i32_0 : i32, i32
  }
  func.func @transform_2(%arg0: i32) -> (i32, i32) {
    %c0_i32 = arith.constant 0 : i32
    %c0_i32_0 = arith.constant 0 : i32
    %c0_i32_1 = arith.constant 0 : i32
    return %c0_i32, %c0_i32_0 : i32, i32
  }
  func.func @transform_3(%arg0: i32) -> (i32, i32) {
    %c0_i32 = arith.constant 0 : i32
    %c0_i32_0 = arith.constant 0 : i32
    %c0_i32_1 = arith.constant 0 : i32
    return %c0_i32, %c0_i32_0 : i32, i32
  }
  func.func @transform_4(%arg0: i32) -> (i32, i32) {
    %c0_i32 = arith.constant 0 : i32
    %c0_i32_0 = arith.constant 0 : i32
    %c0_i32_1 = arith.constant 0 : i32
    return %c0_i32, %c0_i32_0 : i32, i32
  }
  func.func @transform_5(%arg0: i32) -> (i32, i32) {
    %c0_i32 = arith.constant 0 : i32
    %c0_i32_0 = arith.constant 0 : i32
    %c0_i32_1 = arith.constant 0 : i32
    return %c0_i32, %c0_i32_0 : i32, i32
  }
  func.func @transform_6(%arg0: i32) -> (i32, i32) {
    %c0_i32 = arith.constant 0 : i32
    %c0_i32_0 = arith.constant 0 : i32
    %c0_i32_1 = arith.constant 0 : i32
    return %c0_i32, %c0_i32_0 : i32, i32
  }
  func.func @transform_7(%arg0: i32) -> (i32, i32) {
    %c0_i32 = arith.constant 0 : i32
    %c0_i32_0 = arith.constant 0 : i32
    %c0_i32_1 = arith.constant 0 : i32
    return %c0_i32, %c0_i32_0 : i32, i32
  }
  func.func @transform_8(%arg0: i32) -> (i32, i32) {
    %c0_i32 = arith.constant 0 : i32
    %c0_i32_0 = arith.constant 0 : i32
    %c0_i32_1 = arith.constant 0 : i32
    return %c0_i32, %c0_i32_0 : i32, i32
  }
  func.func @transform_9(%arg0: i32) -> (i32, i32) {
    %c0_i32 = arith.constant 0 : i32
    %c0_i32_0 = arith.constant 0 : i32
    %c0_i32_1 = arith.constant 0 : i32
    return %c0_i32, %c0_i32_0 : i32, i32
  }
  func.func @transform_10(%arg0: i32) -> (i32, i32) {
    %c0_i32 = arith.constant 0 : i32
    %c0_i32_0 = arith.constant 0 : i32
    %c0_i32_1 = arith.constant 0 : i32
    return %c0_i32, %c0_i32_0 : i32, i32
  }
  func.func @transform_11(%arg0: i32) -> (i32, i32) {
    %c0_i32 = arith.constant 0 : i32
    %c0_i32_0 = arith.constant 0 : i32
    %c0_i32_1 = arith.constant 0 : i32
    return %c0_i32, %c0_i32_0 : i32, i32
  }
  func.func @transform_12(%arg0: i32) -> (i32, i32) {
    %c0_i32 = arith.constant 0 : i32
    %c0_i32_0 = arith.constant 0 : i32
    %c0_i32_1 = arith.constant 0 : i32
    return %c0_i32, %c0_i32_0 : i32, i32
  }
  func.func @transform_13(%arg0: i32) -> (i32, i32) {
    %c0_i32 = arith.constant 0 : i32
    %c0_i32_0 = arith.constant 0 : i32
    %c0_i32_1 = arith.constant 0 : i32
    return %c0_i32, %c0_i32_0 : i32, i32
  }
  func.func @transform_14(%arg0: i32) -> (i32, i32) {
    %c0_i32 = arith.constant 0 : i32
    %c0_i32_0 = arith.constant 0 : i32
    %c0_i32_1 = arith.constant 0 : i32
    return %c0_i32, %c0_i32_0 : i32, i32
  }
  func.func @transform_15(%arg0: i32) -> (i32, i32) {
    %c0_i32 = arith.constant 0 : i32
    %c0_i32_0 = arith.constant 0 : i32
    %c0_i32_1 = arith.constant 0 : i32
    return %c0_i32, %c0_i32_0 : i32, i32
  }
  func.func @transform_16(%arg0: i32) -> (i32, i32) {
    %c0_i32 = arith.constant 0 : i32
    %c0_i32_0 = arith.constant 0 : i32
    %c0_i32_1 = arith.constant 0 : i32
    return %c0_i32, %c0_i32_0 : i32, i32
  }
  func.func @transform_17(%arg0: i32) -> (i32, i32) {
    %c0_i32 = arith.constant 0 : i32
    %c0_i32_0 = arith.constant 0 : i32
    %c0_i32_1 = arith.constant 0 : i32
    return %c0_i32, %c0_i32_0 : i32, i32
  }
  func.func @transform_18(%arg0: i32) -> (i32, i32) {
    %c0_i32 = arith.constant 0 : i32
    %c0_i32_0 = arith.constant 0 : i32
    %c0_i32_1 = arith.constant 0 : i32
    return %c0_i32, %c0_i32_0 : i32, i32
  }
  func.func @transform_19(%arg0: i32) -> (i32, i32) {
    %c0_i32 = arith.constant 0 : i32
    %c0_i32_0 = arith.constant 0 : i32
    %c0_i32_1 = arith.constant 0 : i32
    return %c0_i32, %c0_i32_0 : i32, i32
  }
  func.func @transform_20(%arg0: i32) -> (i32, i32) {
    %c0_i32 = arith.constant 0 : i32
    %c0_i32_0 = arith.constant 0 : i32
    %c0_i32_1 = arith.constant 0 : i32
    return %c0_i32, %c0_i32_0 : i32, i32
  }
  func.func @transform_21(%arg0: i32) -> (i32, i32) {
    %c0_i32 = arith.constant 0 : i32
    %c0_i32_0 = arith.constant 0 : i32
    %c0_i32_1 = arith.constant 0 : i32
    return %c0_i32, %c0_i32_0 : i32, i32
  }
  func.func @transform_22(%arg0: i32) -> (i32, i32) {
    %c0_i32 = arith.constant 0 : i32
    %c0_i32_0 = arith.constant 0 : i32
    %c0_i32_1 = arith.constant 0 : i32
    return %c0_i32, %c0_i32_0 : i32, i32
  }
  func.func @transform_23(%arg0: i32) -> (i32, i32) {
    %c0_i32 = arith.constant 0 : i32
    %c0_i32_0 = arith.constant 0 : i32
    return %arg0, %c0_i32 : i32, i32
  }
}

</mosaic_0001>

<bundles_post_ra>
// kernel: tpu_custom_call.1
= control target key start
LH: loop header
LB: loop body
LE: loop exit
PB: predicated region body
PF: predicated region fallthrough
CT: control target
= control target key end

     0   :  { %s12152_s0 = inlined_call_operand.hbm [shape: f32[8,16], index: 0, kind: input, shape index: {}]   ;;  %s12153_s1 = inlined_call_operand.hbm [shape: bf16[16,256], index: 1, kind: input, shape index: {}]   ;;  %s12154_s2 = inlined_call_operand.hbm [shape: f32[1,256], index: 2, kind: input, shape index: {}]   ;;  %s12155_s3 = inlined_call_operand.hbm [shape: bf16[256,512], index: 3, kind: input, shape index: {}]   ;;  %s12156_s4 = inlined_call_operand.vmem [shape: f32[1,512], index: 4, kind: input, shape index: {}]   ;;  %s12157_s5 = inlined_call_operand.hbm [shape: bf16[512,512], index: 5, kind: input, shape index: {}]   ;;  %s12158_s6 = inlined_call_operand.vmem [shape: f32[1,512], index: 6, kind: input, shape index: {}]   ;;  %s12159_s7 = inlined_call_operand.hbm [shape: bf16[256,512], index: 7, kind: input, shape index: {}]   ;;  %s12160_s8 = inlined_call_operand.vmem [shape: f32[1,512], index: 8, kind: input, shape index: {}]   ;;  %s12161_s9 = inlined_call_operand.hbm [shape: bf16[512,512], index: 9, kind: input, shape index: {}]   ;;  %s12162_s10 = inlined_call_operand.vmem [shape: f32[1,512], index: 10, kind: input, shape index: {}]   ;;  %s12163_s11 = inlined_call_operand.hbm [shape: bf16[512,512], index: 11, kind: input, shape index: {}]   ;;  %s12164_s12 = inlined_call_operand.vmem [shape: f32[1,512], index: 12, kind: input, shape index: {}]   ;;  %s12165_s13 = inlined_call_operand.hbm [shape: bf16[512,512], index: 13, kind: input, shape index: {}]   ;;  %s12166_s14 = inlined_call_operand.vmem [shape: f32[1,512], index: 14, kind: input, shape index: {}]   ;;  %s12167_s15 = inlined_call_operand.hbm [shape: bf16[512,512], index: 15, kind: input, shape index: {}]   ;;  %s12168_s16 = inlined_call_operand.vmem [shape: f32[1,512], index: 16, kind: input, shape index: {}]   ;;  %s12169_s17 = inlined_call_operand.hbm [shape: bf16[512,512], index: 17, kind: input, shape index: {}]   ;;  %s12170_s18 = inlined_call_operand.vmem [shape: f32[1,512], index: 18, kind: input, shape index: {}]   ;;  %s12171_s19 = inlined_call_operand.hbm [shape: bf16[512,512], index: 19, kind: input, shape index: {}]   ;;  %s12172_s20 = inlined_call_operand.vmem [shape: f32[1,512], index: 20, kind: input, shape index: {}]   ;;  %s12173_s21 = inlined_call_operand.hbm [shape: bf16[512,128], index: 21, kind: input, shape index: {}]   ;;  %s12174_s22 = inlined_call_operand.vmem [shape: f32[1,128], index: 22, kind: input, shape index: {}]   ;;  %s12175_s23 = inlined_call_operand.hbm [shape: f32[8,128], index: 23, kind: output, shape index: {}]  }
   0x1   :  { %12183 = sst [smem:[#allocation32_spill]] %s12152_s0 }
   0x2   :  { %12184 = sst [smem:[#allocation33_spill]] %s12153_s1 }
   0x3   :  { %12185 = sst [smem:[#allocation34_spill]] %s12154_s2 }
   0x4   :  { %12186 = sst [smem:[#allocation35_spill]] %s12155_s3 }
   0x5   :  { %12187 = sst [smem:[#allocation36_spill]] %s12156_s4 }
   0x6   :  { %12188 = sst [smem:[#allocation37_spill]] %s12157_s5 }
   0x7   :  { %12189 = sst [smem:[#allocation38_spill]] %s12158_s6 }
   0x8   :  { %12190 = sst [smem:[#allocation39_spill]] %s12159_s7 }
   0x9   :  { %12191 = sst [smem:[#allocation40_spill]] %s12172_s20 }
   0xa   :  { %12192 = sst [smem:[#allocation41_spill]] %s12174_s22 }
   0xb   :  { %12193 = sst [smem:[#allocation42_spill]] %s12175_s23 }
   0xc   :  { %28 = vsyncpa [#allocation3], 0 }
   0xd   :  { %29 = vsyncpa [#allocation6], 0 }
   0xe   :  { %30 = vsyncpa [#allocation9], 0 }
   0xf   :  { %31 = vsyncpa [#allocation12], 0 }
  0x10   :  { %32 = vsyncpa [#allocation15], 0 }
  0x11   :  { %33 = vsyncpa [#allocation18], 0 }
  0x12   :  { %34 = vsyncpa [#allocation21], 0 }
  0x13   :  { %35 = vsyncpa [#allocation4], 0  ;;  %s11593_s4 = smov [#allocation5]   ;;  %s12194_s5 = sld [smem:[#allocation33_spill]] }
  0x14   :  { %s51_s30 = sshll.u32 %s11593_s4, 4  ;;  %s52_s30 = int_to_ptr.vmem [resolvable:$true] %s51_s30 }
  0x19   :  { %s11269_s1 = scalar_lea.hbm %s12194_s5, 256 }
  0x1a   :  { %p11270_p0 = scmp.ne.s32.totalorder %s12194_s5, %s11269_s1  ;;  %p11273_p1 = scmp.lt.u32.totalorder %s11269_s1, %s12194_s5 }
  0x1c   :  { %p11275_p2 = pnand %p11273_p1, %p11270_p0 }
  0x1e   :  { %11278 = shalt.err (!%p11275_p2)
}
  0x1f   :  { %s11279_s7 = scalar_lea.vmem %s52_s30, 256  ;;  %p11284_p4 = scmp.lt.s32.totalorder %s52_s30, %s52_s30 }
  0x20   :  { %p11280_p3 = scmp.ne.s32.totalorder %s52_s30, %s11279_s7  ;;  %p11285_p5 = scmp.lt.s32.totalorder %s11279_s7, %s11279_s7 }
  0x22   :  { %p11286_p6 = por %p11285_p5, %p11284_p4 }
  0x24   :  { %p11287_p7 = pnand %p11286_p6, %p11280_p3 }
  0x26   :  { %11290 = shalt.err (!%p11287_p7)
}
  0x27   :  { %s11594_s28 = smov 128   ;;  %s11595_s29 = smov 8  }
  0x28   :  { %57 = dma.hbm_to_vmem [thread:$0]  %s12194_s5, 256, %s52_s30, [#allocation6], %s11594_s28, %s11594_s28, %s11595_s29  }
  0x29   :  { %s11596_s4 = smov [#allocation8]   ;;  %s12195_s26 = sld [smem:[#allocation35_spill]] }
  0x2a   :  { %s73_s24 = sshll.u32 %s11596_s4, 4  ;;  %s74_s24 = int_to_ptr.vmem [resolvable:$true] %s73_s24 }
  0x2f   :  { %s11291_s2 = scalar_lea.hbm %s12195_s26, 8192 }
  0x30   :  { %p11292_p8 = scmp.ne.s32.totalorder %s12195_s26, %s11291_s2  ;;  %p11295_p9 = scmp.lt.u32.totalorder %s11291_s2, %s12195_s26 }
  0x32   :  { %p11297_p10 = pnand %p11295_p9, %p11292_p8 }
  0x34   :  { %11300 = shalt.err (!%p11297_p10)
}
  0x35   :  { %s11301_s22 = scalar_lea.vmem %s74_s24, 8192  ;;  %p11306_p12 = scmp.lt.s32.totalorder %s74_s24, %s74_s24 }
  0x36   :  { %p11302_p11 = scmp.ne.s32.totalorder %s74_s24, %s11301_s22  ;;  %p11307_p13 = scmp.lt.s32.totalorder %s11301_s22, %s11301_s22 }
  0x38   :  { %p11308_p0 = por %p11307_p13, %p11306_p12 }
  0x3a   :  { %p11309_p1 = pnand %p11308_p0, %p11302_p11 }
  0x3c   :  { %11312 = shalt.err (!%p11309_p1)
}
  0x3d   :  { %s11597_s30 = smov 256   ;;  %s11598_s5 = smov 16  }
  0x3e   :  { %79 = dma.hbm_to_vmem [thread:$0]  %s12195_s26, 8192, %s74_s24, [#allocation9], %s11597_s30, %s11597_s30, %s11598_s5  }
  0x3f   :  { %s11599_s23 = smov [#allocation11]   ;;  %s11600_s0 = smov [#allocation14]  }
  0x40   :  { %s101_s3 = sshll.u32 %s11599_s23, 4  ;;  %s129_s4 = sshll.u32 %s11600_s0, 4  ;;  %s102_s3 = int_to_ptr.vmem [resolvable:$true] %s101_s3  ;;  %s11762_s4 = int_to_ptr.vmem [resolvable:$true] %s129_s4 }
  0x41   :  { %s12196_s1 = sld [smem:[#allocation39_spill]] }
  0x47   :  { %s11313_s2 = scalar_lea.hbm %s12196_s1, 8192 }
  0x48   :  { %p11314_p2 = scmp.ne.s32.totalorder %s12196_s1, %s11313_s2  ;;  %p11317_p3 = scmp.lt.u32.totalorder %s11313_s2, %s12196_s1 }
  0x4a   :  { %p11319_p4 = pnand %p11317_p3, %p11314_p2 }
  0x4c   :  { %11322 = shalt.err (!%p11319_p4)
}
  0x4d   :  { %s11323_s24 = scalar_lea.vmem %s102_s3, 8192  ;;  %p11328_p6 = scmp.lt.s32.totalorder %s102_s3, %s102_s3 }
  0x4e   :  { %p11324_p5 = scmp.ne.s32.totalorder %s102_s3, %s11323_s24  ;;  %p11329_p7 = scmp.lt.s32.totalorder %s11323_s24, %s11323_s24 }
  0x50   :  { %p11330_p8 = por %p11329_p7, %p11328_p6 }
  0x52   :  { %p11331_p9 = pnand %p11330_p8, %p11324_p5 }
  0x54   :  { %11334 = shalt.err (!%p11331_p9)
}
  0x55   :  { %107 = dma.hbm_to_vmem [thread:$0]  %s12196_s1, 8192, %s102_s3, [#allocation12], %s11597_s30, %s11597_s30, %s11598_s5  }
  0x56   :  { %s11335_s20 = scalar_lea.hbm %s12163_s11, 16384 }
  0x57   :  { %p11336_p10 = scmp.ne.s32.totalorder %s12163_s11, %s11335_s20  ;;  %p11339_p11 = scmp.lt.u32.totalorder %s11335_s20, %s12163_s11 }
  0x59   :  { %p11341_p12 = pnand %p11339_p11, %p11336_p10 }
  0x5b   :  { %11344 = shalt.err (!%p11341_p12)
}
  0x5c   :  { %s11345_s6 = scalar_lea.vmem %s11762_s4, 16384  ;;  %p11350_p0 = scmp.lt.s32.totalorder %s11762_s4, %s11762_s4 }
  0x5d   :  { %p11346_p13 = scmp.ne.s32.totalorder %s11762_s4, %s11345_s6  ;;  %p11351_p1 = scmp.lt.s32.totalorder %s11345_s6, %s11345_s6 }
  0x5f   :  { %p11352_p2 = por %p11351_p1, %p11350_p0 }
  0x61   :  { %p11353_p3 = pnand %p11352_p2, %p11346_p13 }
  0x63   :  { %11356 = shalt.err (!%p11353_p3)
}
  0x64   :  { %135 = dma.hbm_to_vmem [thread:$0]  %s12163_s11, 16384, %s11762_s4, [#allocation15], %s11597_s30, %s11597_s30, %s11598_s5  }
  0x65   :  { %s11601_s27 = smov [#allocation17]   ;;  %s11602_s24 = smov [#allocation20]  }
  0x66   :  { %s157_s7 = sshll.u32 %s11601_s27, 4  ;;  %s185_s26 = sshll.u32 %s11602_s24, 4  ;;  %s158_s7 = int_to_ptr.vmem [resolvable:$true] %s157_s7  ;;  %s11799_s26 = int_to_ptr.vmem [resolvable:$true] %s185_s26 }
  0x67   :  { %s11357_s23 = scalar_lea.hbm %s12167_s15, 16384 }
  0x68   :  { %p11358_p4 = scmp.ne.s32.totalorder %s12167_s15, %s11357_s23  ;;  %p11361_p5 = scmp.lt.u32.totalorder %s11357_s23, %s12167_s15 }
  0x6a   :  { %p11363_p6 = pnand %p11361_p5, %p11358_p4 }
  0x6c   :  { %11366 = shalt.err (!%p11363_p6)
}
  0x6d   :  { %s11367_s11 = scalar_lea.vmem %s158_s7, 16384  ;;  %p11372_p8 = scmp.lt.s32.totalorder %s158_s7, %s158_s7 }
  0x6e   :  { %p11368_p7 = scmp.ne.s32.totalorder %s158_s7, %s11367_s11  ;;  %p11373_p9 = scmp.lt.s32.totalorder %s11367_s11, %s11367_s11 }
  0x70   :  { %p11374_p10 = por %p11373_p9, %p11372_p8 }
  0x72   :  { %p11375_p11 = pnand %p11374_p10, %p11368_p7 }
  0x74   :  { %11378 = shalt.err (!%p11375_p11)
}
  0x75   :  { %163 = dma.hbm_to_vmem [thread:$0]  %s12167_s15, 16384, %s158_s7, [#allocation18], %s11597_s30, %s11597_s30, %s11598_s5  }
  0x76   :  { %s11379_s1 = scalar_lea.hbm %s12171_s19, 16384 }
  0x77   :  { %p11380_p12 = scmp.ne.s32.totalorder %s12171_s19, %s11379_s1  ;;  %p11383_p13 = scmp.lt.u32.totalorder %s11379_s1, %s12171_s19 }
  0x79   :  { %p11385_p0 = pnand %p11383_p13, %p11380_p12 }
  0x7b   :  { %11388 = shalt.err (!%p11385_p0)
}
  0x7c   :  { %s11389_s23 = scalar_lea.vmem %s11799_s26, 16384  ;;  %p11394_p2 = scmp.lt.s32.totalorder %s11799_s26, %s11799_s26 }
  0x7d   :  { %p11390_p1 = scmp.ne.s32.totalorder %s11799_s26, %s11389_s23  ;;  %p11395_p3 = scmp.lt.s32.totalorder %s11389_s23, %s11389_s23 }
  0x7f   :  { %p11396_p4 = por %p11395_p3, %p11394_p2 }
  0x81   :  { %p11397_p5 = pnand %p11396_p4, %p11390_p1 }
  0x83   :  { %11400 = shalt.err (!%p11397_p5)
}
  0x84   :  { %191 = dma.hbm_to_vmem [thread:$0]  %s12171_s19, 16384, %s11799_s26, [#allocation21], %s11597_s30, %s11597_s30, %s11598_s5  }
  0x85   :  { %s11603_s20 = smov [#allocation2]   ;;  %s11604_s22 = smov [#allocation7]  }
  0x86   :  { %s42_s0 = sshll.u32 %s11603_s20, 4  ;;  %s64_s25 = sshll.u32 %s11604_s22, 4  ;;  %s43_s0 = int_to_ptr.vmem [resolvable:$true] %s42_s0  ;;  %s65_s25 = int_to_ptr.vmem [resolvable:$true] %s64_s25 }
  0x87   :  { %s12197_s2 = sld [smem:[#allocation32_spill]] }
  0x8d   :  { %s11401_s6 = scalar_lea.hbm %s12197_s2, 128 }
  0x8e   :  { %p11402_p6 = scmp.ne.s32.totalorder %s12197_s2, %s11401_s6  ;;  %p11405_p7 = scmp.lt.u32.totalorder %s11401_s6, %s12197_s2 }
  0x90   :  { %p11407_p8 = pnand %p11405_p7, %p11402_p6 }
  0x92   :  { %11410 = shalt.err (!%p11407_p8)
}
  0x93   :  { %s11411_s19 = scalar_lea.vmem %s43_s0, 128  ;;  %p11416_p10 = scmp.lt.s32.totalorder %s43_s0, %s43_s0 }
  0x94   :  { %p11412_p9 = scmp.ne.s32.totalorder %s43_s0, %s11411_s19  ;;  %p11417_p11 = scmp.lt.s32.totalorder %s11411_s19, %s11411_s19 }
  0x96   :  { %p11418_p12 = por %p11417_p11, %p11416_p10 }
  0x98   :  { %p11419_p13 = pnand %p11418_p12, %p11412_p9 }
  0x9a   :  { %11422 = shalt.err (!%p11419_p13)
}
  0x9b   :  { %45 = dma.hbm_to_vmem [thread:$0]  %s12197_s2, 128, %s43_s0, [#allocation3]  }
  0x9c   :  { %s12198_s15 = sld [smem:[#allocation34_spill]] }
  0xa2   :  { %s11423_s7 = scalar_lea.hbm %s12198_s15, 32 }
  0xa3   :  { %p11424_p0 = scmp.ne.s32.totalorder %s12198_s15, %s11423_s7  ;;  %p11427_p1 = scmp.lt.u32.totalorder %s11423_s7, %s12198_s15 }
  0xa5   :  { %p11429_p2 = pnand %p11427_p1, %p11424_p0 }
  0xa7   :  { %11432 = shalt.err (!%p11429_p2)
}
  0xa8   :  { %s11433_s6 = scalar_lea.vmem %s65_s25, 32  ;;  %p11438_p4 = scmp.lt.s32.totalorder %s65_s25, %s65_s25 }
  0xa9   :  { %p11434_p3 = scmp.ne.s32.totalorder %s65_s25, %s11433_s6  ;;  %p11439_p5 = scmp.lt.s32.totalorder %s11433_s6, %s11433_s6 }
  0xab   :  { %p11440_p6 = por %p11439_p5, %p11438_p4 }
  0xad   :  { %p11441_p7 = pnand %p11440_p6, %p11434_p3 }
  0xaf   :  { %11444 = shalt.err (!%p11441_p7)
}
  0xb0   :  { %67 = dma.hbm_to_vmem [thread:$0]  %s12198_s15, 32, %s65_s25, [#allocation6]  }
  0xb1   :  { %s11605_s3 = smov [#allocation10]   ;;  %s11606_s27 = smov [#allocation13]  }
  0xb2   :  { %s87_s1 = sshll.u32 %s11605_s3, 4  ;;  %s115_s24 = sshll.u32 %s11606_s27, 4  ;;  %s88_s1 = int_to_ptr.vmem [resolvable:$true] %s87_s1  ;;  %s11860_s24 = int_to_ptr.vmem [resolvable:$true] %s115_s24 }
  0xb3   :  { %s12199_s28 = sld [smem:[#allocation37_spill]] }
  0xb9   :  { %s11445_s29 = scalar_lea.hbm %s12199_s28, 16384 }
  0xba   :  { %p11446_p8 = scmp.ne.s32.totalorder %s12199_s28, %s11445_s29  ;;  %p11449_p9 = scmp.lt.u32.totalorder %s11445_s29, %s12199_s28 }
  0xbc   :  { %p11451_p10 = pnand %p11449_p9, %p11446_p8 }
  0xbe   :  { %11454 = shalt.err (!%p11451_p10)
}
  0xbf   :  { %s11455_s25 = scalar_lea.vmem %s88_s1, 16384  ;;  %p11460_p12 = scmp.lt.s32.totalorder %s88_s1, %s88_s1 }
  0xc0   :  { %p11456_p11 = scmp.ne.s32.totalorder %s88_s1, %s11455_s25  ;;  %p11461_p13 = scmp.lt.s32.totalorder %s11455_s25, %s11455_s25 }
  0xc2   :  { %p11462_p0 = por %p11461_p13, %p11460_p12 }
  0xc4   :  { %p11463_p1 = pnand %p11462_p0, %p11456_p11 }
  0xc6   :  { %11466 = shalt.err (!%p11463_p1)
}
  0xc7   :  { %93 = dma.hbm_to_vmem [thread:$0]  %s12199_s28, 16384, %s88_s1, [#allocation9], %s11597_s30, %s11597_s30, %s11598_s5  }
  0xc8   :  { %s11467_s0 = scalar_lea.hbm %s12161_s9, 16384 }
  0xc9   :  { %p11468_p2 = scmp.ne.s32.totalorder %s12161_s9, %s11467_s0  ;;  %p11471_p3 = scmp.lt.u32.totalorder %s11467_s0, %s12161_s9 }
  0xcb   :  { %p11473_p4 = pnand %p11471_p3, %p11468_p2 }
  0xcd   :  { %11476 = shalt.err (!%p11473_p4)
}
  0xce   :  { %s11477_s26 = scalar_lea.vmem %s11860_s24, 16384  ;;  %p11482_p6 = scmp.lt.s32.totalorder %s11860_s24, %s11860_s24 }
  0xcf   :  { %p11478_p5 = scmp.ne.s32.totalorder %s11860_s24, %s11477_s26  ;;  %p11483_p7 = scmp.lt.s32.totalorder %s11477_s26, %s11477_s26 }
  0xd1   :  { %p11484_p8 = por %p11483_p7, %p11482_p6 }
  0xd3   :  { %p11485_p9 = pnand %p11484_p8, %p11478_p5 }
  0xd5   :  { %11488 = shalt.err (!%p11485_p9)
}
  0xd6   :  { %121 = dma.hbm_to_vmem [thread:$0]  %s12161_s9, 16384, %s11860_s24, [#allocation12], %s11597_s30, %s11597_s30, %s11598_s5  }
  0xd7   :  { %s11607_s29 = smov [#allocation16]   ;;  %s11608_s7 = smov [#allocation19]  }
  0xd8   :  { %s143_s23 = sshll.u32 %s11607_s29, 4  ;;  %s171_s20 = sshll.u32 %s11608_s7, 4  ;;  %s144_s23 = int_to_ptr.vmem [resolvable:$true] %s143_s23  ;;  %s11897_s20 = int_to_ptr.vmem [resolvable:$true] %s171_s20 }
  0xd9   :  { %s11489_s15 = scalar_lea.hbm %s12165_s13, 16384 }
  0xda   :  { %p11490_p10 = scmp.ne.s32.totalorder %s12165_s13, %s11489_s15  ;;  %p11493_p11 = scmp.lt.u32.totalorder %s11489_s15, %s12165_s13 }
  0xdc   :  { %p11495_p12 = pnand %p11493_p11, %p11490_p10 }
  0xde   :  { %11498 = shalt.err (!%p11495_p12)
}
  0xdf   :  { %s11499_s9 = scalar_lea.vmem %s144_s23, 16384  ;;  %p11504_p0 = scmp.lt.s32.totalorder %s144_s23, %s144_s23 }
  0xe0   :  { %p11500_p13 = scmp.ne.s32.totalorder %s144_s23, %s11499_s9  ;;  %p11505_p1 = scmp.lt.s32.totalorder %s11499_s9, %s11499_s9 }
  0xe2   :  { %p11506_p2 = por %p11505_p1, %p11504_p0 }
  0xe4   :  { %p11507_p3 = pnand %p11506_p2, %p11500_p13 }
  0xe6   :  { %11510 = shalt.err (!%p11507_p3)
}
  0xe7   :  { %149 = dma.hbm_to_vmem [thread:$0]  %s12165_s13, 16384, %s144_s23, [#allocation15], %s11597_s30, %s11597_s30, %s11598_s5  }
  0xe8   :  { %s11511_s19 = scalar_lea.hbm %s12169_s17, 16384 }
  0xe9   :  { %p11512_p4 = scmp.ne.s32.totalorder %s12169_s17, %s11511_s19  ;;  %p11515_p5 = scmp.lt.u32.totalorder %s11511_s19, %s12169_s17 }
  0xeb   :  { %p11517_p6 = pnand %p11515_p5, %p11512_p4 }
  0xed   :  { %11520 = shalt.err (!%p11517_p6)
}
  0xee   :  { %s11521_s7 = scalar_lea.vmem %s11897_s20, 16384  ;;  %p11526_p8 = scmp.lt.s32.totalorder %s11897_s20, %s11897_s20 }
  0xef   :  { %p11522_p7 = scmp.ne.s32.totalorder %s11897_s20, %s11521_s7  ;;  %p11527_p9 = scmp.lt.s32.totalorder %s11521_s7, %s11521_s7 }
  0xf1   :  { %p11528_p10 = por %p11527_p9, %p11526_p8 }
  0xf3   :  { %p11529_p11 = pnand %p11528_p10, %p11522_p7 }
  0xf5   :  { %11532 = shalt.err (!%p11529_p11)
}
  0xf6   :  { %177 = dma.hbm_to_vmem [thread:$0]  %s12169_s17, 16384, %s11897_s20, [#allocation18], %s11597_s30, %s11597_s30, %s11598_s5  }
  0xf7   :  { %s11609_s22 = smov [#allocation22]   ;;  %s11533_s4 = scalar_lea.hbm %s12173_s21, 4096 }
  0xf8   :  { %s199_s25 = sshll.u32 %s11609_s22, 4  ;;  %p11534_p12 = scmp.ne.s32.totalorder %s12173_s21, %s11533_s4  ;;  %s200_s25 = int_to_ptr.vmem [resolvable:$true] %s199_s25 }
  0xf9   :  { %p11537_p13 = scmp.lt.u32.totalorder %s11533_s4, %s12173_s21 }
  0xfb   :  { %p11539_p0 = pnand %p11537_p13, %p11534_p12 }
  0xfd   :  { %11542 = shalt.err (!%p11539_p0)
}
  0xfe   :  { %s11543_s2 = scalar_lea.vmem %s200_s25, 4096  ;;  %p11548_p2 = scmp.lt.s32.totalorder %s200_s25, %s200_s25 }
  0xff   :  { %p11544_p1 = scmp.ne.s32.totalorder %s200_s25, %s11543_s2  ;;  %p11549_p3 = scmp.lt.s32.totalorder %s11543_s2, %s11543_s2 }
 0x101   :  { %p11550_p4 = por %p11549_p3, %p11548_p2 }
 0x103   :  { %p11551_p5 = pnand %p11550_p4, %p11544_p1 }
 0x105   :  { %11554 = shalt.err (!%p11551_p5)
}
 0x106   :  { %s11610_s17 = smov 64   ;;  %s11611_s30 = smov 4  }
 0x107   :  { %205 = dma.hbm_to_vmem [thread:$0]  %s12173_s21, 4096, %s200_s25, [#allocation21], %s11610_s17, %s11610_s17, %s11611_s30  }
 0x108   :  { %11577 = dma.done.wait [#allocation3], 128  }
 0x109   :  { %11578 = vsyncadd [#allocation3], 4294967168 }
 0x10a   :  { %11579 = dma.done.wait [#allocation6], 288  }
 0x10b   :  { %11580 = vsyncadd [#allocation6], 4294967008 }
 0x10c   :  { %11581 = dma.done.wait [#allocation9], 24576  }
 0x10d   :  { %11582 = vsyncadd [#allocation9], 4294942720 }
 0x10e   :  { %11583 = dma.done.wait [#allocation12], 24576  }
 0x10f   :  { %11584 = vsyncadd [#allocation12], 4294942720 }
 0x110   :  { %11585 = dma.done.wait [#allocation15], 32768  }
 0x111   :  { %11586 = vsyncadd [#allocation15], 4294934528 }
 0x112   :  { %11587 = dma.done.wait [#allocation18], 32768  }
 0x113   :  { %11588 = vsyncadd [#allocation18], 4294934528 }
 0x114   :  { %11589 = dma.done.wait [#allocation21], 20480  }
 0x115   :  { %11590 = vsyncadd [#allocation21], 4294946816  ;;  %v11612_v0 = vmov 0   ;;  %v9698_v1 = vld [vmem:[#allocation5 + $0x4] ss:$8 sps:$4 sm:$0xff]   ;;  %v248_v3 = vld [vmem:[#allocation2] sm:$0xff] }
 0x116   :  { %310 = vmatprep.mubr.bf16.mxu0 %v11612_v0  ;;  %v9700_v2 = vld [vmem:[#allocation5] ss:$8 sps:$4 sm:$0xff]   ;;  %278 = vmatprep.subr.bf16.mxu0 %v9698_v1  ;;  %v249_v4 = vpack.c.bf16 %v248_v3, %v248_v3  ;;  %vm274_vm0 = vcmask 130048   ;;  %s12200_s27 = sld [smem:[#allocation36_spill]]  ;;  %s12201_s1 = sld [smem:[#allocation38_spill]]  ;;  %vm2279_vm1 = vcmask 785408  }
 0x117   :  { %v9701_v5 = vld [vmem:[#allocation8 + $0x4] ss:$16 sps:$4 sm:$0xff]   ;;  %279 = vmatpush1.bf16.msra.mxu0 %v9700_v2  ;;  %v9703_v6 = vld [vmem:[#allocation8 + $0x8] ss:$16 sps:$4 sm:$0xff]   ;;  %v9705_v7 = vld [vmem:[#allocation8 + $0xc] ss:$16 sps:$4 sm:$0xff]  }
 0x118   :  { %727 = vmatprep.subr.bf16.mxu1 %v9701_v5  ;;  %v9706_v8 = vld [vmem:[#allocation8] ss:$16 sps:$4 sm:$0xff]   ;;  %768 = vmatprep.subr.bf16.mxu0 %v9705_v7  ;;  %v9707_v9 = vld [vmem:[#allocation8 + $0x24] ss:$16 sps:$4 sm:$0xff]   ;;  %v9709_v10 = vld [vmem:[#allocation8 + $0x28] ss:$16 sps:$4 sm:$0xff]   ;;  %v254_v7 = vlaneseq }
 0x119   :  { %728 = vmatpush1.bf16.msra.mxu1 %v9706_v8  ;;  %v9711_v11 = vld [vmem:[#allocation8 + $0x2c] ss:$16 sps:$4 sm:$0xff]   ;;  %v9712_v12 = vld [vmem:[#allocation8 + $0x20] ss:$16 sps:$4 sm:$0xff]   ;;  %v9713_v13 = vld [vmem:[#allocation8 + $0x44] ss:$16 sps:$4 sm:$0xff]  }
 0x11a   :  { %8452 = vmatmul.mubr.msk.bf16.vlgmr.msra.gmra.mrb[0].mxu0 %vm274_vm0, %v249_v4  ;;  %729 = vmatprep.subr.bf16.mxu1 %v9707_v9  ;;  %v9717_v14 = vld [vmem:[#allocation8 + $0x4c] ss:$16 sps:$4 sm:$0xff]   ;;  %v9718_v15 = vld [vmem:[#allocation8 + $0x40] ss:$16 sps:$4 sm:$0xff]   ;;  %v9715_v16 = vld [vmem:[#allocation8 + $0x48] ss:$16 sps:$4 sm:$0xff]  }
 0x11b   :  { %769 = vmatpush1.bf16.msra.mxu0 %v9703_v6  ;;  %v9719_v17 = vld [vmem:[#allocation8 + $0x64] ss:$16 sps:$4 sm:$0xff]   ;;  %v9723_v18 = vld [vmem:[#allocation8 + $0x6c] ss:$16 sps:$4 sm:$0xff]   ;;  %v9721_v19 = vld [vmem:[#allocation8 + $0x68] ss:$16 sps:$4 sm:$0xff]  }
 0x11c   :  { %770 = vmatprep.subr.bf16.mxu0 %v9711_v11  ;;  %v9724_v20 = vld [vmem:[#allocation8 + $0x60] ss:$16 sps:$4 sm:$0xff]   ;;  %v9725_v21 = vld [vmem:[#allocation8 + $0x84] ss:$16 sps:$4 sm:$0xff]   ;;  %v9729_v22 = vld [vmem:[#allocation8 + $0x8c] ss:$16 sps:$4 sm:$0xff]  }
 0x11d   :  { %730 = vmatpush1.bf16.msra.mxu1 %v9712_v12  ;;  %v9730_v23 = vld [vmem:[#allocation8 + $0x80] ss:$16 sps:$4 sm:$0xff]   ;;  %v9727_v24 = vld [vmem:[#allocation8 + $0x88] ss:$16 sps:$4 sm:$0xff]   ;;  %v9731_v25 = vld [vmem:[#allocation8 + $0xa4] ss:$16 sps:$4 sm:$0xff]  }
 0x11e   :  { %731 = vmatprep.subr.bf16.mxu1 %v9713_v13  ;;  %v9735_v26 = vld [vmem:[#allocation8 + $0xac] ss:$16 sps:$4 sm:$0xff]   ;;  %v9733_v27 = vld [vmem:[#allocation8 + $0xa8] ss:$16 sps:$4 sm:$0xff]   ;;  %v9736_v28 = vld [vmem:[#allocation8 + $0xa0] ss:$16 sps:$4 sm:$0xff]  }
 0x11f   :  { %771 = vmatpush1.bf16.msra.mxu0 %v9709_v10  ;;  %v9737_v29 = vld [vmem:[#allocation8 + $0xc4] ss:$16 sps:$4 sm:$0xff]   ;;  %v9741_v30 = vld [vmem:[#allocation8 + $0xcc] ss:$16 sps:$4 sm:$0xff]   ;;  %v9742_v31 = vld [vmem:[#allocation8 + $0xc0] ss:$16 sps:$4 sm:$0xff]  }
 0x120   :  { %772 = vmatprep.subr.bf16.mxu0 %v9717_v14  ;;  %v9739_v32 = vld [vmem:[#allocation8 + $0xc8] ss:$16 sps:$4 sm:$0xff]   ;;  %v9743_v33 = vld [vmem:[#allocation8 + $0xe4] ss:$16 sps:$4 sm:$0xff]   ;;  %v9747_v34 = vld [vmem:[#allocation8 + $0xec] ss:$16 sps:$4 sm:$0xff]  }
 0x121   :  { %732 = vmatpush1.bf16.msra.mxu1 %v9718_v15  ;;  %v9745_v35 = vld [vmem:[#allocation8 + $0xe8] ss:$16 sps:$4 sm:$0xff]   ;;  %v9748_v36 = vld [vmem:[#allocation8 + $0xe0] ss:$16 sps:$4 sm:$0xff]   ;;  %v9749_v37 = vld [vmem:[#allocation8 + $0x104] ss:$16 sps:$4 sm:$0xff]  }
 0x122   :  { %733 = vmatprep.subr.bf16.mxu1 %v9719_v17  ;;  %v9753_v38 = vld [vmem:[#allocation8 + $0x10c] ss:$16 sps:$4 sm:$0xff]   ;;  %v9754_v39 = vld [vmem:[#allocation8 + $0x100] ss:$16 sps:$4 sm:$0xff]   ;;  %v9751_v40 = vld [vmem:[#allocation8 + $0x108] ss:$16 sps:$4 sm:$0xff]  }
 0x123   :  { %773 = vmatpush1.bf16.msra.mxu0 %v9715_v16  ;;  %v9755_v41 = vld [vmem:[#allocation8 + $0x124] ss:$16 sps:$4 sm:$0xff]   ;;  %v9759_v42 = vld [vmem:[#allocation8 + $0x12c] ss:$16 sps:$4 sm:$0xff]   ;;  %v9757_v43 = vld [vmem:[#allocation8 + $0x128] ss:$16 sps:$4 sm:$0xff]  }
 0x124   :  { %774 = vmatprep.subr.bf16.mxu0 %v9723_v18  ;;  %v9760_v44 = vld [vmem:[#allocation8 + $0x120] ss:$16 sps:$4 sm:$0xff]   ;;  %v9761_v45 = vld [vmem:[#allocation8 + $0x144] ss:$16 sps:$4 sm:$0xff]   ;;  %v9765_v46 = vld [vmem:[#allocation8 + $0x14c] ss:$16 sps:$4 sm:$0xff]  }
 0x125   :  { %734 = vmatpush1.bf16.msra.mxu1 %v9724_v20  ;;  %v9763_v47 = vld [vmem:[#allocation8 + $0x148] ss:$16 sps:$4 sm:$0xff]   ;;  %v9766_v48 = vld [vmem:[#allocation8 + $0x140] ss:$16 sps:$4 sm:$0xff]   ;;  %v9767_v49 = vld [vmem:[#allocation8 + $0x164] ss:$16 sps:$4 sm:$0xff]  }
 0x126   :  { %735 = vmatprep.subr.bf16.mxu1 %v9725_v21  ;;  %v9771_v50 = vld [vmem:[#allocation8 + $0x16c] ss:$16 sps:$4 sm:$0xff]   ;;  %v9772_v51 = vld [vmem:[#allocation8 + $0x160] ss:$16 sps:$4 sm:$0xff]   ;;  %v9769_v52 = vld [vmem:[#allocation8 + $0x168] ss:$16 sps:$4 sm:$0xff]  }
 0x127   :  { %775 = vmatpush1.bf16.msra.mxu0 %v9721_v19  ;;  %v9773_v53 = vld [vmem:[#allocation8 + $0x184] ss:$16 sps:$4 sm:$0xff]   ;;  %v9777_v54 = vld [vmem:[#allocation8 + $0x18c] ss:$16 sps:$4 sm:$0xff]   ;;  %v9778_v55 = vld [vmem:[#allocation8 + $0x180] ss:$16 sps:$4 sm:$0xff]  }
 0x128   :  { %776 = vmatprep.subr.bf16.mxu0 %v9729_v22  ;;  %v9775_v56 = vld [vmem:[#allocation8 + $0x188] ss:$16 sps:$4 sm:$0xff]   ;;  %v9779_v57 = vld [vmem:[#allocation8 + $0x1a4] ss:$16 sps:$4 sm:$0xff]   ;;  %v9783_v58 = vld [vmem:[#allocation8 + $0x1ac] ss:$16 sps:$4 sm:$0xff]  }
 0x129   :  { %736 = vmatpush1.bf16.msra.mxu1 %v9730_v23  ;;  %v9784_v59 = vld [vmem:[#allocation8 + $0x1a0] ss:$16 sps:$4 sm:$0xff]   ;;  %v9781_v60 = vld [vmem:[#allocation8 + $0x1a8] ss:$16 sps:$4 sm:$0xff]   ;;  %v9785_v61 = vld [vmem:[#allocation8 + $0x1c4] ss:$16 sps:$4 sm:$0xff]  }
 0x12a   :  { %737 = vmatprep.subr.bf16.mxu1 %v9731_v25  ;;  %v9789_v62 = vld [vmem:[#allocation8 + $0x1cc] ss:$16 sps:$4 sm:$0xff]   ;;  %v9787_v63 = vld [vmem:[#allocation8 + $0x1c8] ss:$16 sps:$4 sm:$0xff]   ;;  %v9790_v0 = vld [vmem:[#allocation8 + $0x1c0] ss:$16 sps:$4 sm:$0xff]  }
 0x12b   :  { %777 = vmatpush1.bf16.msra.mxu0 %v9727_v24  ;;  %v9791_v1 = vld [vmem:[#allocation8 + $0x1e4] ss:$16 sps:$4 sm:$0xff]   ;;  %v9795_v2 = vld [vmem:[#allocation8 + $0x1ec] ss:$16 sps:$4 sm:$0xff]   ;;  %v9793_v3 = vld [vmem:[#allocation8 + $0x1e8] ss:$16 sps:$4 sm:$0xff]  }
 0x12c   :  { %778 = vmatprep.subr.bf16.mxu0 %v9735_v26  ;;  %v9796_v4 = vld [vmem:[#allocation8 + $0x1e0] ss:$16 sps:$4 sm:$0xff]   ;;  %v9799_v5 = vld [vmem:[#allocation10 + $0x4] ss:$16 sps:$4 sm:$0xff]   ;;  %v9802_v6 = vld [vmem:[#allocation10 + $0xc] ss:$16 sps:$4 sm:$0xff]  }
 0x12d   :  { %738 = vmatpush1.bf16.msra.mxu1 %v9736_v28  ;;  %v11948_v8 = vshrl.u32 %v254_v7, 7  ;;  %v252_v9 = vld [vmem:[#allocation7] sm:$0x3]  ;;  %v9797_v19 = vld [vmem:[#allocation10] ss:$16 sps:$4 sm:$0xff]   ;;  %vm5186_vm2 = vcmask 523264  }
 0x12e   :  { %739 = vmatprep.subr.bf16.mxu1 %v9737_v29  ;;  %v9800_v20 = vld [vmem:[#allocation10 + $0x8] ss:$16 sps:$4 sm:$0xff]   ;;  %v9805_v22 = vld [vmem:[#allocation10 + $0x24] ss:$16 sps:$4 sm:$0xff]   ;;  %v9808_v23 = vld [vmem:[#allocation10 + $0x2c] ss:$16 sps:$4 sm:$0xff]  }
 0x12f   :  { %779 = vmatpush1.bf16.msra.mxu0 %v9733_v27  ;;  %v11951_v10 = vsub.s32 0, %v11948_v8  ;;  %v11954_v11 = vsub.s32 1, %v11948_v8  ;;  %v9803_v26 = vld [vmem:[#allocation10 + $0x20] ss:$16 sps:$4 sm:$0xff]   ;;  %v9806_v27 = vld [vmem:[#allocation10 + $0x28] ss:$16 sps:$4 sm:$0xff]  }
 0x130   :  { %780 = vmatprep.subr.bf16.mxu0 %v9741_v30  ;;  %v9811_v28 = vld [vmem:[#allocation10 + $0x44] ss:$16 sps:$4 sm:$0xff]   ;;  %v9814_v29 = vld [vmem:[#allocation10 + $0x4c] ss:$16 sps:$4 sm:$0xff]   ;;  %v9809_v30 = vld [vmem:[#allocation10 + $0x40] ss:$16 sps:$4 sm:$0xff]  }
 0x131   :  { %740 = vmatpush1.bf16.msra.mxu1 %v9742_v31  ;;  %v257_v12 = vrot.slane %v252_v9, %v11951_v10  ;;  %v261_v13 = vrot.slane %v252_v9, %v11954_v11  ;;  %v9812_v31 = vld [vmem:[#allocation10 + $0x48] ss:$16 sps:$4 sm:$0xff]   ;;  %v9877_v9 = vld [vmem:[#allocation10 + $0x1a4] ss:$16 sps:$4 sm:$0xff]   ;;  %s12202_s6 = sld [smem:[#allocation40_spill]]  ;;  %s12203_s9 = sld [smem:[#allocation41_spill]] }
 0x132   :  { %741 = vmatprep.subr.bf16.mxu1 %v9743_v33  ;;  %v9820_v33 = vld [vmem:[#allocation10 + $0x6c] ss:$16 sps:$4 sm:$0xff]   ;;  %v9872_v7 = vld [vmem:[#allocation10 + $0x188] ss:$16 sps:$4 sm:$0xff]   ;;  %s11614_s24 = smov [#allocation23]  }
 0x133   :  { %781 = vmatpush1.bf16.msra.mxu0 %v9739_v32  ;;  %v9817_v32 = vld [vmem:[#allocation10 + $0x64] ss:$16 sps:$4 sm:$0xff]   ;;  %s8435_s2 = sshll.u32 %s11614_s24, 4  ;;  %s8436_s2 = int_to_ptr.vmem [resolvable:$true] %s8435_s2 }
 0x134   :  { %782 = vmatprep.subr.bf16.mxu0 %v9747_v34  ;;  %v9815_v34 = vld [vmem:[#allocation10 + $0x60] ss:$16 sps:$4 sm:$0xff]   ;;  %p11560_p7 = scmp.lt.s32.totalorder %s8436_s2, %s8436_s2 }
 0x135   :  { %742 = vmatpush1.bf16.msra.mxu1 %v9748_v36  ;;  %v9823_v36 = vld [vmem:[#allocation10 + $0x84] ss:$16 sps:$4 sm:$0xff]  }
 0x136   :  { %743 = vmatprep.subr.bf16.mxu1 %v9749_v37  ;;  %v9826_v37 = vld [vmem:[#allocation10 + $0x8c] ss:$16 sps:$4 sm:$0xff]  }
 0x137   :  { %783 = vmatpush1.bf16.msra.mxu0 %v9745_v35  ;;  %v9818_v35 = vld [vmem:[#allocation10 + $0x68] ss:$16 sps:$4 sm:$0xff]  }
 0x138   :  { %784 = vmatprep.subr.bf16.mxu0 %v9753_v38  ;;  %v9821_v38 = vld [vmem:[#allocation10 + $0x80] ss:$16 sps:$4 sm:$0xff]  }
 0x139   :  { %744 = vmatpush1.bf16.msra.mxu1 %v9754_v39  ;;  %v9824_v39 = vld [vmem:[#allocation10 + $0x88] ss:$16 sps:$4 sm:$0xff]  }
 0x13a   :  { %745 = vmatprep.subr.bf16.mxu1 %v9755_v41  ;;  %v9832_v41 = vld [vmem:[#allocation10 + $0xac] ss:$16 sps:$4 sm:$0xff]  }
 0x13b   :  { %785 = vmatpush1.bf16.msra.mxu0 %v9751_v40  ;;  %v9829_v40 = vld [vmem:[#allocation10 + $0xa4] ss:$16 sps:$4 sm:$0xff]  }
 0x13c   :  { %786 = vmatprep.subr.bf16.mxu0 %v9759_v42  ;;  %v9827_v42 = vld [vmem:[#allocation10 + $0xa0] ss:$16 sps:$4 sm:$0xff]  }
 0x13d   :  { %746 = vmatpush1.bf16.msra.mxu1 %v9760_v44  ;;  %v9835_v44 = vld [vmem:[#allocation10 + $0xc4] ss:$16 sps:$4 sm:$0xff]  }
 0x13e   :  { %747 = vmatprep.subr.bf16.mxu1 %v9761_v45  ;;  %v9838_v45 = vld [vmem:[#allocation10 + $0xcc] ss:$16 sps:$4 sm:$0xff]  }
 0x13f   :  { %787 = vmatpush1.bf16.msra.mxu0 %v9757_v43  ;;  %v9830_v43 = vld [vmem:[#allocation10 + $0xa8] ss:$16 sps:$4 sm:$0xff]  }
 0x140   :  { %788 = vmatprep.subr.bf16.mxu0 %v9765_v46  ;;  %v9833_v46 = vld [vmem:[#allocation10 + $0xc0] ss:$16 sps:$4 sm:$0xff]  }
 0x141   :  { %748 = vmatpush1.bf16.msra.mxu1 %v9766_v48  ;;  %v9841_v48 = vld [vmem:[#allocation10 + $0xe4] ss:$16 sps:$4 sm:$0xff]  }
 0x142   :  { %749 = vmatprep.subr.bf16.mxu1 %v9767_v49  ;;  %v9844_v49 = vld [vmem:[#allocation10 + $0xec] ss:$16 sps:$4 sm:$0xff]  }
 0x143   :  { %789 = vmatpush1.bf16.msra.mxu0 %v9763_v47  ;;  %v9836_v47 = vld [vmem:[#allocation10 + $0xc8] ss:$16 sps:$4 sm:$0xff]  }
 0x144   :  { %790 = vmatprep.subr.bf16.mxu0 %v9771_v50  ;;  %v9839_v50 = vld [vmem:[#allocation10 + $0xe0] ss:$16 sps:$4 sm:$0xff]  }
 0x145   :  { %750 = vmatpush1.bf16.msra.mxu1 %v9772_v51  ;;  %v9842_v51 = vld [vmem:[#allocation10 + $0xe8] ss:$16 sps:$4 sm:$0xff]  }
 0x146   :  { %751 = vmatprep.subr.bf16.mxu1 %v9773_v53  ;;  %v9850_v53 = vld [vmem:[#allocation10 + $0x10c] ss:$16 sps:$4 sm:$0xff]  }
 0x147   :  { %791 = vmatpush1.bf16.msra.mxu0 %v9769_v52  ;;  %v9847_v52 = vld [vmem:[#allocation10 + $0x104] ss:$16 sps:$4 sm:$0xff]  }
 0x148   :  { %792 = vmatprep.subr.bf16.mxu0 %v9777_v54  ;;  %v9845_v54 = vld [vmem:[#allocation10 + $0x100] ss:$16 sps:$4 sm:$0xff]  }
 0x149   :  { %752 = vmatpush1.bf16.msra.mxu1 %v9778_v55  ;;  %v9848_v55 = vld [vmem:[#allocation10 + $0x108] ss:$16 sps:$4 sm:$0xff]  }
 0x14a   :  { %753 = vmatprep.subr.bf16.mxu1 %v9779_v57  ;;  %v9856_v57 = vld [vmem:[#allocation10 + $0x12c] ss:$16 sps:$4 sm:$0xff]  }
 0x14b   :  { %793 = vmatpush1.bf16.msra.mxu0 %v9775_v56  ;;  %v9853_v56 = vld [vmem:[#allocation10 + $0x124] ss:$16 sps:$4 sm:$0xff]  }
 0x14c   :  { %794 = vmatprep.subr.bf16.mxu0 %v9783_v58  ;;  %v9851_v58 = vld [vmem:[#allocation10 + $0x120] ss:$16 sps:$4 sm:$0xff]  }
 0x14d   :  { %754 = vmatpush1.bf16.msra.mxu1 %v9784_v59  ;;  %v9854_v59 = vld [vmem:[#allocation10 + $0x128] ss:$16 sps:$4 sm:$0xff]  }
 0x14e   :  { %755 = vmatprep.subr.bf16.mxu1 %v9785_v61  ;;  %v9862_v61 = vld [vmem:[#allocation10 + $0x14c] ss:$16 sps:$4 sm:$0xff]  }
 0x14f   :  { %795 = vmatpush1.bf16.msra.mxu0 %v9781_v60  ;;  %v9859_v60 = vld [vmem:[#allocation10 + $0x144] ss:$16 sps:$4 sm:$0xff]  }
 0x150   :  { %796 = vmatprep.subr.bf16.mxu0 %v9789_v62  ;;  %v9857_v62 = vld [vmem:[#allocation10 + $0x140] ss:$16 sps:$4 sm:$0xff]  }
 0x151   :  { %756 = vmatpush1.bf16.msra.mxu1 %v9790_v0  ;;  %v9865_v0 = vld [vmem:[#allocation10 + $0x164] ss:$16 sps:$4 sm:$0xff]  }
 0x152   :  { %757 = vmatprep.subr.bf16.mxu1 %v9791_v1  ;;  %v9868_v1 = vld [vmem:[#allocation10 + $0x16c] ss:$16 sps:$4 sm:$0xff]  }
 0x153   :  { %797 = vmatpush1.bf16.msra.mxu0 %v9787_v63  ;;  %v9860_v63 = vld [vmem:[#allocation10 + $0x148] ss:$16 sps:$4 sm:$0xff]  }
 0x154   :  { %798 = vmatprep.subr.bf16.mxu0 %v9795_v2  ;;  %v9863_v2 = vld [vmem:[#allocation10 + $0x160] ss:$16 sps:$4 sm:$0xff]  }
 0x155   :  { %758 = vmatpush1.bf16.msra.mxu1 %v9796_v4  ;;  %v9871_v4 = vld [vmem:[#allocation10 + $0x184] ss:$16 sps:$4 sm:$0xff]  }
 0x156   :  { %1607 = vmatprep.subr.bf16.mxu1 %v9799_v5  ;;  %v9874_v5 = vld [vmem:[#allocation10 + $0x18c] ss:$16 sps:$4 sm:$0xff]  }
 0x157   :  { %799 = vmatpush1.bf16.msra.mxu0 %v9793_v3  ;;  %v9866_v3 = vld [vmem:[#allocation10 + $0x168] ss:$16 sps:$4 sm:$0xff]  }
 0x158   :  { %1689 = vmatprep.subr.bf16.mxu0 %v9802_v6  ;;  %v9869_v6 = vld [vmem:[#allocation10 + $0x180] ss:$16 sps:$4 sm:$0xff]  }
 0x1ed   :  { %v312_v14 = vpop.f32.mrb[0].mxu0 }
 0x1ee   :  { %v313_v15 = vadd.f32 %v312_v14, %v257_v12  ;;  %v314_v16 = vpop.f32.mrb[1].mxu0  ;;  %v9880_v12 = vld [vmem:[#allocation10 + $0x1ac] ss:$16 sps:$4 sm:$0xff]   ;;  %v9878_v14 = vld [vmem:[#allocation10 + $0x1a8] ss:$16 sps:$4 sm:$0xff]  }
 0x1ef   :  { %v315_v17 = vadd.f32 %v314_v16, %v261_v13  ;;  %v316_v18 = vpop.f32.mrb[2].mxu0  ;;  %v9875_v13 = vld [vmem:[#allocation10 + $0x1a0] ss:$16 sps:$4 sm:$0xff]   ;;  %v9886_v16 = vld [vmem:[#allocation10 + $0x1cc] ss:$16 sps:$4 sm:$0xff]  }
 0x1f0   :  { %v317_v21 = vpop.f32.mrb[3].mxu0  ;;  %v11960_v25 = vpack.c.bf16 %v313_v15, %v313_v15  ;;  %v9883_v15 = vld [vmem:[#allocation10 + $0x1c4] ss:$16 sps:$4 sm:$0xff]   ;;  %v9884_v18 = vld [vmem:[#allocation10 + $0x1c8] ss:$16 sps:$4 sm:$0xff]  }
 0x1f1   :  { %v11958_v24 = vpack.c.bf16 %v315_v17, %v315_v17  ;;  %v9881_v17 = vld [vmem:[#allocation10 + $0x1c0] ss:$16 sps:$4 sm:$0xff]  }
 0x1f2   :  { %v9887_v21 = vld [vmem:[#allocation10 + $0x1e0] ss:$16 sps:$4 sm:$0xff]  }
 0x1f3   :  { %759 = vmatprep.mubr.bf16.mxu1 %v11958_v24  ;;  %800 = vmatprep.mubr.bf16.mxu0 %v11958_v24 }
 0x1f4   :  { %760 = vmatmul.mubr.bf16.vlgmr.msra.gmra.mrb[0].mxu1 %v11960_v25  ;;  %801 = vmatmul.mubr.bf16.vlgmr.msra.gmra.mrb[4].mxu0 %v11960_v25 }
 0x1f5   :  { %1608 = vmatpush1.bf16.msra.mxu1 %v9797_v19  ;;  %1690 = vmatpush1.bf16.msra.mxu0 %v9800_v20  ;;  %v9889_v19 = vld [vmem:[#allocation10 + $0x1e4] ss:$16 sps:$4 sm:$0xff]   ;;  %v9892_v20 = vld [vmem:[#allocation10 + $0x1ec] ss:$16 sps:$4 sm:$0xff]  }
 0x1f6   :  { %1609 = vmatprep.subr.bf16.mxu1 %v9805_v22  ;;  %1691 = vmatprep.subr.bf16.mxu0 %v9808_v23  ;;  %v9890_v22 = vld [vmem:[#allocation10 + $0x1e8] ss:$16 sps:$4 sm:$0xff]   ;;  %v9895_v23 = vld [vmem:[#allocation10 + $0x204] ss:$16 sps:$4 sm:$0xff]  }
 0x1f9   :  { %1610 = vmatpush1.bf16.msra.mxu1 %v9803_v26  ;;  %1692 = vmatpush1.bf16.msra.mxu0 %v9806_v27  ;;  %v9898_v26 = vld [vmem:[#allocation10 + $0x20c] ss:$16 sps:$4 sm:$0xff]   ;;  %v11969_v27 = vld [vmem:[%s12200_s27] sm:$0xf] }
 0x1fa   :  { %1611 = vmatprep.subr.bf16.mxu1 %v9811_v28  ;;  %1693 = vmatprep.subr.bf16.mxu0 %v9814_v29  ;;  %v11972_v28 = vsub.s32 3, %v11948_v8  ;;  %v390_v29 = vrot.slane %v11969_v27, %v11951_v10 }
 0x1fd   :  { %1612 = vmatpush1.bf16.msra.mxu1 %v9809_v30  ;;  %1694 = vmatpush1.bf16.msra.mxu0 %v9812_v31  ;;  %v394_v30 = vrot.slane %v11969_v27, %v11954_v11  ;;  %v402_v31 = vrot.slane %v11969_v27, %v11972_v28 }
 0x1fe   :  { %1613 = vmatprep.subr.bf16.mxu1 %v9817_v32  ;;  %1695 = vmatprep.subr.bf16.mxu0 %v9820_v33 }
 0x201   :  { %1614 = vmatpush1.bf16.msra.mxu1 %v9815_v34  ;;  %1696 = vmatpush1.bf16.msra.mxu0 %v9818_v35 }
 0x202   :  { %1615 = vmatprep.subr.bf16.mxu1 %v9823_v36  ;;  %1697 = vmatprep.subr.bf16.mxu0 %v9826_v37 }
 0x205   :  { %1616 = vmatpush1.bf16.msra.mxu1 %v9821_v38  ;;  %1698 = vmatpush1.bf16.msra.mxu0 %v9824_v39 }
 0x206   :  { %1617 = vmatprep.subr.bf16.mxu1 %v9829_v40  ;;  %1699 = vmatprep.subr.bf16.mxu0 %v9832_v41 }
 0x209   :  { %1618 = vmatpush1.bf16.msra.mxu1 %v9827_v42  ;;  %1700 = vmatpush1.bf16.msra.mxu0 %v9830_v43 }
 0x20a   :  { %1619 = vmatprep.subr.bf16.mxu1 %v9835_v44  ;;  %1701 = vmatprep.subr.bf16.mxu0 %v9838_v45  ;;  %v9893_v45 = vld [vmem:[#allocation10 + $0x200] ss:$16 sps:$4 sm:$0xff]  }
 0x20d   :  { %1620 = vmatpush1.bf16.msra.mxu1 %v9833_v46  ;;  %1702 = vmatpush1.bf16.msra.mxu0 %v9836_v47  ;;  %v9896_v46 = vld [vmem:[#allocation10 + $0x208] ss:$16 sps:$4 sm:$0xff]  }
 0x20e   :  { %1621 = vmatprep.subr.bf16.mxu1 %v9841_v48  ;;  %1703 = vmatprep.subr.bf16.mxu0 %v9844_v49  ;;  %v9901_v49 = vld [vmem:[#allocation10 + $0x224] ss:$16 sps:$4 sm:$0xff]  }
 0x211   :  { %1622 = vmatpush1.bf16.msra.mxu1 %v9839_v50  ;;  %1704 = vmatpush1.bf16.msra.mxu0 %v9842_v51  ;;  %v9904_v50 = vld [vmem:[#allocation10 + $0x22c] ss:$16 sps:$4 sm:$0xff]  }
 0x212   :  { %1623 = vmatprep.subr.bf16.mxu1 %v9847_v52  ;;  %1705 = vmatprep.subr.bf16.mxu0 %v9850_v53  ;;  %v9899_v52 = vld [vmem:[#allocation10 + $0x220] ss:$16 sps:$4 sm:$0xff]   ;;  %v9902_v53 = vld [vmem:[#allocation10 + $0x228] ss:$16 sps:$4 sm:$0xff]  }
 0x215   :  { %1624 = vmatpush1.bf16.msra.mxu1 %v9845_v54  ;;  %1706 = vmatpush1.bf16.msra.mxu0 %v9848_v55  ;;  %v9907_v55 = vld [vmem:[#allocation10 + $0x244] ss:$16 sps:$4 sm:$0xff]  }
 0x216   :  { %1625 = vmatprep.subr.bf16.mxu1 %v9853_v56  ;;  %1707 = vmatprep.subr.bf16.mxu0 %v9856_v57  ;;  %v9910_v56 = vld [vmem:[#allocation10 + $0x24c] ss:$16 sps:$4 sm:$0xff]   ;;  %v9905_v57 = vld [vmem:[#allocation10 + $0x240] ss:$16 sps:$4 sm:$0xff]  }
 0x219   :  { %1626 = vmatpush1.bf16.msra.mxu1 %v9851_v58  ;;  %1708 = vmatpush1.bf16.msra.mxu0 %v9854_v59  ;;  %v9908_v58 = vld [vmem:[#allocation10 + $0x248] ss:$16 sps:$4 sm:$0xff]   ;;  %v9913_v59 = vld [vmem:[#allocation10 + $0x264] ss:$16 sps:$4 sm:$0xff]  }
 0x21a   :  { %1627 = vmatprep.subr.bf16.mxu1 %v9859_v60  ;;  %1709 = vmatprep.subr.bf16.mxu0 %v9862_v61  ;;  %v9916_v60 = vld [vmem:[#allocation10 + $0x26c] ss:$16 sps:$4 sm:$0xff]   ;;  %v9911_v61 = vld [vmem:[#allocation10 + $0x260] ss:$16 sps:$4 sm:$0xff]  }
 0x21d   :  { %1628 = vmatpush1.bf16.msra.mxu1 %v9857_v62  ;;  %1710 = vmatpush1.bf16.msra.mxu0 %v9860_v63  ;;  %v9914_v62 = vld [vmem:[#allocation10 + $0x268] ss:$16 sps:$4 sm:$0xff]   ;;  %v9919_v63 = vld [vmem:[#allocation10 + $0x284] ss:$16 sps:$4 sm:$0xff]  }
 0x21e   :  { %1629 = vmatprep.subr.bf16.mxu1 %v9865_v0  ;;  %1711 = vmatprep.subr.bf16.mxu0 %v9868_v1  ;;  %v9922_v0 = vld [vmem:[#allocation10 + $0x28c] ss:$16 sps:$4 sm:$0xff]   ;;  %v9917_v1 = vld [vmem:[#allocation10 + $0x280] ss:$16 sps:$4 sm:$0xff]  }
 0x221   :  { %1630 = vmatpush1.bf16.msra.mxu1 %v9863_v2  ;;  %1712 = vmatpush1.bf16.msra.mxu0 %v9866_v3  ;;  %v9920_v2 = vld [vmem:[#allocation10 + $0x288] ss:$16 sps:$4 sm:$0xff]   ;;  %v9925_v3 = vld [vmem:[#allocation10 + $0x2a4] ss:$16 sps:$4 sm:$0xff]  }
 0x222   :  { %1631 = vmatprep.subr.bf16.mxu1 %v9871_v4  ;;  %1713 = vmatprep.subr.bf16.mxu0 %v9874_v5  ;;  %v9928_v4 = vld [vmem:[#allocation10 + $0x2ac] ss:$16 sps:$4 sm:$0xff]   ;;  %v9923_v5 = vld [vmem:[#allocation10 + $0x2a0] ss:$16 sps:$4 sm:$0xff]  }
 0x225   :  { %1632 = vmatpush1.bf16.msra.mxu1 %v9869_v6  ;;  %1714 = vmatpush1.bf16.msra.mxu0 %v9872_v7  ;;  %v9926_v6 = vld [vmem:[#allocation10 + $0x2a8] ss:$16 sps:$4 sm:$0xff]   ;;  %v9931_v7 = vld [vmem:[#allocation10 + $0x2c4] ss:$16 sps:$4 sm:$0xff]  }
 0x226   :  { %1633 = vmatprep.subr.bf16.mxu1 %v9877_v9  ;;  %1715 = vmatprep.subr.bf16.mxu0 %v9880_v12  ;;  %v9934_v9 = vld [vmem:[#allocation10 + $0x2cc] ss:$16 sps:$4 sm:$0xff]   ;;  %v9929_v12 = vld [vmem:[#allocation10 + $0x2c0] ss:$16 sps:$4 sm:$0xff]  }
 0x229   :  { %1634 = vmatpush1.bf16.msra.mxu1 %v9875_v13  ;;  %1716 = vmatpush1.bf16.msra.mxu0 %v9878_v14  ;;  %v9932_v13 = vld [vmem:[#allocation10 + $0x2c8] ss:$16 sps:$4 sm:$0xff]   ;;  %v9937_v14 = vld [vmem:[#allocation10 + $0x2e4] ss:$16 sps:$4 sm:$0xff]  }
 0x22a   :  { %1635 = vmatprep.subr.bf16.mxu1 %v9883_v15  ;;  %1717 = vmatprep.subr.bf16.mxu0 %v9886_v16  ;;  %v9940_v15 = vld [vmem:[#allocation10 + $0x2ec] ss:$16 sps:$4 sm:$0xff]   ;;  %v9935_v16 = vld [vmem:[#allocation10 + $0x2e0] ss:$16 sps:$4 sm:$0xff]  }
 0x22d   :  { %1636 = vmatpush1.bf16.msra.mxu1 %v9881_v17  ;;  %1718 = vmatpush1.bf16.msra.mxu0 %v9884_v18  ;;  %v9938_v17 = vld [vmem:[#allocation10 + $0x2e8] ss:$16 sps:$4 sm:$0xff]   ;;  %v9943_v18 = vld [vmem:[#allocation10 + $0x304] ss:$16 sps:$4 sm:$0xff]  }
 0x22e   :  { %1637 = vmatprep.subr.bf16.mxu1 %v9889_v19  ;;  %1719 = vmatprep.subr.bf16.mxu0 %v9892_v20  ;;  %v9946_v19 = vld [vmem:[#allocation10 + $0x30c] ss:$16 sps:$4 sm:$0xff]   ;;  %v9941_v20 = vld [vmem:[#allocation10 + $0x300] ss:$16 sps:$4 sm:$0xff]  }
 0x231   :  { %1638 = vmatpush1.bf16.msra.mxu1 %v9887_v21  ;;  %1720 = vmatpush1.bf16.msra.mxu0 %v9890_v22  ;;  %v9944_v21 = vld [vmem:[#allocation10 + $0x308] ss:$16 sps:$4 sm:$0xff]   ;;  %v9949_v22 = vld [vmem:[#allocation10 + $0x324] ss:$16 sps:$4 sm:$0xff]  }
 0x232   :  { %1648 = vmatprep.subr.bf16.mxu1 %v9895_v23  ;;  %1730 = vmatprep.subr.bf16.mxu0 %v9898_v26  ;;  %v9952_v23 = vld [vmem:[#allocation10 + $0x32c] ss:$16 sps:$4 sm:$0xff]   ;;  %v9947_v26 = vld [vmem:[#allocation10 + $0x320] ss:$16 sps:$4 sm:$0xff]  }
 0x2c7   :  { %v761_v32 = vpop.f32.mrb[0].mxu1  ;;  %v11980_v33 = vpop.f32.mrb[4].mxu0 }
 0x2c8   :  { %v762_v34 = vadd.f32 %v761_v32, %v390_v29  ;;  %v763_v35 = vpop.f32.mrb[1].mxu1  ;;  %v804_v36 = vpop.f32.mrb[5].mxu0  ;;  %v9950_v29 = vld [vmem:[#allocation10 + $0x328] ss:$16 sps:$4 sm:$0xff]   ;;  %v9953_v32 = vld [vmem:[#allocation10 + $0x340] ss:$16 sps:$4 sm:$0xff]  }
 0x2c9   :  { %v764_v37 = vadd.f32 %v763_v35, %v394_v30  ;;  %v805_v38 = vadd.f32 %v804_v36, %v402_v31  ;;  %v765_v39 = vpop.f32.mrb[2].mxu1  ;;  %v806_v40 = vpop.f32.mrb[6].mxu0  ;;  %v9955_v30 = vld [vmem:[#allocation10 + $0x344] ss:$16 sps:$4 sm:$0xff]   ;;  %v9958_v31 = vld [vmem:[#allocation10 + $0x34c] ss:$16 sps:$4 sm:$0xff]  }
 0x2ca   :  { %v809_v41 = vmax.f32 %v762_v34, 0.0  ;;  %v766_v42 = vpop.f32.mrb[3].mxu1  ;;  %v807_v43 = vpop.f32.mrb[7].mxu0  ;;  %v9956_v34 = vld [vmem:[#allocation10 + $0x348] ss:$16 sps:$4 sm:$0xff]  }
 0x2cb   :  { %v810_v44 = vmax.f32 %v764_v37, 0.0  ;;  %v812_v47 = vmax.f32 %v805_v38, 0.0  ;;  %v9961_v35 = vld [vmem:[#allocation10 + $0x364] ss:$16 sps:$4 sm:$0xff]   ;;  %v9964_v36 = vld [vmem:[#allocation10 + $0x36c] ss:$16 sps:$4 sm:$0xff]  }
 0x2cc   :  { %v813_v51 = vpack.c.bf16 %v809_v41, %v809_v41  ;;  %v9959_v37 = vld [vmem:[#allocation10 + $0x360] ss:$16 sps:$4 sm:$0xff]   ;;  %v9962_v38 = vld [vmem:[#allocation10 + $0x368] ss:$16 sps:$4 sm:$0xff]   ;;  %v9967_v39 = vld [vmem:[#allocation10 + $0x384] ss:$16 sps:$4 sm:$0xff]  }
 0x2cd   :  { %v814_v48 = vpack.c.bf16 %v810_v44, %v810_v44  ;;  %v816_v54 = vpack.c.bf16 %v812_v47, %v812_v47  ;;  %v9970_v40 = vld [vmem:[#allocation10 + $0x38c] ss:$16 sps:$4 sm:$0xff]   ;;  %v9965_v41 = vld [vmem:[#allocation10 + $0x380] ss:$16 sps:$4 sm:$0xff]   ;;  %v9968_v42 = vld [vmem:[#allocation10 + $0x388] ss:$16 sps:$4 sm:$0xff]  }
 0x2ce   :  { %v11983_v43 = vsub.s32 2, %v11948_v8  ;;  %v9973_v44 = vld [vmem:[#allocation10 + $0x3a4] ss:$16 sps:$4 sm:$0xff]   ;;  %v9974_v47 = vld [vmem:[#allocation10 + $0x3a8] ss:$16 sps:$4 sm:$0xff]  }
 0x2cf   :  { %1639 = vmatprep.mubr.bf16.mxu1 %v814_v48  ;;  %1721 = vmatprep.mubr.bf16.mxu0 %v814_v48  ;;  %v9980_v8 = vld [vmem:[#allocation10 + $0x3c8] ss:$16 sps:$4 sm:$0xff]  }
 0x2d0   :  { %1640 = vmatmul.mubr.bf16.vlgmr.msra.gmra.mrb[4].mxu1 %v813_v51  ;;  %1722 = vmatmul.mubr.bf16.vlgmr.msra.gmra.mrb[8].mxu0 %v813_v51  ;;  %v398_v48 = vrot.slane %v11969_v27, %v11983_v43  ;;  %v9977_v51 = vld [vmem:[#allocation10 + $0x3c0] ss:$16 sps:$4 sm:$0xff]   ;;  %v9991_v27 = vld [vmem:[#allocation11 + $0x4] ss:$16 sps:$4 sm:$0xff]  }
 0x2d1   :  { %1649 = vmatpush1.bf16.msra.mxu1 %v9893_v45  ;;  %1731 = vmatpush1.bf16.msra.mxu0 %v9896_v46  ;;  %v9976_v45 = vld [vmem:[#allocation10 + $0x3ac] ss:$16 sps:$4 sm:$0xff]   ;;  %v9971_v46 = vld [vmem:[#allocation10 + $0x3a0] ss:$16 sps:$4 sm:$0xff]  }
 0x2d2   :  { %1680 = vmatprep.mubr.bf16.mxu1 %v816_v54  ;;  %1762 = vmatprep.mubr.bf16.mxu0 %v816_v54  ;;  %v9988_v54 = vld [vmem:[#allocation10 + $0x3ec] ss:$16 sps:$4 sm:$0xff]  }
 0x2d3   :  { %1650 = vmatprep.subr.bf16.mxu1 %v9901_v49  ;;  %1732 = vmatprep.subr.bf16.mxu0 %v9904_v50  ;;  %v9979_v49 = vld [vmem:[#allocation10 + $0x3c4] ss:$16 sps:$4 sm:$0xff]   ;;  %v9982_v50 = vld [vmem:[#allocation10 + $0x3cc] ss:$16 sps:$4 sm:$0xff]  }
 0x2d5   :  { %1651 = vmatpush1.bf16.msra.mxu1 %v9899_v52  ;;  %1733 = vmatpush1.bf16.msra.mxu0 %v9902_v53  ;;  %v803_v52 = vadd.f32 %v11980_v33, %v398_v48  ;;  %v9985_v53 = vld [vmem:[#allocation10 + $0x3e4] ss:$16 sps:$4 sm:$0xff]   ;;  %v10058_v48 = vld [vmem:[#allocation11 + $0x168] ss:$16 sps:$4 sm:$0xff]  }
 0x2d6   :  { %1652 = vmatprep.subr.bf16.mxu1 %v9907_v55  ;;  %1734 = vmatprep.subr.bf16.mxu0 %v9910_v56  ;;  %v9983_v55 = vld [vmem:[#allocation10 + $0x3e0] ss:$16 sps:$4 sm:$0xff]   ;;  %v9986_v56 = vld [vmem:[#allocation10 + $0x3e8] ss:$16 sps:$4 sm:$0xff]   ;;  %v9997_v33 = vld [vmem:[#allocation11 + $0x24] ss:$16 sps:$4 sm:$0xff]  }
 0x2d9   :  { %1653 = vmatpush1.bf16.msra.mxu1 %v9905_v57  ;;  %1735 = vmatpush1.bf16.msra.mxu0 %v9908_v58  ;;  %v811_v57 = vmax.f32 %v803_v52, 0.0  ;;  %v9994_v58 = vld [vmem:[#allocation11 + $0xc] ss:$16 sps:$4 sm:$0xff]   ;;  %v10069_v52 = vld [vmem:[#allocation11 + $0x1a4] ss:$16 sps:$4 sm:$0xff]  }
 0x2da   :  { %1654 = vmatprep.subr.bf16.mxu1 %v9913_v59  ;;  %1736 = vmatprep.subr.bf16.mxu0 %v9916_v60  ;;  %v9989_v59 = vld [vmem:[#allocation11] ss:$16 sps:$4 sm:$0xff]  }
 0x2db   :  { %v815_v60 = vpack.c.bf16 %v811_v57, %v811_v57  ;;  %v10078_v57 = vld [vmem:[#allocation11 + $0x1cc] ss:$16 sps:$4 sm:$0xff]  }
 0x2dd   :  { %1655 = vmatpush1.bf16.msra.mxu1 %v9911_v61  ;;  %1737 = vmatpush1.bf16.msra.mxu0 %v9914_v62  ;;  %v9992_v61 = vld [vmem:[#allocation11 + $0x8] ss:$16 sps:$4 sm:$0xff]   ;;  %v10000_v62 = vld [vmem:[#allocation11 + $0x2c] ss:$16 sps:$4 sm:$0xff]  }
 0x2de   :  { %1656 = vmatprep.subr.bf16.mxu1 %v9919_v63  ;;  %1738 = vmatprep.subr.bf16.mxu0 %v9922_v0  ;;  %v9995_v63 = vld [vmem:[#allocation11 + $0x20] ss:$16 sps:$4 sm:$0xff]   ;;  %v9998_v0 = vld [vmem:[#allocation11 + $0x28] ss:$16 sps:$4 sm:$0xff]  }
 0x2e1   :  { %1657 = vmatpush1.bf16.msra.mxu1 %v9917_v1  ;;  %1739 = vmatpush1.bf16.msra.mxu0 %v9920_v2  ;;  %v10003_v1 = vld [vmem:[#allocation11 + $0x44] ss:$16 sps:$4 sm:$0xff]   ;;  %v10006_v2 = vld [vmem:[#allocation11 + $0x4c] ss:$16 sps:$4 sm:$0xff]  }
 0x2e2   :  { %1658 = vmatprep.subr.bf16.mxu1 %v9925_v3  ;;  %1740 = vmatprep.subr.bf16.mxu0 %v9928_v4  ;;  %v10001_v3 = vld [vmem:[#allocation11 + $0x40] ss:$16 sps:$4 sm:$0xff]   ;;  %v10004_v4 = vld [vmem:[#allocation11 + $0x48] ss:$16 sps:$4 sm:$0xff]  }
 0x2e5   :  { %1659 = vmatpush1.bf16.msra.mxu1 %v9923_v5  ;;  %1741 = vmatpush1.bf16.msra.mxu0 %v9926_v6  ;;  %v10009_v5 = vld [vmem:[#allocation11 + $0x64] ss:$16 sps:$4 sm:$0xff]   ;;  %v10012_v6 = vld [vmem:[#allocation11 + $0x6c] ss:$16 sps:$4 sm:$0xff]  }
 0x2e6   :  { %1660 = vmatprep.subr.bf16.mxu1 %v9931_v7  ;;  %1742 = vmatprep.subr.bf16.mxu0 %v9934_v9  ;;  %v10007_v7 = vld [vmem:[#allocation11 + $0x60] ss:$16 sps:$4 sm:$0xff]   ;;  %v10010_v9 = vld [vmem:[#allocation11 + $0x68] ss:$16 sps:$4 sm:$0xff]  }
 0x2e9   :  { %1661 = vmatpush1.bf16.msra.mxu1 %v9929_v12  ;;  %1743 = vmatpush1.bf16.msra.mxu0 %v9932_v13  ;;  %v10015_v12 = vld [vmem:[#allocation11 + $0x84] ss:$16 sps:$4 sm:$0xff]   ;;  %v10013_v13 = vld [vmem:[#allocation11 + $0x80] ss:$16 sps:$4 sm:$0xff]  }
 0x2ea   :  { %1662 = vmatprep.subr.bf16.mxu1 %v9937_v14  ;;  %1744 = vmatprep.subr.bf16.mxu0 %v9940_v15  ;;  %v10016_v14 = vld [vmem:[#allocation11 + $0x88] ss:$16 sps:$4 sm:$0xff]   ;;  %v10021_v15 = vld [vmem:[#allocation11 + $0xa4] ss:$16 sps:$4 sm:$0xff]  }
 0x2ed   :  { %1663 = vmatpush1.bf16.msra.mxu1 %v9935_v16  ;;  %1745 = vmatpush1.bf16.msra.mxu0 %v9938_v17  ;;  %v10024_v16 = vld [vmem:[#allocation11 + $0xac] ss:$16 sps:$4 sm:$0xff]   ;;  %v10019_v17 = vld [vmem:[#allocation11 + $0xa0] ss:$16 sps:$4 sm:$0xff]  }
 0x2ee   :  { %1664 = vmatprep.subr.bf16.mxu1 %v9943_v18  ;;  %1746 = vmatprep.subr.bf16.mxu0 %v9946_v19  ;;  %v10022_v18 = vld [vmem:[#allocation11 + $0xa8] ss:$16 sps:$4 sm:$0xff]   ;;  %v10027_v19 = vld [vmem:[#allocation11 + $0xc4] ss:$16 sps:$4 sm:$0xff]  }
 0x2f1   :  { %1665 = vmatpush1.bf16.msra.mxu1 %v9941_v20  ;;  %1747 = vmatpush1.bf16.msra.mxu0 %v9944_v21  ;;  %v10030_v20 = vld [vmem:[#allocation11 + $0xcc] ss:$16 sps:$4 sm:$0xff]   ;;  %v10025_v21 = vld [vmem:[#allocation11 + $0xc0] ss:$16 sps:$4 sm:$0xff]  }
 0x2f2   :  { %1666 = vmatprep.subr.bf16.mxu1 %v9949_v22  ;;  %1748 = vmatprep.subr.bf16.mxu0 %v9952_v23  ;;  %v10028_v22 = vld [vmem:[#allocation11 + $0xc8] ss:$16 sps:$4 sm:$0xff]   ;;  %v10033_v23 = vld [vmem:[#allocation11 + $0xe4] ss:$16 sps:$4 sm:$0xff]  }
 0x2f5   :  { %1667 = vmatpush1.bf16.msra.mxu1 %v9947_v26  ;;  %1749 = vmatpush1.bf16.msra.mxu0 %v9950_v29  ;;  %v10036_v26 = vld [vmem:[#allocation11 + $0xec] ss:$16 sps:$4 sm:$0xff]   ;;  %v10031_v29 = vld [vmem:[#allocation11 + $0xe0] ss:$16 sps:$4 sm:$0xff]  }
 0x2f6   :  { %1668 = vmatprep.subr.bf16.mxu1 %v9955_v30  ;;  %1750 = vmatprep.subr.bf16.mxu0 %v9958_v31  ;;  %v10034_v30 = vld [vmem:[#allocation11 + $0xe8] ss:$16 sps:$4 sm:$0xff]   ;;  %v10039_v31 = vld [vmem:[#allocation11 + $0x104] ss:$16 sps:$4 sm:$0xff]  }
 0x2f9   :  { %1669 = vmatpush1.bf16.msra.mxu1 %v9953_v32  ;;  %1751 = vmatpush1.bf16.msra.mxu0 %v9956_v34  ;;  %v10042_v32 = vld [vmem:[#allocation11 + $0x10c] ss:$16 sps:$4 sm:$0xff]   ;;  %v10037_v34 = vld [vmem:[#allocation11 + $0x100] ss:$16 sps:$4 sm:$0xff]  }
 0x2fa   :  { %1670 = vmatprep.subr.bf16.mxu1 %v9961_v35  ;;  %1752 = vmatprep.subr.bf16.mxu0 %v9964_v36  ;;  %v10040_v35 = vld [vmem:[#allocation11 + $0x108] ss:$16 sps:$4 sm:$0xff]   ;;  %v10045_v36 = vld [vmem:[#allocation11 + $0x124] ss:$16 sps:$4 sm:$0xff]  }
 0x2fd   :  { %1671 = vmatpush1.bf16.msra.mxu1 %v9959_v37  ;;  %1753 = vmatpush1.bf16.msra.mxu0 %v9962_v38  ;;  %v10048_v37 = vld [vmem:[#allocation11 + $0x12c] ss:$16 sps:$4 sm:$0xff]   ;;  %v10043_v38 = vld [vmem:[#allocation11 + $0x120] ss:$16 sps:$4 sm:$0xff]  }
 0x2fe   :  { %1672 = vmatprep.subr.bf16.mxu1 %v9967_v39  ;;  %1754 = vmatprep.subr.bf16.mxu0 %v9970_v40  ;;  %v10046_v39 = vld [vmem:[#allocation11 + $0x128] ss:$16 sps:$4 sm:$0xff]   ;;  %v10051_v40 = vld [vmem:[#allocation11 + $0x144] ss:$16 sps:$4 sm:$0xff]  }
 0x301   :  { %1673 = vmatpush1.bf16.msra.mxu1 %v9965_v41  ;;  %1755 = vmatpush1.bf16.msra.mxu0 %v9968_v42  ;;  %v10054_v41 = vld [vmem:[#allocation11 + $0x14c] ss:$16 sps:$4 sm:$0xff]   ;;  %v10049_v42 = vld [vmem:[#allocation11 + $0x140] ss:$16 sps:$4 sm:$0xff]  }
 0x302   :  { %1674 = vmatprep.subr.bf16.mxu1 %v9973_v44  ;;  %1756 = vmatprep.subr.bf16.mxu0 %v9976_v45  ;;  %v10052_v44 = vld [vmem:[#allocation11 + $0x148] ss:$16 sps:$4 sm:$0xff]   ;;  %v10057_v45 = vld [vmem:[#allocation11 + $0x164] ss:$16 sps:$4 sm:$0xff]  }
 0x305   :  { %1675 = vmatpush1.bf16.msra.mxu1 %v9971_v46  ;;  %1757 = vmatpush1.bf16.msra.mxu0 %v9974_v47  ;;  %v10060_v46 = vld [vmem:[#allocation11 + $0x16c] ss:$16 sps:$4 sm:$0xff]   ;;  %v10055_v47 = vld [vmem:[#allocation11 + $0x160] ss:$16 sps:$4 sm:$0xff]  }
 0x306   :  { %1676 = vmatprep.subr.bf16.mxu1 %v9979_v49  ;;  %1758 = vmatprep.subr.bf16.mxu0 %v9982_v50  ;;  %v10063_v49 = vld [vmem:[#allocation11 + $0x184] ss:$16 sps:$4 sm:$0xff]   ;;  %v10066_v50 = vld [vmem:[#allocation11 + $0x18c] ss:$16 sps:$4 sm:$0xff]  }
 0x309   :  { %1677 = vmatpush1.bf16.msra.mxu1 %v9977_v51  ;;  %1759 = vmatpush1.bf16.msra.mxu0 %v9980_v8  ;;  %v10061_v51 = vld [vmem:[#allocation11 + $0x180] ss:$16 sps:$4 sm:$0xff]   ;;  %v10064_v8 = vld [vmem:[#allocation11 + $0x188] ss:$16 sps:$4 sm:$0xff]  }
 0x30a   :  { %1678 = vmatprep.subr.bf16.mxu1 %v9985_v53  ;;  %1760 = vmatprep.subr.bf16.mxu0 %v9988_v54  ;;  %v10072_v53 = vld [vmem:[#allocation11 + $0x1ac] ss:$16 sps:$4 sm:$0xff]   ;;  %v10067_v54 = vld [vmem:[#allocation11 + $0x1a0] ss:$16 sps:$4 sm:$0xff]  }
 0x30d   :  { %1679 = vmatpush1.bf16.msra.mxu1 %v9983_v55  ;;  %1761 = vmatpush1.bf16.msra.mxu0 %v9986_v56  ;;  %v10070_v55 = vld [vmem:[#allocation11 + $0x1a8] ss:$16 sps:$4 sm:$0xff]   ;;  %v10075_v56 = vld [vmem:[#allocation11 + $0x1c4] ss:$16 sps:$4 sm:$0xff]  }
 0x30e   :  { %2177 = vmatprep.subr.bf16.mxu1 %v9991_v27  ;;  %2218 = vmatprep.subr.bf16.mxu0 %v9994_v58  ;;  %v10073_v27 = vld [vmem:[#allocation11 + $0x1c0] ss:$16 sps:$4 sm:$0xff]   ;;  %v10076_v58 = vld [vmem:[#allocation11 + $0x1c8] ss:$16 sps:$4 sm:$0xff]  }
 0x310   :  { %1681 = vmatmul.mubr.bf16.vlgmr.msra.gmra.mrb[4].mxu1 %v815_v60  ;;  %1763 = vmatmul.mubr.bf16.vlgmr.msra.gmra.mrb[8].mxu0 %v815_v60  ;;  %v10084_v60 = vld [vmem:[#allocation11 + $0x1ec] ss:$16 sps:$4 sm:$0xff]  }
 0x311   :  { %2178 = vmatpush1.bf16.msra.mxu1 %v9989_v59  ;;  %2209 = vmatprep.mubr.bf16.mxu1 %v11958_v24  ;;  %v10081_v59 = vld [vmem:[#allocation11 + $0x1e4] ss:$16 sps:$4 sm:$0xff]  }
 0x312   :  { %2219 = vmatpush1.bf16.msra.mxu0 %v9992_v61  ;;  %2250 = vmatprep.mubr.bf16.mxu0 %v11958_v24  ;;  %v10018_v24 = vld [vmem:[#allocation11 + $0x8c] ss:$16 sps:$4 sm:$0xff]   ;;  %v10079_v61 = vld [vmem:[#allocation11 + $0x1e0] ss:$16 sps:$4 sm:$0xff]  }
 0x313   :  { %2179 = vmatprep.subr.bf16.mxu1 %v9997_v33  ;;  %2220 = vmatprep.subr.bf16.mxu0 %v10000_v62  ;;  %v10082_v33 = vld [vmem:[#allocation11 + $0x1e8] ss:$16 sps:$4 sm:$0xff]   ;;  %v10085_v62 = vld [vmem:[#allocation13] ss:$16 sps:$4 sm:$0xff]  }
 0x315   :  { %2180 = vmatpush1.bf16.msra.mxu1 %v9995_v63  ;;  %v10087_v63 = vld [vmem:[#allocation13 + $0x4] ss:$16 sps:$4 sm:$0xff]  }
 0x316   :  { %2221 = vmatpush1.bf16.msra.mxu0 %v9998_v0  ;;  %2181 = vmatprep.subr.bf16.mxu1 %v10003_v1  ;;  %v10088_v0 = vld [vmem:[#allocation13 + $0x8] ss:$16 sps:$4 sm:$0xff]   ;;  %v10090_v1 = vld [vmem:[#allocation13 + $0xc] ss:$16 sps:$4 sm:$0xff]  }
 0x317   :  { %2222 = vmatprep.subr.bf16.mxu0 %v10006_v2  ;;  %v10093_v2 = vld [vmem:[#allocation13 + $0x24] ss:$16 sps:$4 sm:$0xff]  }
 0x319   :  { %2182 = vmatpush1.bf16.msra.mxu1 %v10001_v3  ;;  %v10096_v3 = vld [vmem:[#allocation13 + $0x2c] ss:$16 sps:$4 sm:$0xff]  }
 0x31a   :  { %2223 = vmatpush1.bf16.msra.mxu0 %v10004_v4  ;;  %2183 = vmatprep.subr.bf16.mxu1 %v10009_v5  ;;  %v10091_v4 = vld [vmem:[#allocation13 + $0x20] ss:$16 sps:$4 sm:$0xff]   ;;  %v10094_v5 = vld [vmem:[#allocation13 + $0x28] ss:$16 sps:$4 sm:$0xff]  }
 0x31b   :  { %2224 = vmatprep.subr.bf16.mxu0 %v10012_v6  ;;  %v10099_v6 = vld [vmem:[#allocation13 + $0x44] ss:$16 sps:$4 sm:$0xff]  }
 0x31d   :  { %2184 = vmatpush1.bf16.msra.mxu1 %v10007_v7  ;;  %v10102_v7 = vld [vmem:[#allocation13 + $0x4c] ss:$16 sps:$4 sm:$0xff]  }
 0x31e   :  { %2225 = vmatpush1.bf16.msra.mxu0 %v10010_v9  ;;  %2185 = vmatprep.subr.bf16.mxu1 %v10015_v12  ;;  %v10097_v9 = vld [vmem:[#allocation13 + $0x40] ss:$16 sps:$4 sm:$0xff]   ;;  %v10105_v12 = vld [vmem:[#allocation13 + $0x64] ss:$16 sps:$4 sm:$0xff]  }
 0x31f   :  { %2226 = vmatprep.subr.bf16.mxu0 %v10018_v24  ;;  %v10108_v24 = vld [vmem:[#allocation13 + $0x6c] ss:$16 sps:$4 sm:$0xff]  }
 0x321   :  { %2186 = vmatpush1.bf16.msra.mxu1 %v10013_v13  ;;  %v10103_v13 = vld [vmem:[#allocation13 + $0x60] ss:$16 sps:$4 sm:$0xff]  }
 0x322   :  { %2227 = vmatpush1.bf16.msra.mxu0 %v10016_v14  ;;  %2187 = vmatprep.subr.bf16.mxu1 %v10021_v15  ;;  %v10106_v14 = vld [vmem:[#allocation13 + $0x68] ss:$16 sps:$4 sm:$0xff]   ;;  %v10111_v15 = vld [vmem:[#allocation13 + $0x84] ss:$16 sps:$4 sm:$0xff]  }
 0x323   :  { %2228 = vmatprep.subr.bf16.mxu0 %v10024_v16  ;;  %v10114_v16 = vld [vmem:[#allocation13 + $0x8c] ss:$16 sps:$4 sm:$0xff]  }
 0x325   :  { %2188 = vmatpush1.bf16.msra.mxu1 %v10019_v17  ;;  %v10109_v17 = vld [vmem:[#allocation13 + $0x80] ss:$16 sps:$4 sm:$0xff]  }
 0x326   :  { %2229 = vmatpush1.bf16.msra.mxu0 %v10022_v18  ;;  %2189 = vmatprep.subr.bf16.mxu1 %v10027_v19  ;;  %v10112_v18 = vld [vmem:[#allocation13 + $0x88] ss:$16 sps:$4 sm:$0xff]   ;;  %v10117_v19 = vld [vmem:[#allocation13 + $0xa4] ss:$16 sps:$4 sm:$0xff]  }
 0x327   :  { %2230 = vmatprep.subr.bf16.mxu0 %v10030_v20  ;;  %v10120_v20 = vld [vmem:[#allocation13 + $0xac] ss:$16 sps:$4 sm:$0xff]  }
 0x329   :  { %2190 = vmatpush1.bf16.msra.mxu1 %v10025_v21  ;;  %v10115_v21 = vld [vmem:[#allocation13 + $0xa0] ss:$16 sps:$4 sm:$0xff]  }
 0x32a   :  { %2231 = vmatpush1.bf16.msra.mxu0 %v10028_v22  ;;  %2191 = vmatprep.subr.bf16.mxu1 %v10033_v23  ;;  %v10118_v22 = vld [vmem:[#allocation13 + $0xa8] ss:$16 sps:$4 sm:$0xff]   ;;  %v10123_v23 = vld [vmem:[#allocation13 + $0xc4] ss:$16 sps:$4 sm:$0xff]  }
 0x32b   :  { %2232 = vmatprep.subr.bf16.mxu0 %v10036_v26  ;;  %v10126_v26 = vld [vmem:[#allocation13 + $0xcc] ss:$16 sps:$4 sm:$0xff]  }
 0x32d   :  { %2192 = vmatpush1.bf16.msra.mxu1 %v10031_v29  ;;  %v10121_v29 = vld [vmem:[#allocation13 + $0xc0] ss:$16 sps:$4 sm:$0xff]  }
 0x32e   :  { %2233 = vmatpush1.bf16.msra.mxu0 %v10034_v30  ;;  %2193 = vmatprep.subr.bf16.mxu1 %v10039_v31  ;;  %v10124_v30 = vld [vmem:[#allocation13 + $0xc8] ss:$16 sps:$4 sm:$0xff]   ;;  %v10129_v31 = vld [vmem:[#allocation13 + $0xe4] ss:$16 sps:$4 sm:$0xff]  }
 0x32f   :  { %2234 = vmatprep.subr.bf16.mxu0 %v10042_v32  ;;  %v10132_v32 = vld [vmem:[#allocation13 + $0xec] ss:$16 sps:$4 sm:$0xff]  }
 0x331   :  { %2194 = vmatpush1.bf16.msra.mxu1 %v10037_v34  ;;  %v10127_v34 = vld [vmem:[#allocation13 + $0xe0] ss:$16 sps:$4 sm:$0xff]  }
 0x332   :  { %2235 = vmatpush1.bf16.msra.mxu0 %v10040_v35  ;;  %2195 = vmatprep.subr.bf16.mxu1 %v10045_v36  ;;  %v10130_v35 = vld [vmem:[#allocation13 + $0xe8] ss:$16 sps:$4 sm:$0xff]   ;;  %v10135_v36 = vld [vmem:[#allocation13 + $0x104] ss:$16 sps:$4 sm:$0xff]  }
 0x333   :  { %2236 = vmatprep.subr.bf16.mxu0 %v10048_v37  ;;  %v10138_v37 = vld [vmem:[#allocation13 + $0x10c] ss:$16 sps:$4 sm:$0xff]  }
 0x335   :  { %2196 = vmatpush1.bf16.msra.mxu1 %v10043_v38  ;;  %v10133_v38 = vld [vmem:[#allocation13 + $0x100] ss:$16 sps:$4 sm:$0xff]  }
 0x336   :  { %2237 = vmatpush1.bf16.msra.mxu0 %v10046_v39  ;;  %2197 = vmatprep.subr.bf16.mxu1 %v10051_v40  ;;  %v10136_v39 = vld [vmem:[#allocation13 + $0x108] ss:$16 sps:$4 sm:$0xff]   ;;  %v10141_v40 = vld [vmem:[#allocation13 + $0x124] ss:$16 sps:$4 sm:$0xff]  }
 0x337   :  { %2238 = vmatprep.subr.bf16.mxu0 %v10054_v41  ;;  %v10144_v41 = vld [vmem:[#allocation13 + $0x12c] ss:$16 sps:$4 sm:$0xff]  }
 0x339   :  { %2198 = vmatpush1.bf16.msra.mxu1 %v10049_v42  ;;  %v10139_v42 = vld [vmem:[#allocation13 + $0x120] ss:$16 sps:$4 sm:$0xff]  }
 0x33a   :  { %2239 = vmatpush1.bf16.msra.mxu0 %v10052_v44  ;;  %2199 = vmatprep.subr.bf16.mxu1 %v10057_v45  ;;  %v10142_v44 = vld [vmem:[#allocation13 + $0x128] ss:$16 sps:$4 sm:$0xff]   ;;  %v10147_v45 = vld [vmem:[#allocation13 + $0x144] ss:$16 sps:$4 sm:$0xff]  }
 0x33b   :  { %2240 = vmatprep.subr.bf16.mxu0 %v10060_v46  ;;  %v10150_v46 = vld [vmem:[#allocation13 + $0x14c] ss:$16 sps:$4 sm:$0xff]  }
 0x33d   :  { %2200 = vmatpush1.bf16.msra.mxu1 %v10055_v47  ;;  %v10145_v47 = vld [vmem:[#allocation13 + $0x140] ss:$16 sps:$4 sm:$0xff]  }
 0x33e   :  { %2241 = vmatpush1.bf16.msra.mxu0 %v10058_v48  ;;  %2201 = vmatprep.subr.bf16.mxu1 %v10063_v49  ;;  %v10148_v48 = vld [vmem:[#allocation13 + $0x148] ss:$16 sps:$4 sm:$0xff]   ;;  %v10153_v49 = vld [vmem:[#allocation13 + $0x164] ss:$16 sps:$4 sm:$0xff]  }
 0x33f   :  { %2242 = vmatprep.subr.bf16.mxu0 %v10066_v50  ;;  %v10156_v50 = vld [vmem:[#allocation13 + $0x16c] ss:$16 sps:$4 sm:$0xff]  }
 0x341   :  { %2202 = vmatpush1.bf16.msra.mxu1 %v10061_v51  ;;  %v10151_v51 = vld [vmem:[#allocation13 + $0x160] ss:$16 sps:$4 sm:$0xff]  }
 0x342   :  { %2243 = vmatpush1.bf16.msra.mxu0 %v10064_v8  ;;  %2203 = vmatprep.subr.bf16.mxu1 %v10069_v52  ;;  %v10154_v8 = vld [vmem:[#allocation13 + $0x168] ss:$16 sps:$4 sm:$0xff]   ;;  %v10159_v52 = vld [vmem:[#allocation13 + $0x184] ss:$16 sps:$4 sm:$0xff]  }
 0x343   :  { %2244 = vmatprep.subr.bf16.mxu0 %v10072_v53  ;;  %v10162_v53 = vld [vmem:[#allocation13 + $0x18c] ss:$16 sps:$4 sm:$0xff]  }
 0x345   :  { %2204 = vmatpush1.bf16.msra.mxu1 %v10067_v54  ;;  %v10157_v54 = vld [vmem:[#allocation13 + $0x180] ss:$16 sps:$4 sm:$0xff]  }
 0x346   :  { %2245 = vmatpush1.bf16.msra.mxu0 %v10070_v55  ;;  %2205 = vmatprep.subr.bf16.mxu1 %v10075_v56  ;;  %v10160_v55 = vld [vmem:[#allocation13 + $0x188] ss:$16 sps:$4 sm:$0xff]   ;;  %v10165_v56 = vld [vmem:[#allocation13 + $0x1a4] ss:$16 sps:$4 sm:$0xff]  }
 0x347   :  { %2246 = vmatprep.subr.bf16.mxu0 %v10078_v57  ;;  %v10168_v57 = vld [vmem:[#allocation13 + $0x1ac] ss:$16 sps:$4 sm:$0xff]  }
 0x349   :  { %2206 = vmatpush1.bf16.msra.mxu1 %v10073_v27  ;;  %v10163_v27 = vld [vmem:[#allocation13 + $0x1a0] ss:$16 sps:$4 sm:$0xff]  }
 0x34a   :  { %2247 = vmatpush1.bf16.msra.mxu0 %v10076_v58  ;;  %2207 = vmatprep.subr.bf16.mxu1 %v10081_v59  ;;  %v10166_v58 = vld [vmem:[#allocation13 + $0x1a8] ss:$16 sps:$4 sm:$0xff]  }
 0x34b   :  { %2248 = vmatprep.subr.bf16.mxu0 %v10084_v60  ;;  %v945_v59 = vld [vmem:[%s12201_s1] sm:$0xf] }
 0x34c   :  { %v1835_v60 = vld [vmem:[%s12160_s8] sm:$0xf]  ;;  %s11613_s8 = smov 96  }
 0x34d   :  { %2208 = vmatpush1.bf16.msra.mxu1 %v10079_v61  ;;  %v958_v61 = vrot.slane %v945_v59, %v11983_v43 }
 0x34e   :  { %2249 = vmatpush1.bf16.msra.mxu0 %v10082_v33  ;;  %3086 = vmatprep.subr.bf16.mxu1 %v10087_v63  ;;  %v1848_v33 = vrot.slane %v1835_v60, %v11983_v43  ;;  %v1844_v63 = vrot.slane %v1835_v60, %v11954_v11 }
 0x34f   :  { %3168 = vmatprep.subr.bf16.mxu0 %v10090_v1  ;;  %v10174_v1 = vld [vmem:[#allocation13 + $0x1cc] ss:$16 sps:$4 sm:$0xff]  }
 0x350   :  { %2210 = vmatmul.mubr.bf16.vlgmr.msra.gmra.mrb[4].mxu1 %v11960_v25 }
 0x351   :  { %2251 = vmatmul.mubr.bf16.vlgmr.msra.gmra.mrb[8].mxu0 %v11960_v25  ;;  %3087 = vmatpush1.bf16.msra.mxu1 %v10085_v62  ;;  %v10100_v25 = vld [vmem:[#allocation13 + $0x48] ss:$16 sps:$4 sm:$0xff]   ;;  %v954_v62 = vrot.slane %v945_v59, %v11954_v11 }
 0x352   :  { %3169 = vmatpush1.bf16.msra.mxu0 %v10088_v0  ;;  %3088 = vmatprep.subr.bf16.mxu1 %v10093_v2  ;;  %v10171_v0 = vld [vmem:[#allocation13 + $0x1c4] ss:$16 sps:$4 sm:$0xff]   ;;  %v962_v2 = vrot.slane %v945_v59, %v11972_v28 }
 0x353   :  { %3170 = vmatprep.subr.bf16.mxu0 %v10096_v3  ;;  %v1852_v3 = vrot.slane %v1835_v60, %v11972_v28 }
 0x355   :  { %3089 = vmatpush1.bf16.msra.mxu1 %v10091_v4  ;;  %v10169_v4 = vld [vmem:[#allocation13 + $0x1c0] ss:$16 sps:$4 sm:$0xff]  }
 0x356   :  { %3171 = vmatpush1.bf16.msra.mxu0 %v10094_v5  ;;  %3090 = vmatprep.subr.bf16.mxu1 %v10099_v6  ;;  %v10172_v5 = vld [vmem:[#allocation13 + $0x1c8] ss:$16 sps:$4 sm:$0xff]   ;;  %v950_v6 = vrot.slane %v945_v59, %v11951_v10  ;;  %v10187_v59 = vld [vmem:[#allocation13 + $0x220] ss:$16 sps:$4 sm:$0xff]  }
 0x357   :  { %3172 = vmatprep.subr.bf16.mxu0 %v10102_v7  ;;  %v1840_v7 = vrot.slane %v1835_v60, %v11951_v10  ;;  %v10190_v60 = vld [vmem:[#allocation13 + $0x228] ss:$16 sps:$4 sm:$0xff]  }
 0x359   :  { %3091 = vmatpush1.bf16.msra.mxu1 %v10097_v9  ;;  %v9558_v9 = vadd.f32 %v1848_v33, %v958_v61  ;;  %v10195_v61 = vld [vmem:[#allocation13 + $0x244] ss:$16 sps:$4 sm:$0xff]   ;;  %v10198_v33 = vld [vmem:[#allocation13 + $0x24c] ss:$16 sps:$4 sm:$0xff]  }
 0x35a   :  { %3173 = vmatpush1.bf16.msra.mxu0 %v10100_v25  ;;  %3092 = vmatprep.subr.bf16.mxu1 %v10105_v12  ;;  %v9556_v25 = vadd.f32 %v1844_v63, %v954_v62  ;;  %v10177_v12 = vld [vmem:[#allocation13 + $0x1e4] ss:$16 sps:$4 sm:$0xff]   ;;  %v10193_v62 = vld [vmem:[#allocation13 + $0x240] ss:$16 sps:$4 sm:$0xff]   ;;  %v10196_v63 = vld [vmem:[#allocation13 + $0x248] ss:$16 sps:$4 sm:$0xff]  }
 0x35b   :  { %3174 = vmatprep.subr.bf16.mxu0 %v10108_v24  ;;  %v10180_v24 = vld [vmem:[#allocation13 + $0x1ec] ss:$16 sps:$4 sm:$0xff]  }
 0x35d   :  { %3093 = vmatpush1.bf16.msra.mxu1 %v10103_v13  ;;  %v9560_v13 = vadd.f32 %v1852_v3, %v962_v2  ;;  %v10199_v2 = vld [vmem:[#allocation13 + $0x260] ss:$16 sps:$4 sm:$0xff]   ;;  %v10202_v3 = vld [vmem:[#allocation13 + $0x268] ss:$16 sps:$4 sm:$0xff]  }
 0x35e   :  { %3175 = vmatpush1.bf16.msra.mxu0 %v10106_v14  ;;  %3094 = vmatprep.subr.bf16.mxu1 %v10111_v15  ;;  %v10175_v14 = vld [vmem:[#allocation13 + $0x1e0] ss:$16 sps:$4 sm:$0xff]   ;;  %v10178_v15 = vld [vmem:[#allocation13 + $0x1e8] ss:$16 sps:$4 sm:$0xff]  }
 0x35f   :  { %3176 = vmatprep.subr.bf16.mxu0 %v10114_v16 }
 0x361   :  { %3095 = vmatpush1.bf16.msra.mxu1 %v10109_v17 }
 0x362   :  { %3177 = vmatpush1.bf16.msra.mxu0 %v10112_v18  ;;  %3096 = vmatprep.subr.bf16.mxu1 %v10117_v19  ;;  %v9554_v19 = vadd.f32 %v1840_v7, %v950_v6  ;;  %v10205_v6 = vld [vmem:[#allocation13 + $0x280] ss:$16 sps:$4 sm:$0xff]   ;;  %v10208_v7 = vld [vmem:[#allocation13 + $0x288] ss:$16 sps:$4 sm:$0xff]  }
 0x363   :  { %3178 = vmatprep.subr.bf16.mxu0 %v10120_v20 }
 0x365   :  { %3097 = vmatpush1.bf16.msra.mxu1 %v10115_v21 }
 0x366   :  { %3179 = vmatpush1.bf16.msra.mxu0 %v10118_v22  ;;  %3098 = vmatprep.subr.bf16.mxu1 %v10123_v23 }
 0x367   :  { %3180 = vmatprep.subr.bf16.mxu0 %v10126_v26  ;;  %v10183_v26 = vld [vmem:[#allocation13 + $0x204] ss:$16 sps:$4 sm:$0xff]  }
 0x369   :  { %3099 = vmatpush1.bf16.msra.mxu1 %v10121_v29 }
 0x36a   :  { %3181 = vmatpush1.bf16.msra.mxu0 %v10124_v30  ;;  %3100 = vmatprep.subr.bf16.mxu1 %v10129_v31 }
 0x36b   :  { %3182 = vmatprep.subr.bf16.mxu0 %v10132_v32 }
 0x36d   :  { %3101 = vmatpush1.bf16.msra.mxu1 %v10127_v34 }
 0x36e   :  { %3183 = vmatpush1.bf16.msra.mxu0 %v10130_v35  ;;  %3102 = vmatprep.subr.bf16.mxu1 %v10135_v36  ;;  %v10186_v36 = vld [vmem:[#allocation13 + $0x20c] ss:$16 sps:$4 sm:$0xff]  }
 0x36f   :  { %3184 = vmatprep.subr.bf16.mxu0 %v10138_v37 }
 0x371   :  { %3103 = vmatpush1.bf16.msra.mxu1 %v10133_v38 }
 0x372   :  { %3185 = vmatpush1.bf16.msra.mxu0 %v10136_v39  ;;  %3104 = vmatprep.subr.bf16.mxu1 %v10141_v40 }
 0x373   :  { %3186 = vmatprep.subr.bf16.mxu0 %v10144_v41 }
 0x375   :  { %3105 = vmatpush1.bf16.msra.mxu1 %v10139_v42 }
 0x376   :  { %3187 = vmatpush1.bf16.msra.mxu0 %v10142_v44  ;;  %3106 = vmatprep.subr.bf16.mxu1 %v10147_v45 }
 0x377   :  { %3188 = vmatprep.subr.bf16.mxu0 %v10150_v46 }
 0x379   :  { %3107 = vmatpush1.bf16.msra.mxu1 %v10145_v47 }
 0x37a   :  { %3189 = vmatpush1.bf16.msra.mxu0 %v10148_v48  ;;  %3108 = vmatprep.subr.bf16.mxu1 %v10153_v49 }
 0x37b   :  { %3190 = vmatprep.subr.bf16.mxu0 %v10156_v50 }
 0x37d   :  { %3109 = vmatpush1.bf16.msra.mxu1 %v10151_v51 }
 0x37e   :  { %3191 = vmatpush1.bf16.msra.mxu0 %v10154_v8  ;;  %3110 = vmatprep.subr.bf16.mxu1 %v10159_v52 }
 0x37f   :  { %3192 = vmatprep.subr.bf16.mxu0 %v10162_v53 }
 0x381   :  { %3111 = vmatpush1.bf16.msra.mxu1 %v10157_v54  ;;  %v10181_v54 = vld [vmem:[#allocation13 + $0x200] ss:$16 sps:$4 sm:$0xff]  }
 0x382   :  { %3193 = vmatpush1.bf16.msra.mxu0 %v10160_v55  ;;  %3112 = vmatprep.subr.bf16.mxu1 %v10165_v56  ;;  %v10184_v55 = vld [vmem:[#allocation13 + $0x208] ss:$16 sps:$4 sm:$0xff]  }
 0x383   :  { %3194 = vmatprep.subr.bf16.mxu0 %v10168_v57  ;;  %v10189_v57 = vld [vmem:[#allocation13 + $0x224] ss:$16 sps:$4 sm:$0xff]  }
 0x385   :  { %3113 = vmatpush1.bf16.msra.mxu1 %v10163_v27  ;;  %v10192_v27 = vld [vmem:[#allocation13 + $0x22c] ss:$16 sps:$4 sm:$0xff]  }
 0x386   :  { %3195 = vmatpush1.bf16.msra.mxu0 %v10166_v58  ;;  %3114 = vmatprep.subr.bf16.mxu1 %v10171_v0  ;;  %v10201_v0 = vld [vmem:[#allocation13 + $0x264] ss:$16 sps:$4 sm:$0xff]  }
 0x387   :  { %3196 = vmatprep.subr.bf16.mxu0 %v10174_v1  ;;  %v10204_v1 = vld [vmem:[#allocation13 + $0x26c] ss:$16 sps:$4 sm:$0xff]  }
 0x389   :  { %3115 = vmatpush1.bf16.msra.mxu1 %v10169_v4  ;;  %v10207_v4 = vld [vmem:[#allocation13 + $0x284] ss:$16 sps:$4 sm:$0xff]  }
 0x38a   :  { %3197 = vmatpush1.bf16.msra.mxu0 %v10172_v5  ;;  %3116 = vmatprep.subr.bf16.mxu1 %v10177_v12  ;;  %v10210_v5 = vld [vmem:[#allocation13 + $0x28c] ss:$16 sps:$4 sm:$0xff]   ;;  %v10211_v12 = vld [vmem:[#allocation13 + $0x2a0] ss:$16 sps:$4 sm:$0xff]  }
 0x38b   :  { %3198 = vmatprep.subr.bf16.mxu0 %v10180_v24  ;;  %v10214_v24 = vld [vmem:[#allocation13 + $0x2a8] ss:$16 sps:$4 sm:$0xff]  }
 0x38d   :  { %3117 = vmatpush1.bf16.msra.mxu1 %v10175_v14  ;;  %v10222_v14 = vld [vmem:[#allocation13 + $0x2cc] ss:$16 sps:$4 sm:$0xff]  }
 0x38e   :  { %3199 = vmatpush1.bf16.msra.mxu0 %v10178_v15  ;;  %3127 = vmatprep.subr.bf16.mxu1 %v10183_v26  ;;  %v10217_v15 = vld [vmem:[#allocation13 + $0x2c0] ss:$16 sps:$4 sm:$0xff]  }
 0x38f   :  { %3209 = vmatprep.subr.bf16.mxu0 %v10186_v36  ;;  %v10229_v26 = vld [vmem:[#allocation13 + $0x300] ss:$16 sps:$4 sm:$0xff]   ;;  %v10243_v36 = vld [vmem:[#allocation13 + $0x344] ss:$16 sps:$4 sm:$0xff]  }
 0x423   :  { %v2211_v16 = vpop.f32.mrb[4].mxu1 }
 0x424   :  { %v2252_v17 = vpop.f32.mrb[8].mxu0  ;;  %v2213_v18 = vpop.f32.mrb[5].mxu1  ;;  %v9555_v38 = vadd.f32 %v9554_v19, %v2211_v16  ;;  %v10220_v16 = vld [vmem:[#allocation13 + $0x2c8] ss:$16 sps:$4 sm:$0xff]   ;;  %v10223_v19 = vld [vmem:[#allocation13 + $0x2e0] ss:$16 sps:$4 sm:$0xff]  }
 0x425   :  { %v12006_v20 = vadd.f32 %v9558_v9, %v2252_v17  ;;  %v9557_v21 = vadd.f32 %v9556_v25, %v2213_v18  ;;  %v2254_v22 = vpop.f32.mrb[9].mxu0  ;;  %v2215_v23 = vpop.f32.mrb[6].mxu1  ;;  %v10213_v9 = vld [vmem:[#allocation13 + $0x2a4] ss:$16 sps:$4 sm:$0xff]   ;;  %v10216_v25 = vld [vmem:[#allocation13 + $0x2ac] ss:$16 sps:$4 sm:$0xff]  }
 0x426   :  { %v9561_v29 = vadd.f32 %v9560_v13, %v2254_v22  ;;  %v2256_v30 = vpop.f32.mrb[10].mxu0  ;;  %v2216_v31 = vpop.f32.mrb[7].mxu1  ;;  %v2263_v40 = vmax.f32 %v9555_v38, 0.0  ;;  %v10219_v13 = vld [vmem:[#allocation13 + $0x2c4] ss:$16 sps:$4 sm:$0xff]  }
 0x427   :  { %v2265_v32 = vmax.f32 %v12006_v20, 0.0  ;;  %v2264_v34 = vmax.f32 %v9557_v21, 0.0  ;;  %v2257_v35 = vpop.f32.mrb[11].mxu0  ;;  %v10225_v17 = vld [vmem:[#allocation13 + $0x2e4] ss:$16 sps:$4 sm:$0xff]  }
 0x428   :  { %v2266_v37 = vmax.f32 %v9561_v29, 0.0  ;;  %v10228_v18 = vld [vmem:[#allocation13 + $0x2ec] ss:$16 sps:$4 sm:$0xff]   ;;  %v10226_v21 = vld [vmem:[#allocation13 + $0x2e8] ss:$16 sps:$4 sm:$0xff]  }
 0x429   :  { %v9688_v39 = vpack.i.bf16 %v2265_v32, %v2264_v34  ;;  %v10231_v22 = vld [vmem:[#allocation13 + $0x304] ss:$16 sps:$4 sm:$0xff]   ;;  %v10234_v23 = vld [vmem:[#allocation13 + $0x30c] ss:$16 sps:$4 sm:$0xff]   ;;  %v10232_v29 = vld [vmem:[#allocation13 + $0x308] ss:$16 sps:$4 sm:$0xff]  }
 0x42a   :  { %2277 = vrot.lane.b32.xlu1 %v2266_v37, %s11613_s8  ;;  %v10237_v30 = vld [vmem:[#allocation13 + $0x324] ss:$16 sps:$4 sm:$0xff]   ;;  %v10240_v31 = vld [vmem:[#allocation13 + $0x32c] ss:$16 sps:$4 sm:$0xff]   ;;  %v10238_v35 = vld [vmem:[#allocation13 + $0x328] ss:$16 sps:$4 sm:$0xff]  }
 0x42b   :  { %9689 = vrot.lane.b32.xlu0 %v9688_v39, %s11613_s8  ;;  %v10241_v38 = vld [vmem:[#allocation13 + $0x340] ss:$16 sps:$4 sm:$0xff]   ;;  %v10244_v39 = vld [vmem:[#allocation13 + $0x348] ss:$16 sps:$4 sm:$0xff]  }
 0x42c   :  { %v10283_v20 = vld [vmem:[#allocation14 + $0x20] ss:$16 sps:$4 sm:$0xff]  }
 0x42f   :  { %2271 = vrot.lane.b32.xlu0 %v2263_v40, %s11613_s8 }
 0x49c   :  { %v2278_v41 = vpop.permute.xlu1 %2277 }
 0x49d   :  { %v9690_v42 = vpop.permute.xlu0 %9689  ;;  %v2287_v46 = vsel %vm2279_vm1, %v2278_v41, 0.0 }
 0x49e   :  { %v9692_v44 = vunpack.i.h.bf16 %v9690_v42  ;;  %v9691_v45 = vunpack.i.l.bf16 %v9690_v42  ;;  %v2291_v8 = vmax.f32 %v2266_v37, %v2287_v46  ;;  %v10246_v37 = vld [vmem:[#allocation13 + $0x34c] ss:$16 sps:$4 sm:$0xff]   ;;  %v10247_v42 = vld [vmem:[#allocation13 + $0x360] ss:$16 sps:$4 sm:$0xff]  }
 0x49f   :  { %v10258_v46 = vld [vmem:[#allocation13 + $0x38c] ss:$16 sps:$4 sm:$0xff]  }
 0x4a0   :  { %v12011_v47 = vsel %vm2279_vm1, %v9692_v44, %v2278_v41  ;;  %v2281_v48 = vsel %vm2279_vm1, %v9691_v45, %v9692_v44  ;;  %v12019_v58 = vpack.c.bf16 %v2291_v8, %v2291_v8  ;;  %v10252_v41 = vld [vmem:[#allocation13 + $0x36c] ss:$16 sps:$4 sm:$0xff]   ;;  %v10250_v44 = vld [vmem:[#allocation13 + $0x368] ss:$16 sps:$4 sm:$0xff]   ;;  %v10259_v8 = vld [vmem:[#allocation13 + $0x3a0] ss:$16 sps:$4 sm:$0xff]  }
 0x4a1   :  { %v2289_v49 = vmax.f32 %v2264_v34, %v2281_v48  ;;  %v2272_v50 = vpop.permute.xlu0 %2271  ;;  %v10235_v34 = vld [vmem:[#allocation13 + $0x320] ss:$16 sps:$4 sm:$0xff]  }
 0x4a2   :  { %v2280_v51 = vsel %vm2279_vm1, %v2272_v50, %v9691_v45  ;;  %v10255_v45 = vld [vmem:[#allocation13 + $0x384] ss:$16 sps:$4 sm:$0xff]   ;;  %v10253_v48 = vld [vmem:[#allocation13 + $0x380] ss:$16 sps:$4 sm:$0xff]  }
 0x4a3   :  { %v2288_v52 = vmax.f32 %v2263_v40, %v2280_v51  ;;  %v12013_v53 = vpack.c.bf16 %v2289_v49, %v2289_v49  ;;  %v10249_v40 = vld [vmem:[#allocation13 + $0x364] ss:$16 sps:$4 sm:$0xff]   ;;  %v10256_v49 = vld [vmem:[#allocation13 + $0x388] ss:$16 sps:$4 sm:$0xff]   ;;  %v10264_v51 = vld [vmem:[#allocation13 + $0x3ac] ss:$16 sps:$4 sm:$0xff]  }
 0x4a4   :  { %v10261_v50 = vld [vmem:[#allocation13 + $0x3a4] ss:$16 sps:$4 sm:$0xff]  }
 0x4a5   :  { %v12015_v56 = vpack.c.bf16 %v2288_v52, %v2288_v52  ;;  %3118 = vmatprep.mubr.bf16.mxu1 %v12013_v53  ;;  %3200 = vmatprep.mubr.bf16.mxu0 %v12013_v53  ;;  %v10262_v52 = vld [vmem:[#allocation13 + $0x3a8] ss:$16 sps:$4 sm:$0xff]  }
 0x4a7   :  { %3119 = vmatmul.mubr.bf16.vlgmr.msra.gmra.mrb[8].mxu1 %v12015_v56  ;;  %3201 = vmatmul.mubr.bf16.vlgmr.msra.gmra.mrb[12].mxu0 %v12015_v56 }
 0x4a8   :  { %3128 = vmatpush1.bf16.msra.mxu1 %v10181_v54  ;;  %3210 = vmatpush1.bf16.msra.mxu0 %v10184_v55  ;;  %v10267_v54 = vld [vmem:[#allocation13 + $0x3c4] ss:$16 sps:$4 sm:$0xff]   ;;  %v10270_v55 = vld [vmem:[#allocation13 + $0x3cc] ss:$16 sps:$4 sm:$0xff]  }
 0x4a9   :  { %3159 = vmatprep.mubr.bf16.mxu1 %v12019_v58  ;;  %3241 = vmatprep.mubr.bf16.mxu0 %v12019_v58 }
 0x4aa   :  { %3129 = vmatprep.subr.bf16.mxu1 %v10189_v57  ;;  %3211 = vmatprep.subr.bf16.mxu0 %v10192_v27  ;;  %v10265_v57 = vld [vmem:[#allocation13 + $0x3c0] ss:$16 sps:$4 sm:$0xff]   ;;  %v10268_v27 = vld [vmem:[#allocation13 + $0x3c8] ss:$16 sps:$4 sm:$0xff]  }
 0x4ac   :  { %3130 = vmatpush1.bf16.msra.mxu1 %v10187_v59  ;;  %3212 = vmatpush1.bf16.msra.mxu0 %v10190_v60  ;;  %v10273_v59 = vld [vmem:[#allocation13 + $0x3e4] ss:$16 sps:$4 sm:$0xff]   ;;  %v10276_v60 = vld [vmem:[#allocation13 + $0x3ec] ss:$16 sps:$4 sm:$0xff]  }
 0x4ad   :  { %3131 = vmatprep.subr.bf16.mxu1 %v10195_v61  ;;  %3213 = vmatprep.subr.bf16.mxu0 %v10198_v33  ;;  %v10271_v61 = vld [vmem:[#allocation13 + $0x3e0] ss:$16 sps:$4 sm:$0xff]   ;;  %v10274_v33 = vld [vmem:[#allocation13 + $0x3e8] ss:$16 sps:$4 sm:$0xff]  }
 0x4b0   :  { %3132 = vmatpush1.bf16.msra.mxu1 %v10193_v62  ;;  %3214 = vmatpush1.bf16.msra.mxu0 %v10196_v63  ;;  %v2290_v62 = vmax.f32 %v2265_v32, %v12011_v47  ;;  %v10279_v63 = vld [vmem:[#allocation14 + $0x4] ss:$16 sps:$4 sm:$0xff]   ;;  %v10286_v32 = vld [vmem:[#allocation14 + $0x28] ss:$16 sps:$4 sm:$0xff]  }
 0x4b1   :  { %3133 = vmatprep.subr.bf16.mxu1 %v10201_v0  ;;  %3215 = vmatprep.subr.bf16.mxu0 %v10204_v1  ;;  %v10282_v0 = vld [vmem:[#allocation14 + $0xc] ss:$16 sps:$4 sm:$0xff]   ;;  %v10277_v1 = vld [vmem:[#allocation14] ss:$16 sps:$4 sm:$0xff]   ;;  %v10291_v47 = vld [vmem:[#allocation14 + $0x44] ss:$16 sps:$4 sm:$0xff]  }
 0x4b4   :  { %3134 = vmatpush1.bf16.msra.mxu1 %v10199_v2  ;;  %3216 = vmatpush1.bf16.msra.mxu0 %v10202_v3  ;;  %v10280_v2 = vld [vmem:[#allocation14 + $0x8] ss:$16 sps:$4 sm:$0xff]   ;;  %v12028_v3 = vpack.c.bf16 %v2290_v62, %v2290_v62 }
 0x4b5   :  { %3135 = vmatprep.subr.bf16.mxu1 %v10207_v4  ;;  %3217 = vmatprep.subr.bf16.mxu0 %v10210_v5  ;;  %v10285_v4 = vld [vmem:[#allocation14 + $0x24] ss:$16 sps:$4 sm:$0xff]   ;;  %v10288_v5 = vld [vmem:[#allocation14 + $0x2c] ss:$16 sps:$4 sm:$0xff]   ;;  %v10358_v62 = vld [vmem:[#allocation14 + $0x1a8] ss:$16 sps:$4 sm:$0xff]  }
 0x4b8   :  { %3136 = vmatpush1.bf16.msra.mxu1 %v10205_v6  ;;  %3218 = vmatpush1.bf16.msra.mxu0 %v10208_v7  ;;  %v10294_v6 = vld [vmem:[#allocation14 + $0x4c] ss:$16 sps:$4 sm:$0xff]   ;;  %v10289_v7 = vld [vmem:[#allocation14 + $0x40] ss:$16 sps:$4 sm:$0xff]  }
 0x4b9   :  { %3137 = vmatprep.subr.bf16.mxu1 %v10213_v9  ;;  %3219 = vmatprep.subr.bf16.mxu0 %v10216_v25  ;;  %v10292_v9 = vld [vmem:[#allocation14 + $0x48] ss:$16 sps:$4 sm:$0xff]   ;;  %v10297_v25 = vld [vmem:[#allocation14 + $0x64] ss:$16 sps:$4 sm:$0xff]  }
 0x4bc   :  { %3138 = vmatpush1.bf16.msra.mxu1 %v10211_v12  ;;  %3220 = vmatpush1.bf16.msra.mxu0 %v10214_v24  ;;  %v10300_v12 = vld [vmem:[#allocation14 + $0x6c] ss:$16 sps:$4 sm:$0xff]   ;;  %v10295_v24 = vld [vmem:[#allocation14 + $0x60] ss:$16 sps:$4 sm:$0xff]  }
 0x4bd   :  { %3139 = vmatprep.subr.bf16.mxu1 %v10219_v13  ;;  %3221 = vmatprep.subr.bf16.mxu0 %v10222_v14  ;;  %v10298_v13 = vld [vmem:[#allocation14 + $0x68] ss:$16 sps:$4 sm:$0xff]   ;;  %v10303_v14 = vld [vmem:[#allocation14 + $0x84] ss:$16 sps:$4 sm:$0xff]  }
 0x4c0   :  { %3140 = vmatpush1.bf16.msra.mxu1 %v10217_v15  ;;  %3222 = vmatpush1.bf16.msra.mxu0 %v10220_v16  ;;  %v10306_v15 = vld [vmem:[#allocation14 + $0x8c] ss:$16 sps:$4 sm:$0xff]   ;;  %v10301_v16 = vld [vmem:[#allocation14 + $0x80] ss:$16 sps:$4 sm:$0xff]  }
 0x4c1   :  { %3141 = vmatprep.subr.bf16.mxu1 %v10225_v17  ;;  %3223 = vmatprep.subr.bf16.mxu0 %v10228_v18  ;;  %v10304_v17 = vld [vmem:[#allocation14 + $0x88] ss:$16 sps:$4 sm:$0xff]   ;;  %v10309_v18 = vld [vmem:[#allocation14 + $0xa4] ss:$16 sps:$4 sm:$0xff]  }
 0x4c4   :  { %3142 = vmatpush1.bf16.msra.mxu1 %v10223_v19  ;;  %3224 = vmatpush1.bf16.msra.mxu0 %v10226_v21  ;;  %v10312_v19 = vld [vmem:[#allocation14 + $0xac] ss:$16 sps:$4 sm:$0xff]   ;;  %v10307_v21 = vld [vmem:[#allocation14 + $0xa0] ss:$16 sps:$4 sm:$0xff]  }
 0x4c5   :  { %3143 = vmatprep.subr.bf16.mxu1 %v10231_v22  ;;  %3225 = vmatprep.subr.bf16.mxu0 %v10234_v23  ;;  %v10310_v22 = vld [vmem:[#allocation14 + $0xa8] ss:$16 sps:$4 sm:$0xff]   ;;  %v10315_v23 = vld [vmem:[#allocation14 + $0xc4] ss:$16 sps:$4 sm:$0xff]  }
 0x4c8   :  { %3144 = vmatpush1.bf16.msra.mxu1 %v10229_v26  ;;  %3226 = vmatpush1.bf16.msra.mxu0 %v10232_v29  ;;  %v10318_v26 = vld [vmem:[#allocation14 + $0xcc] ss:$16 sps:$4 sm:$0xff]   ;;  %v10313_v29 = vld [vmem:[#allocation14 + $0xc0] ss:$16 sps:$4 sm:$0xff]  }
 0x4c9   :  { %3145 = vmatprep.subr.bf16.mxu1 %v10237_v30  ;;  %3227 = vmatprep.subr.bf16.mxu0 %v10240_v31  ;;  %v10316_v30 = vld [vmem:[#allocation14 + $0xc8] ss:$16 sps:$4 sm:$0xff]   ;;  %v10321_v31 = vld [vmem:[#allocation14 + $0xe4] ss:$16 sps:$4 sm:$0xff]  }
 0x4cc   :  { %3146 = vmatpush1.bf16.msra.mxu1 %v10235_v34  ;;  %3228 = vmatpush1.bf16.msra.mxu0 %v10238_v35  ;;  %v10324_v34 = vld [vmem:[#allocation14 + $0xec] ss:$16 sps:$4 sm:$0xff]   ;;  %v10319_v35 = vld [vmem:[#allocation14 + $0xe0] ss:$16 sps:$4 sm:$0xff]  }
 0x4cd   :  { %3147 = vmatprep.subr.bf16.mxu1 %v10243_v36  ;;  %3229 = vmatprep.subr.bf16.mxu0 %v10246_v37  ;;  %v10322_v36 = vld [vmem:[#allocation14 + $0xe8] ss:$16 sps:$4 sm:$0xff]   ;;  %v10327_v37 = vld [vmem:[#allocation14 + $0x104] ss:$16 sps:$4 sm:$0xff]  }
 0x4d0   :  { %3148 = vmatpush1.bf16.msra.mxu1 %v10241_v38  ;;  %3230 = vmatpush1.bf16.msra.mxu0 %v10244_v39  ;;  %v10330_v38 = vld [vmem:[#allocation14 + $0x10c] ss:$16 sps:$4 sm:$0xff]   ;;  %v10325_v39 = vld [vmem:[#allocation14 + $0x100] ss:$16 sps:$4 sm:$0xff]  }
 0x4d1   :  { %3149 = vmatprep.subr.bf16.mxu1 %v10249_v40  ;;  %3231 = vmatprep.subr.bf16.mxu0 %v10252_v41  ;;  %v10328_v40 = vld [vmem:[#allocation14 + $0x108] ss:$16 sps:$4 sm:$0xff]   ;;  %v10333_v41 = vld [vmem:[#allocation14 + $0x124] ss:$16 sps:$4 sm:$0xff]  }
 0x4d4   :  { %3150 = vmatpush1.bf16.msra.mxu1 %v10247_v42  ;;  %3232 = vmatpush1.bf16.msra.mxu0 %v10250_v44  ;;  %v10336_v42 = vld [vmem:[#allocation14 + $0x12c] ss:$16 sps:$4 sm:$0xff]   ;;  %v10331_v44 = vld [vmem:[#allocation14 + $0x120] ss:$16 sps:$4 sm:$0xff]  }
 0x4d5   :  { %3151 = vmatprep.subr.bf16.mxu1 %v10255_v45  ;;  %3233 = vmatprep.subr.bf16.mxu0 %v10258_v46  ;;  %v10334_v45 = vld [vmem:[#allocation14 + $0x128] ss:$16 sps:$4 sm:$0xff]   ;;  %v10339_v46 = vld [vmem:[#allocation14 + $0x144] ss:$16 sps:$4 sm:$0xff]  }
 0x4d8   :  { %3152 = vmatpush1.bf16.msra.mxu1 %v10253_v48  ;;  %3234 = vmatpush1.bf16.msra.mxu0 %v10256_v49  ;;  %v10342_v48 = vld [vmem:[#allocation14 + $0x14c] ss:$16 sps:$4 sm:$0xff]   ;;  %v10337_v49 = vld [vmem:[#allocation14 + $0x140] ss:$16 sps:$4 sm:$0xff]  }
 0x4d9   :  { %3153 = vmatprep.subr.bf16.mxu1 %v10261_v50  ;;  %3235 = vmatprep.subr.bf16.mxu0 %v10264_v51  ;;  %v10340_v50 = vld [vmem:[#allocation14 + $0x148] ss:$16 sps:$4 sm:$0xff]   ;;  %v10345_v51 = vld [vmem:[#allocation14 + $0x164] ss:$16 sps:$4 sm:$0xff]  }
 0x4dc   :  { %3154 = vmatpush1.bf16.msra.mxu1 %v10259_v8  ;;  %3236 = vmatpush1.bf16.msra.mxu0 %v10262_v52  ;;  %v10348_v8 = vld [vmem:[#allocation14 + $0x16c] ss:$16 sps:$4 sm:$0xff]   ;;  %v10343_v52 = vld [vmem:[#allocation14 + $0x160] ss:$16 sps:$4 sm:$0xff]  }
 0x4dd   :  { %3155 = vmatprep.subr.bf16.mxu1 %v10267_v54  ;;  %3237 = vmatprep.subr.bf16.mxu0 %v10270_v55  ;;  %v10346_v54 = vld [vmem:[#allocation14 + $0x168] ss:$16 sps:$4 sm:$0xff]   ;;  %v10351_v55 = vld [vmem:[#allocation14 + $0x184] ss:$16 sps:$4 sm:$0xff]  }
 0x4e0   :  { %3156 = vmatpush1.bf16.msra.mxu1 %v10265_v57  ;;  %3238 = vmatpush1.bf16.msra.mxu0 %v10268_v27  ;;  %v10354_v57 = vld [vmem:[#allocation14 + $0x18c] ss:$16 sps:$4 sm:$0xff]   ;;  %v10349_v27 = vld [vmem:[#allocation14 + $0x180] ss:$16 sps:$4 sm:$0xff]  }
 0x4e1   :  { %3157 = vmatprep.subr.bf16.mxu1 %v10273_v59  ;;  %3239 = vmatprep.subr.bf16.mxu0 %v10276_v60  ;;  %v10352_v59 = vld [vmem:[#allocation14 + $0x188] ss:$16 sps:$4 sm:$0xff]   ;;  %v10357_v60 = vld [vmem:[#allocation14 + $0x1a4] ss:$16 sps:$4 sm:$0xff]  }
 0x4e4   :  { %3158 = vmatpush1.bf16.msra.mxu1 %v10271_v61  ;;  %3240 = vmatpush1.bf16.msra.mxu0 %v10274_v33  ;;  %v10360_v61 = vld [vmem:[#allocation14 + $0x1ac] ss:$16 sps:$4 sm:$0xff]   ;;  %v10355_v33 = vld [vmem:[#allocation14 + $0x1a0] ss:$16 sps:$4 sm:$0xff]  }
 0x4e5   :  { %4048 = vmatprep.subr.bf16.mxu1 %v10279_v63  ;;  %4130 = vmatprep.subr.bf16.mxu0 %v10282_v0  ;;  %v10363_v63 = vld [vmem:[#allocation14 + $0x1c4] ss:$16 sps:$4 sm:$0xff]   ;;  %v10366_v0 = vld [vmem:[#allocation14 + $0x1cc] ss:$16 sps:$4 sm:$0xff]  }
 0x4e7   :  { %3160 = vmatmul.mubr.bf16.vlgmr.msra.gmra.mrb[8].mxu1 %v12028_v3  ;;  %3242 = vmatmul.mubr.bf16.vlgmr.msra.gmra.mrb[12].mxu0 %v12028_v3 }
 0x4e8   :  { %4049 = vmatpush1.bf16.msra.mxu1 %v10277_v1  ;;  %4131 = vmatpush1.bf16.msra.mxu0 %v10280_v2  ;;  %v10361_v1 = vld [vmem:[#allocation14 + $0x1c0] ss:$16 sps:$4 sm:$0xff]   ;;  %v10364_v2 = vld [vmem:[#allocation14 + $0x1c8] ss:$16 sps:$4 sm:$0xff]  }
 0x4e9   :  { %4050 = vmatprep.subr.bf16.mxu1 %v10285_v4  ;;  %4132 = vmatprep.subr.bf16.mxu0 %v10288_v5  ;;  %v10369_v4 = vld [vmem:[#allocation14 + $0x1e4] ss:$16 sps:$4 sm:$0xff]   ;;  %v10372_v5 = vld [vmem:[#allocation14 + $0x1ec] ss:$16 sps:$4 sm:$0xff]  }
 0x4ec   :  { %4051 = vmatpush1.bf16.msra.mxu1 %v10283_v20  ;;  %4133 = vmatpush1.bf16.msra.mxu0 %v10286_v32  ;;  %v10367_v20 = vld [vmem:[#allocation14 + $0x1e0] ss:$16 sps:$4 sm:$0xff]   ;;  %v10370_v32 = vld [vmem:[#allocation14 + $0x1e8] ss:$16 sps:$4 sm:$0xff]  }
 0x4ed   :  { %4052 = vmatprep.subr.bf16.mxu1 %v10291_v47  ;;  %4134 = vmatprep.subr.bf16.mxu0 %v10294_v6  ;;  %v10375_v47 = vld [vmem:[#allocation14 + $0x204] ss:$16 sps:$4 sm:$0xff]   ;;  %v10378_v6 = vld [vmem:[#allocation14 + $0x20c] ss:$16 sps:$4 sm:$0xff]  }
 0x4f0   :  { %4053 = vmatpush1.bf16.msra.mxu1 %v10289_v7  ;;  %4135 = vmatpush1.bf16.msra.mxu0 %v10292_v9  ;;  %v12035_v7 = vld [vmem:[%s12162_s10] sm:$0xf] }
 0x4f1   :  { %4054 = vmatprep.subr.bf16.mxu1 %v10297_v25  ;;  %4136 = vmatprep.subr.bf16.mxu0 %v10300_v12  ;;  %v2429_v9 = vrot.slane %v12035_v7, %v11951_v10  ;;  %v2433_v25 = vrot.slane %v12035_v7, %v11954_v11  ;;  %v2441_v12 = vrot.slane %v12035_v7, %v11972_v28 }
 0x4f4   :  { %4055 = vmatpush1.bf16.msra.mxu1 %v10295_v24  ;;  %4137 = vmatpush1.bf16.msra.mxu0 %v10298_v13 }
 0x4f5   :  { %4056 = vmatprep.subr.bf16.mxu1 %v10303_v14  ;;  %4138 = vmatprep.subr.bf16.mxu0 %v10306_v15 }
 0x4f8   :  { %4057 = vmatpush1.bf16.msra.mxu1 %v10301_v16  ;;  %4139 = vmatpush1.bf16.msra.mxu0 %v10304_v17 }
 0x4f9   :  { %4058 = vmatprep.subr.bf16.mxu1 %v10309_v18  ;;  %4140 = vmatprep.subr.bf16.mxu0 %v10312_v19 }
 0x4fc   :  { %4059 = vmatpush1.bf16.msra.mxu1 %v10307_v21  ;;  %4141 = vmatpush1.bf16.msra.mxu0 %v10310_v22 }
 0x4fd   :  { %4060 = vmatprep.subr.bf16.mxu1 %v10315_v23  ;;  %4142 = vmatprep.subr.bf16.mxu0 %v10318_v26 }
 0x500   :  { %4061 = vmatpush1.bf16.msra.mxu1 %v10313_v29  ;;  %4143 = vmatpush1.bf16.msra.mxu0 %v10316_v30 }
 0x501   :  { %4062 = vmatprep.subr.bf16.mxu1 %v10321_v31  ;;  %4144 = vmatprep.subr.bf16.mxu0 %v10324_v34  ;;  %v10373_v34 = vld [vmem:[#allocation14 + $0x200] ss:$16 sps:$4 sm:$0xff]  }
 0x504   :  { %4063 = vmatpush1.bf16.msra.mxu1 %v10319_v35  ;;  %4145 = vmatpush1.bf16.msra.mxu0 %v10322_v36  ;;  %v10376_v35 = vld [vmem:[#allocation14 + $0x208] ss:$16 sps:$4 sm:$0xff]  }
 0x505   :  { %4064 = vmatprep.subr.bf16.mxu1 %v10327_v37  ;;  %4146 = vmatprep.subr.bf16.mxu0 %v10330_v38  ;;  %v10381_v37 = vld [vmem:[#allocation14 + $0x224] ss:$16 sps:$4 sm:$0xff]   ;;  %v10384_v38 = vld [vmem:[#allocation14 + $0x22c] ss:$16 sps:$4 sm:$0xff]  }
 0x508   :  { %4065 = vmatpush1.bf16.msra.mxu1 %v10325_v39  ;;  %4147 = vmatpush1.bf16.msra.mxu0 %v10328_v40  ;;  %v10379_v40 = vld [vmem:[#allocation14 + $0x220] ss:$16 sps:$4 sm:$0xff]  }
 0x509   :  { %4066 = vmatprep.subr.bf16.mxu1 %v10333_v41  ;;  %4148 = vmatprep.subr.bf16.mxu0 %v10336_v42  ;;  %v10382_v41 = vld [vmem:[#allocation14 + $0x228] ss:$16 sps:$4 sm:$0xff]   ;;  %v10387_v42 = vld [vmem:[#allocation14 + $0x244] ss:$16 sps:$4 sm:$0xff]  }
 0x50c   :  { %4067 = vmatpush1.bf16.msra.mxu1 %v10331_v44  ;;  %4149 = vmatpush1.bf16.msra.mxu0 %v10334_v45  ;;  %v10390_v44 = vld [vmem:[#allocation14 + $0x24c] ss:$16 sps:$4 sm:$0xff]   ;;  %v10385_v45 = vld [vmem:[#allocation14 + $0x240] ss:$16 sps:$4 sm:$0xff]  }
 0x50d   :  { %4068 = vmatprep.subr.bf16.mxu1 %v10339_v46  ;;  %4150 = vmatprep.subr.bf16.mxu0 %v10342_v48  ;;  %v10388_v46 = vld [vmem:[#allocation14 + $0x248] ss:$16 sps:$4 sm:$0xff]   ;;  %v10393_v48 = vld [vmem:[#allocation14 + $0x264] ss:$16 sps:$4 sm:$0xff]  }
 0x510   :  { %4069 = vmatpush1.bf16.msra.mxu1 %v10337_v49  ;;  %4151 = vmatpush1.bf16.msra.mxu0 %v10340_v50  ;;  %v10396_v49 = vld [vmem:[#allocation14 + $0x26c] ss:$16 sps:$4 sm:$0xff]   ;;  %v10391_v50 = vld [vmem:[#allocation14 + $0x260] ss:$16 sps:$4 sm:$0xff]  }
 0x511   :  { %4070 = vmatprep.subr.bf16.mxu1 %v10345_v51  ;;  %4152 = vmatprep.subr.bf16.mxu0 %v10348_v8  ;;  %v10394_v51 = vld [vmem:[#allocation14 + $0x268] ss:$16 sps:$4 sm:$0xff]   ;;  %v10399_v8 = vld [vmem:[#allocation14 + $0x284] ss:$16 sps:$4 sm:$0xff]  }
 0x514   :  { %4071 = vmatpush1.bf16.msra.mxu1 %v10343_v52  ;;  %4153 = vmatpush1.bf16.msra.mxu0 %v10346_v54  ;;  %v10402_v52 = vld [vmem:[#allocation14 + $0x28c] ss:$16 sps:$4 sm:$0xff]   ;;  %v10397_v54 = vld [vmem:[#allocation14 + $0x280] ss:$16 sps:$4 sm:$0xff]  }
 0x515   :  { %4072 = vmatprep.subr.bf16.mxu1 %v10351_v55  ;;  %4154 = vmatprep.subr.bf16.mxu0 %v10354_v57  ;;  %v10400_v55 = vld [vmem:[#allocation14 + $0x288] ss:$16 sps:$4 sm:$0xff]   ;;  %v10405_v57 = vld [vmem:[#allocation14 + $0x2a4] ss:$16 sps:$4 sm:$0xff]  }
 0x518   :  { %4073 = vmatpush1.bf16.msra.mxu1 %v10349_v27  ;;  %4155 = vmatpush1.bf16.msra.mxu0 %v10352_v59  ;;  %v10408_v27 = vld [vmem:[#allocation14 + $0x2ac] ss:$16 sps:$4 sm:$0xff]   ;;  %v10403_v59 = vld [vmem:[#allocation14 + $0x2a0] ss:$16 sps:$4 sm:$0xff]  }
 0x519   :  { %4074 = vmatprep.subr.bf16.mxu1 %v10357_v60  ;;  %4156 = vmatprep.subr.bf16.mxu0 %v10360_v61  ;;  %v10406_v60 = vld [vmem:[#allocation14 + $0x2a8] ss:$16 sps:$4 sm:$0xff]   ;;  %v10411_v61 = vld [vmem:[#allocation14 + $0x2c4] ss:$16 sps:$4 sm:$0xff]  }
 0x51c   :  { %4075 = vmatpush1.bf16.msra.mxu1 %v10355_v33  ;;  %4157 = vmatpush1.bf16.msra.mxu0 %v10358_v62  ;;  %v10414_v33 = vld [vmem:[#allocation14 + $0x2cc] ss:$16 sps:$4 sm:$0xff]   ;;  %v10409_v62 = vld [vmem:[#allocation14 + $0x2c0] ss:$16 sps:$4 sm:$0xff]  }
 0x51d   :  { %4076 = vmatprep.subr.bf16.mxu1 %v10363_v63  ;;  %4158 = vmatprep.subr.bf16.mxu0 %v10366_v0  ;;  %v10412_v63 = vld [vmem:[#allocation14 + $0x2c8] ss:$16 sps:$4 sm:$0xff]   ;;  %v10417_v0 = vld [vmem:[#allocation14 + $0x2e4] ss:$16 sps:$4 sm:$0xff]  }
 0x520   :  { %4077 = vmatpush1.bf16.msra.mxu1 %v10361_v1  ;;  %4159 = vmatpush1.bf16.msra.mxu0 %v10364_v2  ;;  %v10420_v1 = vld [vmem:[#allocation14 + $0x2ec] ss:$16 sps:$4 sm:$0xff]   ;;  %v10415_v2 = vld [vmem:[#allocation14 + $0x2e0] ss:$16 sps:$4 sm:$0xff]  }
 0x521   :  { %4078 = vmatprep.subr.bf16.mxu1 %v10369_v4  ;;  %4160 = vmatprep.subr.bf16.mxu0 %v10372_v5  ;;  %v10418_v4 = vld [vmem:[#allocation14 + $0x2e8] ss:$16 sps:$4 sm:$0xff]   ;;  %v10423_v5 = vld [vmem:[#allocation14 + $0x304] ss:$16 sps:$4 sm:$0xff]  }
 0x524   :  { %4079 = vmatpush1.bf16.msra.mxu1 %v10367_v20  ;;  %4161 = vmatpush1.bf16.msra.mxu0 %v10370_v32  ;;  %v10426_v20 = vld [vmem:[#allocation14 + $0x30c] ss:$16 sps:$4 sm:$0xff]   ;;  %v10421_v32 = vld [vmem:[#allocation14 + $0x300] ss:$16 sps:$4 sm:$0xff]  }
 0x525   :  { %4089 = vmatprep.subr.bf16.mxu1 %v10375_v47  ;;  %4171 = vmatprep.subr.bf16.mxu0 %v10378_v6  ;;  %v10424_v47 = vld [vmem:[#allocation14 + $0x308] ss:$16 sps:$4 sm:$0xff]   ;;  %v10429_v6 = vld [vmem:[#allocation14 + $0x324] ss:$16 sps:$4 sm:$0xff]  }
 0x5ba   :  { %v3161_v24 = vpop.f32.mrb[8].mxu1  ;;  %v12043_v13 = vpop.f32.mrb[12].mxu0 }
 0x5bb   :  { %v9562_v14 = vadd.f32 %v3161_v24, %v2429_v9  ;;  %v3163_v15 = vpop.f32.mrb[9].mxu1  ;;  %v3245_v16 = vpop.f32.mrb[13].mxu0  ;;  %v10432_v9 = vld [vmem:[#allocation14 + $0x32c] ss:$16 sps:$4 sm:$0xff]   ;;  %v10435_v24 = vld [vmem:[#allocation14 + $0x344] ss:$16 sps:$4 sm:$0xff]  }
 0x5bc   :  { %v9563_v17 = vadd.f32 %v3163_v15, %v2433_v25  ;;  %v9565_v18 = vadd.f32 %v3245_v16, %v2441_v12  ;;  %v3165_v19 = vpop.f32.mrb[10].mxu1  ;;  %v3247_v21 = vpop.f32.mrb[14].mxu0  ;;  %v10427_v25 = vld [vmem:[#allocation14 + $0x320] ss:$16 sps:$4 sm:$0xff]   ;;  %v10430_v12 = vld [vmem:[#allocation14 + $0x328] ss:$16 sps:$4 sm:$0xff]  }
 0x5bd   :  { %v3250_v22 = vmax.f32 %v9562_v14, 0.0  ;;  %v3166_v23 = vpop.f32.mrb[11].mxu1  ;;  %v3248_v26 = vpop.f32.mrb[15].mxu0  ;;  %v10438_v14 = vld [vmem:[#allocation14 + $0x34c] ss:$16 sps:$4 sm:$0xff]  }
 0x5be   :  { %v3251_v29 = vmax.f32 %v9563_v17, 0.0  ;;  %v3253_v30 = vmax.f32 %v9565_v18, 0.0  ;;  %v10433_v15 = vld [vmem:[#allocation14 + $0x340] ss:$16 sps:$4 sm:$0xff]   ;;  %v10436_v16 = vld [vmem:[#allocation14 + $0x348] ss:$16 sps:$4 sm:$0xff]  }
 0x5bf   :  { %v3254_v36 = vpack.c.bf16 %v3250_v22, %v3250_v22  ;;  %v10441_v17 = vld [vmem:[#allocation14 + $0x364] ss:$16 sps:$4 sm:$0xff]   ;;  %v10444_v18 = vld [vmem:[#allocation14 + $0x36c] ss:$16 sps:$4 sm:$0xff]   ;;  %v10439_v19 = vld [vmem:[#allocation14 + $0x360] ss:$16 sps:$4 sm:$0xff]  }
 0x5c0   :  { %v3255_v31 = vpack.c.bf16 %v3251_v29, %v3251_v29  ;;  %v3257_v39 = vpack.c.bf16 %v3253_v30, %v3253_v30  ;;  %v10442_v21 = vld [vmem:[#allocation14 + $0x368] ss:$16 sps:$4 sm:$0xff]   ;;  %v10447_v22 = vld [vmem:[#allocation14 + $0x384] ss:$16 sps:$4 sm:$0xff]   ;;  %v10450_v23 = vld [vmem:[#allocation14 + $0x38c] ss:$16 sps:$4 sm:$0xff]  }
 0x5c1   :  { %v10445_v26 = vld [vmem:[#allocation14 + $0x380] ss:$16 sps:$4 sm:$0xff]   ;;  %v10448_v29 = vld [vmem:[#allocation14 + $0x388] ss:$16 sps:$4 sm:$0xff]   ;;  %v10453_v30 = vld [vmem:[#allocation14 + $0x3a4] ss:$16 sps:$4 sm:$0xff]  }
 0x5c2   :  { %4080 = vmatprep.mubr.bf16.mxu1 %v3255_v31  ;;  %4162 = vmatprep.mubr.bf16.mxu0 %v3255_v31  ;;  %v10456_v31 = vld [vmem:[#allocation14 + $0x3ac] ss:$16 sps:$4 sm:$0xff]  }
 0x5c3   :  { %4081 = vmatmul.mubr.bf16.vlgmr.msra.gmra.mrb[12].mxu1 %v3254_v36  ;;  %4163 = vmatmul.mubr.bf16.vlgmr.msra.gmra.mrb[16].mxu0 %v3254_v36  ;;  %v2437_v36 = vrot.slane %v12035_v7, %v11983_v43  ;;  %v10471_v7 = vld [vmem:[#allocation16 + $0x4] ss:$16 sps:$4 sm:$0xff]  }
 0x5c4   :  { %4090 = vmatpush1.bf16.msra.mxu1 %v10373_v34  ;;  %4172 = vmatpush1.bf16.msra.mxu0 %v10376_v35  ;;  %v10451_v34 = vld [vmem:[#allocation14 + $0x3a0] ss:$16 sps:$4 sm:$0xff]   ;;  %v10454_v35 = vld [vmem:[#allocation14 + $0x3a8] ss:$16 sps:$4 sm:$0xff]  }
 0x5c5   :  { %4121 = vmatprep.mubr.bf16.mxu1 %v3257_v39  ;;  %4203 = vmatprep.mubr.bf16.mxu0 %v3257_v39  ;;  %v10457_v39 = vld [vmem:[#allocation14 + $0x3c0] ss:$16 sps:$4 sm:$0xff]  }
 0x5c6   :  { %4091 = vmatprep.subr.bf16.mxu1 %v10381_v37  ;;  %4173 = vmatprep.subr.bf16.mxu0 %v10384_v38  ;;  %v10459_v37 = vld [vmem:[#allocation14 + $0x3c4] ss:$16 sps:$4 sm:$0xff]   ;;  %v10462_v38 = vld [vmem:[#allocation14 + $0x3cc] ss:$16 sps:$4 sm:$0xff]  }
 0x5c8   :  { %4092 = vmatpush1.bf16.msra.mxu1 %v10379_v40  ;;  %4174 = vmatpush1.bf16.msra.mxu0 %v10382_v41  ;;  %v10460_v40 = vld [vmem:[#allocation14 + $0x3c8] ss:$16 sps:$4 sm:$0xff]   ;;  %v9564_v41 = vadd.f32 %v12043_v13, %v2437_v36  ;;  %v10477_v13 = vld [vmem:[#allocation16 + $0x24] ss:$16 sps:$4 sm:$0xff]   ;;  %v10540_v36 = vld [vmem:[#allocation16 + $0x16c] ss:$16 sps:$4 sm:$0xff]  }
 0x5c9   :  { %4093 = vmatprep.subr.bf16.mxu1 %v10387_v42  ;;  %4175 = vmatprep.subr.bf16.mxu0 %v10390_v44  ;;  %v10465_v42 = vld [vmem:[#allocation14 + $0x3e4] ss:$16 sps:$4 sm:$0xff]   ;;  %v10468_v44 = vld [vmem:[#allocation14 + $0x3ec] ss:$16 sps:$4 sm:$0xff]  }
 0x5cc   :  { %4094 = vmatpush1.bf16.msra.mxu1 %v10385_v45  ;;  %4176 = vmatpush1.bf16.msra.mxu0 %v10388_v46  ;;  %v10463_v45 = vld [vmem:[#allocation14 + $0x3e0] ss:$16 sps:$4 sm:$0xff]   ;;  %v10466_v46 = vld [vmem:[#allocation14 + $0x3e8] ss:$16 sps:$4 sm:$0xff]  }
 0x5cd   :  { %4095 = vmatprep.subr.bf16.mxu1 %v10393_v48  ;;  %4177 = vmatprep.subr.bf16.mxu0 %v10396_v49  ;;  %v3252_v48 = vmax.f32 %v9564_v41, 0.0  ;;  %v10474_v49 = vld [vmem:[#allocation16 + $0xc] ss:$16 sps:$4 sm:$0xff]   ;;  %v10541_v41 = vld [vmem:[#allocation16 + $0x180] ss:$16 sps:$4 sm:$0xff]  }
 0x5d0   :  { %4096 = vmatpush1.bf16.msra.mxu1 %v10391_v50  ;;  %4178 = vmatpush1.bf16.msra.mxu0 %v10394_v51  ;;  %v10469_v50 = vld [vmem:[#allocation16] ss:$16 sps:$4 sm:$0xff]   ;;  %v3256_v51 = vpack.c.bf16 %v3252_v48, %v3252_v48  ;;  %v10550_v48 = vld [vmem:[#allocation16 + $0x1a8] ss:$16 sps:$4 sm:$0xff]  }
 0x5d1   :  { %4097 = vmatprep.subr.bf16.mxu1 %v10399_v8  ;;  %4179 = vmatprep.subr.bf16.mxu0 %v10402_v52  ;;  %v10472_v8 = vld [vmem:[#allocation16 + $0x8] ss:$16 sps:$4 sm:$0xff]   ;;  %v10480_v52 = vld [vmem:[#allocation16 + $0x2c] ss:$16 sps:$4 sm:$0xff]  }
 0x5d4   :  { %4098 = vmatpush1.bf16.msra.mxu1 %v10397_v54  ;;  %4180 = vmatpush1.bf16.msra.mxu0 %v10400_v55  ;;  %v10475_v54 = vld [vmem:[#allocation16 + $0x20] ss:$16 sps:$4 sm:$0xff]   ;;  %v10478_v55 = vld [vmem:[#allocation16 + $0x28] ss:$16 sps:$4 sm:$0xff]  }
 0x5d5   :  { %4099 = vmatprep.subr.bf16.mxu1 %v10405_v57  ;;  %4181 = vmatprep.subr.bf16.mxu0 %v10408_v27  ;;  %v10483_v57 = vld [vmem:[#allocation16 + $0x44] ss:$16 sps:$4 sm:$0xff]   ;;  %v10486_v27 = vld [vmem:[#allocation16 + $0x4c] ss:$16 sps:$4 sm:$0xff]  }
 0x5d8   :  { %4100 = vmatpush1.bf16.msra.mxu1 %v10403_v59  ;;  %4182 = vmatpush1.bf16.msra.mxu0 %v10406_v60  ;;  %v10481_v59 = vld [vmem:[#allocation16 + $0x40] ss:$16 sps:$4 sm:$0xff]   ;;  %v10484_v60 = vld [vmem:[#allocation16 + $0x48] ss:$16 sps:$4 sm:$0xff]  }
 0x5d9   :  { %4101 = vmatprep.subr.bf16.mxu1 %v10411_v61  ;;  %4183 = vmatprep.subr.bf16.mxu0 %v10414_v33  ;;  %v10489_v61 = vld [vmem:[#allocation16 + $0x64] ss:$16 sps:$4 sm:$0xff]   ;;  %v10492_v33 = vld [vmem:[#allocation16 + $0x6c] ss:$16 sps:$4 sm:$0xff]  }
 0x5dc   :  { %4102 = vmatpush1.bf16.msra.mxu1 %v10409_v62  ;;  %4184 = vmatpush1.bf16.msra.mxu0 %v10412_v63  ;;  %v10487_v62 = vld [vmem:[#allocation16 + $0x60] ss:$16 sps:$4 sm:$0xff]   ;;  %v10490_v63 = vld [vmem:[#allocation16 + $0x68] ss:$16 sps:$4 sm:$0xff]  }
 0x5dd   :  { %4103 = vmatprep.subr.bf16.mxu1 %v10417_v0  ;;  %4185 = vmatprep.subr.bf16.mxu0 %v10420_v1  ;;  %v10495_v0 = vld [vmem:[#allocation16 + $0x84] ss:$16 sps:$4 sm:$0xff]   ;;  %v10493_v1 = vld [vmem:[#allocation16 + $0x80] ss:$16 sps:$4 sm:$0xff]  }
 0x5e0   :  { %4104 = vmatpush1.bf16.msra.mxu1 %v10415_v2  ;;  %4186 = vmatpush1.bf16.msra.mxu0 %v10418_v4  ;;  %v10496_v2 = vld [vmem:[#allocation16 + $0x88] ss:$16 sps:$4 sm:$0xff]   ;;  %v10501_v4 = vld [vmem:[#allocation16 + $0xa4] ss:$16 sps:$4 sm:$0xff]  }
 0x5e1   :  { %4105 = vmatprep.subr.bf16.mxu1 %v10423_v5  ;;  %4187 = vmatprep.subr.bf16.mxu0 %v10426_v20  ;;  %v10504_v5 = vld [vmem:[#allocation16 + $0xac] ss:$16 sps:$4 sm:$0xff]   ;;  %v10499_v20 = vld [vmem:[#allocation16 + $0xa0] ss:$16 sps:$4 sm:$0xff]  }
 0x5e4   :  { %4106 = vmatpush1.bf16.msra.mxu1 %v10421_v32  ;;  %4188 = vmatpush1.bf16.msra.mxu0 %v10424_v47  ;;  %v10502_v32 = vld [vmem:[#allocation16 + $0xa8] ss:$16 sps:$4 sm:$0xff]   ;;  %v10507_v47 = vld [vmem:[#allocation16 + $0xc4] ss:$16 sps:$4 sm:$0xff]  }
 0x5e5   :  { %4107 = vmatprep.subr.bf16.mxu1 %v10429_v6  ;;  %4189 = vmatprep.subr.bf16.mxu0 %v10432_v9  ;;  %v10510_v6 = vld [vmem:[#allocation16 + $0xcc] ss:$16 sps:$4 sm:$0xff]   ;;  %v10505_v9 = vld [vmem:[#allocation16 + $0xc0] ss:$16 sps:$4 sm:$0xff]  }
 0x5e8   :  { %4108 = vmatpush1.bf16.msra.mxu1 %v10427_v25  ;;  %4190 = vmatpush1.bf16.msra.mxu0 %v10430_v12  ;;  %v10508_v25 = vld [vmem:[#allocation16 + $0xc8] ss:$16 sps:$4 sm:$0xff]   ;;  %v10513_v12 = vld [vmem:[#allocation16 + $0xe4] ss:$16 sps:$4 sm:$0xff]  }
 0x5e9   :  { %4109 = vmatprep.subr.bf16.mxu1 %v10435_v24  ;;  %4191 = vmatprep.subr.bf16.mxu0 %v10438_v14  ;;  %v10516_v24 = vld [vmem:[#allocation16 + $0xec] ss:$16 sps:$4 sm:$0xff]   ;;  %v10511_v14 = vld [vmem:[#allocation16 + $0xe0] ss:$16 sps:$4 sm:$0xff]  }
 0x5ec   :  { %4110 = vmatpush1.bf16.msra.mxu1 %v10433_v15  ;;  %4192 = vmatpush1.bf16.msra.mxu0 %v10436_v16  ;;  %v10514_v15 = vld [vmem:[#allocation16 + $0xe8] ss:$16 sps:$4 sm:$0xff]   ;;  %v10519_v16 = vld [vmem:[#allocation16 + $0x104] ss:$16 sps:$4 sm:$0xff]  }
 0x5ed   :  { %4111 = vmatprep.subr.bf16.mxu1 %v10441_v17  ;;  %4193 = vmatprep.subr.bf16.mxu0 %v10444_v18  ;;  %v10522_v17 = vld [vmem:[#allocation16 + $0x10c] ss:$16 sps:$4 sm:$0xff]   ;;  %v10517_v18 = vld [vmem:[#allocation16 + $0x100] ss:$16 sps:$4 sm:$0xff]  }
 0x5f0   :  { %4112 = vmatpush1.bf16.msra.mxu1 %v10439_v19  ;;  %4194 = vmatpush1.bf16.msra.mxu0 %v10442_v21  ;;  %v10520_v19 = vld [vmem:[#allocation16 + $0x108] ss:$16 sps:$4 sm:$0xff]   ;;  %v10525_v21 = vld [vmem:[#allocation16 + $0x124] ss:$16 sps:$4 sm:$0xff]  }
 0x5f1   :  { %4113 = vmatprep.subr.bf16.mxu1 %v10447_v22  ;;  %4195 = vmatprep.subr.bf16.mxu0 %v10450_v23  ;;  %v10528_v22 = vld [vmem:[#allocation16 + $0x12c] ss:$16 sps:$4 sm:$0xff]   ;;  %v10523_v23 = vld [vmem:[#allocation16 + $0x120] ss:$16 sps:$4 sm:$0xff]  }
 0x5f4   :  { %4114 = vmatpush1.bf16.msra.mxu1 %v10445_v26  ;;  %4196 = vmatpush1.bf16.msra.mxu0 %v10448_v29  ;;  %v10526_v26 = vld [vmem:[#allocation16 + $0x128] ss:$16 sps:$4 sm:$0xff]   ;;  %v10531_v29 = vld [vmem:[#allocation16 + $0x144] ss:$16 sps:$4 sm:$0xff]  }
 0x5f5   :  { %4115 = vmatprep.subr.bf16.mxu1 %v10453_v30  ;;  %4197 = vmatprep.subr.bf16.mxu0 %v10456_v31  ;;  %v10534_v30 = vld [vmem:[#allocation16 + $0x14c] ss:$16 sps:$4 sm:$0xff]   ;;  %v10529_v31 = vld [vmem:[#allocation16 + $0x140] ss:$16 sps:$4 sm:$0xff]  }
 0x5f8   :  { %4116 = vmatpush1.bf16.msra.mxu1 %v10451_v34  ;;  %4198 = vmatpush1.bf16.msra.mxu0 %v10454_v35  ;;  %v10532_v34 = vld [vmem:[#allocation16 + $0x148] ss:$16 sps:$4 sm:$0xff]   ;;  %v10537_v35 = vld [vmem:[#allocation16 + $0x164] ss:$16 sps:$4 sm:$0xff]  }
 0x5f9   :  { %4117 = vmatprep.subr.bf16.mxu1 %v10459_v37  ;;  %4199 = vmatprep.subr.bf16.mxu0 %v10462_v38  ;;  %v10535_v37 = vld [vmem:[#allocation16 + $0x160] ss:$16 sps:$4 sm:$0xff]   ;;  %v10538_v38 = vld [vmem:[#allocation16 + $0x168] ss:$16 sps:$4 sm:$0xff]  }
 0x5fc   :  { %4118 = vmatpush1.bf16.msra.mxu1 %v10457_v39  ;;  %4200 = vmatpush1.bf16.msra.mxu0 %v10460_v40  ;;  %v10543_v39 = vld [vmem:[#allocation16 + $0x184] ss:$16 sps:$4 sm:$0xff]   ;;  %v10546_v40 = vld [vmem:[#allocation16 + $0x18c] ss:$16 sps:$4 sm:$0xff]  }
 0x5fd   :  { %4119 = vmatprep.subr.bf16.mxu1 %v10465_v42  ;;  %4201 = vmatprep.subr.bf16.mxu0 %v10468_v44  ;;  %v10544_v42 = vld [vmem:[#allocation16 + $0x188] ss:$16 sps:$4 sm:$0xff]   ;;  %v10549_v44 = vld [vmem:[#allocation16 + $0x1a4] ss:$16 sps:$4 sm:$0xff]  }
 0x600   :  { %4120 = vmatpush1.bf16.msra.mxu1 %v10463_v45  ;;  %4202 = vmatpush1.bf16.msra.mxu0 %v10466_v46  ;;  %v10552_v45 = vld [vmem:[#allocation16 + $0x1ac] ss:$16 sps:$4 sm:$0xff]   ;;  %v10547_v46 = vld [vmem:[#allocation16 + $0x1a0] ss:$16 sps:$4 sm:$0xff]  }
 0x601   :  { %5002 = vmatprep.subr.bf16.mxu1 %v10471_v7  ;;  %5084 = vmatprep.subr.bf16.mxu0 %v10474_v49  ;;  %v10555_v7 = vld [vmem:[#allocation16 + $0x1c4] ss:$16 sps:$4 sm:$0xff]   ;;  %v10558_v49 = vld [vmem:[#allocation16 + $0x1cc] ss:$16 sps:$4 sm:$0xff]  }
 0x603   :  { %4122 = vmatmul.mubr.bf16.vlgmr.msra.gmra.mrb[12].mxu1 %v3256_v51  ;;  %4204 = vmatmul.mubr.bf16.vlgmr.msra.gmra.mrb[16].mxu0 %v3256_v51  ;;  %v10556_v51 = vld [vmem:[#allocation16 + $0x1c8] ss:$16 sps:$4 sm:$0xff]  }
 0x604   :  { %5003 = vmatpush1.bf16.msra.mxu1 %v10469_v50  ;;  %5034 = vmatprep.mubr.bf16.mxu1 %v12013_v53  ;;  %v10553_v50 = vld [vmem:[#allocation16 + $0x1c0] ss:$16 sps:$4 sm:$0xff]  }
 0x605   :  { %5085 = vmatpush1.bf16.msra.mxu0 %v10472_v8  ;;  %5116 = vmatprep.mubr.bf16.mxu0 %v12013_v53  ;;  %v10498_v53 = vld [vmem:[#allocation16 + $0x8c] ss:$16 sps:$4 sm:$0xff]   ;;  %v10561_v8 = vld [vmem:[#allocation16 + $0x1e4] ss:$16 sps:$4 sm:$0xff]  }
 0x606   :  { %5004 = vmatprep.subr.bf16.mxu1 %v10477_v13  ;;  %5086 = vmatprep.subr.bf16.mxu0 %v10480_v52  ;;  %v10564_v13 = vld [vmem:[#allocation16 + $0x1ec] ss:$16 sps:$4 sm:$0xff]   ;;  %v10559_v52 = vld [vmem:[#allocation16 + $0x1e0] ss:$16 sps:$4 sm:$0xff]  }
 0x608   :  { %5005 = vmatpush1.bf16.msra.mxu1 %v10475_v54  ;;  %v10562_v54 = vld [vmem:[#allocation16 + $0x1e8] ss:$16 sps:$4 sm:$0xff]  }
 0x609   :  { %5087 = vmatpush1.bf16.msra.mxu0 %v10478_v55  ;;  %5006 = vmatprep.subr.bf16.mxu1 %v10483_v57  ;;  %v10567_v55 = vld [vmem:[#allocation16 + $0x204] ss:$16 sps:$4 sm:$0xff]   ;;  %v10570_v57 = vld [vmem:[#allocation16 + $0x20c] ss:$16 sps:$4 sm:$0xff]  }
 0x60a   :  { %5088 = vmatprep.subr.bf16.mxu0 %v10486_v27  ;;  %v10565_v27 = vld [vmem:[#allocation16 + $0x200] ss:$16 sps:$4 sm:$0xff]  }
 0x60c   :  { %5007 = vmatpush1.bf16.msra.mxu1 %v10481_v59  ;;  %v10568_v59 = vld [vmem:[#allocation16 + $0x208] ss:$16 sps:$4 sm:$0xff]  }
 0x60d   :  { %5089 = vmatpush1.bf16.msra.mxu0 %v10484_v60  ;;  %5008 = vmatprep.subr.bf16.mxu1 %v10489_v61  ;;  %v10573_v60 = vld [vmem:[#allocation16 + $0x224] ss:$16 sps:$4 sm:$0xff]   ;;  %v10576_v61 = vld [vmem:[#allocation16 + $0x22c] ss:$16 sps:$4 sm:$0xff]  }
 0x60e   :  { %5090 = vmatprep.subr.bf16.mxu0 %v10492_v33  ;;  %v10571_v33 = vld [vmem:[#allocation16 + $0x220] ss:$16 sps:$4 sm:$0xff]  }
 0x610   :  { %5009 = vmatpush1.bf16.msra.mxu1 %v10487_v62  ;;  %v10574_v62 = vld [vmem:[#allocation16 + $0x228] ss:$16 sps:$4 sm:$0xff]  }
 0x611   :  { %5091 = vmatpush1.bf16.msra.mxu0 %v10490_v63  ;;  %5010 = vmatprep.subr.bf16.mxu1 %v10495_v0  ;;  %v10579_v63 = vld [vmem:[#allocation16 + $0x244] ss:$16 sps:$4 sm:$0xff]   ;;  %v10582_v0 = vld [vmem:[#allocation16 + $0x24c] ss:$16 sps:$4 sm:$0xff]  }
 0x612   :  { %5092 = vmatprep.subr.bf16.mxu0 %v10498_v53  ;;  %v10577_v53 = vld [vmem:[#allocation16 + $0x240] ss:$16 sps:$4 sm:$0xff]  }
 0x614   :  { %5011 = vmatpush1.bf16.msra.mxu1 %v10493_v1  ;;  %v10580_v1 = vld [vmem:[#allocation16 + $0x248] ss:$16 sps:$4 sm:$0xff]  }
 0x615   :  { %5093 = vmatpush1.bf16.msra.mxu0 %v10496_v2  ;;  %5012 = vmatprep.subr.bf16.mxu1 %v10501_v4  ;;  %v10585_v2 = vld [vmem:[#allocation16 + $0x264] ss:$16 sps:$4 sm:$0xff]   ;;  %v10583_v4 = vld [vmem:[#allocation16 + $0x260] ss:$16 sps:$4 sm:$0xff]  }
 0x616   :  { %5094 = vmatprep.subr.bf16.mxu0 %v10504_v5  ;;  %v10586_v5 = vld [vmem:[#allocation16 + $0x268] ss:$16 sps:$4 sm:$0xff]  }
 0x618   :  { %5013 = vmatpush1.bf16.msra.mxu1 %v10499_v20  ;;  %v10591_v20 = vld [vmem:[#allocation16 + $0x284] ss:$16 sps:$4 sm:$0xff]  }
 0x619   :  { %5095 = vmatpush1.bf16.msra.mxu0 %v10502_v32  ;;  %5014 = vmatprep.subr.bf16.mxu1 %v10507_v47  ;;  %v10594_v32 = vld [vmem:[#allocation16 + $0x28c] ss:$16 sps:$4 sm:$0xff]   ;;  %v10592_v47 = vld [vmem:[#allocation16 + $0x288] ss:$16 sps:$4 sm:$0xff]  }
 0x61a   :  { %5096 = vmatprep.subr.bf16.mxu0 %v10510_v6  ;;  %v10597_v6 = vld [vmem:[#allocation16 + $0x2a4] ss:$16 sps:$4 sm:$0xff]  }
 0x61c   :  { %5015 = vmatpush1.bf16.msra.mxu1 %v10505_v9  ;;  %v10600_v9 = vld [vmem:[#allocation16 + $0x2ac] ss:$16 sps:$4 sm:$0xff]  }
 0x61d   :  { %5097 = vmatpush1.bf16.msra.mxu0 %v10508_v25  ;;  %5016 = vmatprep.subr.bf16.mxu1 %v10513_v12  ;;  %v10595_v25 = vld [vmem:[#allocation16 + $0x2a0] ss:$16 sps:$4 sm:$0xff]   ;;  %v10598_v12 = vld [vmem:[#allocation16 + $0x2a8] ss:$16 sps:$4 sm:$0xff]  }
 0x61e   :  { %5098 = vmatprep.subr.bf16.mxu0 %v10516_v24  ;;  %v10603_v24 = vld [vmem:[#allocation16 + $0x2c4] ss:$16 sps:$4 sm:$0xff]  }
 0x620   :  { %5017 = vmatpush1.bf16.msra.mxu1 %v10511_v14  ;;  %v10606_v14 = vld [vmem:[#allocation16 + $0x2cc] ss:$16 sps:$4 sm:$0xff]  }
 0x621   :  { %5099 = vmatpush1.bf16.msra.mxu0 %v10514_v15  ;;  %5018 = vmatprep.subr.bf16.mxu1 %v10519_v16  ;;  %v10601_v15 = vld [vmem:[#allocation16 + $0x2c0] ss:$16 sps:$4 sm:$0xff]   ;;  %v10604_v16 = vld [vmem:[#allocation16 + $0x2c8] ss:$16 sps:$4 sm:$0xff]  }
 0x622   :  { %5100 = vmatprep.subr.bf16.mxu0 %v10522_v17  ;;  %v10609_v17 = vld [vmem:[#allocation16 + $0x2e4] ss:$16 sps:$4 sm:$0xff]  }
 0x624   :  { %5019 = vmatpush1.bf16.msra.mxu1 %v10517_v18  ;;  %v10612_v18 = vld [vmem:[#allocation16 + $0x2ec] ss:$16 sps:$4 sm:$0xff]  }
 0x625   :  { %5101 = vmatpush1.bf16.msra.mxu0 %v10520_v19  ;;  %5020 = vmatprep.subr.bf16.mxu1 %v10525_v21  ;;  %v10607_v19 = vld [vmem:[#allocation16 + $0x2e0] ss:$16 sps:$4 sm:$0xff]   ;;  %v10610_v21 = vld [vmem:[#allocation16 + $0x2e8] ss:$16 sps:$4 sm:$0xff]  }
 0x626   :  { %5102 = vmatprep.subr.bf16.mxu0 %v10528_v22  ;;  %v10615_v22 = vld [vmem:[#allocation16 + $0x304] ss:$16 sps:$4 sm:$0xff]  }
 0x628   :  { %5021 = vmatpush1.bf16.msra.mxu1 %v10523_v23  ;;  %v10618_v23 = vld [vmem:[#allocation16 + $0x30c] ss:$16 sps:$4 sm:$0xff]  }
 0x629   :  { %5103 = vmatpush1.bf16.msra.mxu0 %v10526_v26  ;;  %5022 = vmatprep.subr.bf16.mxu1 %v10531_v29  ;;  %v10613_v26 = vld [vmem:[#allocation16 + $0x300] ss:$16 sps:$4 sm:$0xff]   ;;  %v10616_v29 = vld [vmem:[#allocation16 + $0x308] ss:$16 sps:$4 sm:$0xff]  }
 0x62a   :  { %5104 = vmatprep.subr.bf16.mxu0 %v10534_v30  ;;  %v10621_v30 = vld [vmem:[#allocation16 + $0x324] ss:$16 sps:$4 sm:$0xff]  }
 0x62c   :  { %5023 = vmatpush1.bf16.msra.mxu1 %v10529_v31  ;;  %v10624_v31 = vld [vmem:[#allocation16 + $0x32c] ss:$16 sps:$4 sm:$0xff]  }
 0x62d   :  { %5105 = vmatpush1.bf16.msra.mxu0 %v10532_v34  ;;  %5024 = vmatprep.subr.bf16.mxu1 %v10537_v35  ;;  %v10619_v34 = vld [vmem:[#allocation16 + $0x320] ss:$16 sps:$4 sm:$0xff]   ;;  %v10622_v35 = vld [vmem:[#allocation16 + $0x328] ss:$16 sps:$4 sm:$0xff]  }
 0x62e   :  { %5106 = vmatprep.subr.bf16.mxu0 %v10540_v36  ;;  %v10627_v36 = vld [vmem:[#allocation16 + $0x344] ss:$16 sps:$4 sm:$0xff]  }
 0x630   :  { %5025 = vmatpush1.bf16.msra.mxu1 %v10535_v37  ;;  %v10630_v37 = vld [vmem:[#allocation16 + $0x34c] ss:$16 sps:$4 sm:$0xff]  }
 0x631   :  { %5107 = vmatpush1.bf16.msra.mxu0 %v10538_v38  ;;  %5026 = vmatprep.subr.bf16.mxu1 %v10543_v39  ;;  %v10625_v38 = vld [vmem:[#allocation16 + $0x340] ss:$16 sps:$4 sm:$0xff]   ;;  %v10628_v39 = vld [vmem:[#allocation16 + $0x348] ss:$16 sps:$4 sm:$0xff]  }
 0x632   :  { %5108 = vmatprep.subr.bf16.mxu0 %v10546_v40  ;;  %v10633_v40 = vld [vmem:[#allocation16 + $0x364] ss:$16 sps:$4 sm:$0xff]  }
 0x634   :  { %5027 = vmatpush1.bf16.msra.mxu1 %v10541_v41  ;;  %v10636_v41 = vld [vmem:[#allocation16 + $0x36c] ss:$16 sps:$4 sm:$0xff]  }
 0x635   :  { %5109 = vmatpush1.bf16.msra.mxu0 %v10544_v42  ;;  %5028 = vmatprep.subr.bf16.mxu1 %v10549_v44  ;;  %v10631_v42 = vld [vmem:[#allocation16 + $0x360] ss:$16 sps:$4 sm:$0xff]   ;;  %v10634_v44 = vld [vmem:[#allocation16 + $0x368] ss:$16 sps:$4 sm:$0xff]  }
 0x636   :  { %5110 = vmatprep.subr.bf16.mxu0 %v10552_v45  ;;  %v10639_v45 = vld [vmem:[#allocation16 + $0x384] ss:$16 sps:$4 sm:$0xff]  }
 0x638   :  { %5029 = vmatpush1.bf16.msra.mxu1 %v10547_v46  ;;  %v10642_v46 = vld [vmem:[#allocation16 + $0x38c] ss:$16 sps:$4 sm:$0xff]  }
 0x639   :  { %5111 = vmatpush1.bf16.msra.mxu0 %v10550_v48  ;;  %5030 = vmatprep.subr.bf16.mxu1 %v10555_v7  ;;  %v10637_v48 = vld [vmem:[#allocation16 + $0x380] ss:$16 sps:$4 sm:$0xff]   ;;  %v10640_v7 = vld [vmem:[#allocation16 + $0x388] ss:$16 sps:$4 sm:$0xff]  }
 0x63a   :  { %5112 = vmatprep.subr.bf16.mxu0 %v10558_v49  ;;  %v10645_v49 = vld [vmem:[#allocation16 + $0x3a4] ss:$16 sps:$4 sm:$0xff]  }
 0x63c   :  { %5031 = vmatpush1.bf16.msra.mxu1 %v10553_v50  ;;  %v10648_v50 = vld [vmem:[#allocation16 + $0x3ac] ss:$16 sps:$4 sm:$0xff]  }
 0x63d   :  { %5113 = vmatpush1.bf16.msra.mxu0 %v10556_v51  ;;  %5032 = vmatprep.subr.bf16.mxu1 %v10561_v8  ;;  %v10643_v51 = vld [vmem:[#allocation16 + $0x3a0] ss:$16 sps:$4 sm:$0xff]   ;;  %v10646_v8 = vld [vmem:[#allocation16 + $0x3a8] ss:$16 sps:$4 sm:$0xff]  }
 0x63e   :  { %5114 = vmatprep.subr.bf16.mxu0 %v10564_v13  ;;  %v10651_v13 = vld [vmem:[#allocation16 + $0x3c4] ss:$16 sps:$4 sm:$0xff]  }
 0x640   :  { %5033 = vmatpush1.bf16.msra.mxu1 %v10559_v52  ;;  %v10654_v52 = vld [vmem:[#allocation16 + $0x3cc] ss:$16 sps:$4 sm:$0xff]  }
 0x641   :  { %5115 = vmatpush1.bf16.msra.mxu0 %v10562_v54  ;;  %5043 = vmatprep.subr.bf16.mxu1 %v10567_v55  ;;  %v10649_v54 = vld [vmem:[#allocation16 + $0x3c0] ss:$16 sps:$4 sm:$0xff]   ;;  %v10652_v55 = vld [vmem:[#allocation16 + $0x3c8] ss:$16 sps:$4 sm:$0xff]  }
 0x642   :  { %5125 = vmatprep.subr.bf16.mxu0 %v10570_v57  ;;  %v10657_v57 = vld [vmem:[#allocation16 + $0x3e4] ss:$16 sps:$4 sm:$0xff]  }
 0x643   :  { %5035 = vmatmul.mubr.bf16.vlgmr.msra.gmra.mrb[12].mxu1 %v12015_v56 }
 0x644   :  { %5117 = vmatmul.mubr.bf16.vlgmr.msra.gmra.mrb[16].mxu0 %v12015_v56  ;;  %5044 = vmatpush1.bf16.msra.mxu1 %v10565_v27  ;;  %v10588_v56 = vld [vmem:[#allocation16 + $0x26c] ss:$16 sps:$4 sm:$0xff]  }
 0x645   :  { %5075 = vmatprep.mubr.bf16.mxu1 %v12019_v58  ;;  %5126 = vmatpush1.bf16.msra.mxu0 %v10568_v59  ;;  %v10660_v27 = vld [vmem:[#allocation16 + $0x3ec] ss:$16 sps:$4 sm:$0xff]   ;;  %v10655_v59 = vld [vmem:[#allocation16 + $0x3e0] ss:$16 sps:$4 sm:$0xff]  }
 0x646   :  { %5157 = vmatprep.mubr.bf16.mxu0 %v12019_v58  ;;  %5045 = vmatprep.subr.bf16.mxu1 %v10573_v60  ;;  %v10589_v58 = vld [vmem:[#allocation16 + $0x280] ss:$16 sps:$4 sm:$0xff]   ;;  %v10658_v60 = vld [vmem:[#allocation16 + $0x3e8] ss:$16 sps:$4 sm:$0xff]  }
 0x647   :  { %5127 = vmatprep.subr.bf16.mxu0 %v10576_v61  ;;  %v10661_v61 = vld [vmem:[#allocation17] ss:$16 sps:$4 sm:$0xff]  }
 0x648   :  { %5046 = vmatpush1.bf16.msra.mxu1 %v10571_v33  ;;  %v10663_v33 = vld [vmem:[#allocation17 + $0x4] ss:$16 sps:$4 sm:$0xff]  }
 0x649   :  { %5128 = vmatpush1.bf16.msra.mxu0 %v10574_v62  ;;  %5047 = vmatprep.subr.bf16.mxu1 %v10579_v63  ;;  %v10664_v62 = vld [vmem:[#allocation17 + $0x8] ss:$16 sps:$4 sm:$0xff]   ;;  %v10666_v63 = vld [vmem:[#allocation17 + $0xc] ss:$16 sps:$4 sm:$0xff]  }
 0x64a   :  { %5129 = vmatprep.subr.bf16.mxu0 %v10582_v0  ;;  %v10669_v0 = vld [vmem:[#allocation17 + $0x24] ss:$16 sps:$4 sm:$0xff]  }
 0x64c   :  { %5048 = vmatpush1.bf16.msra.mxu1 %v10577_v53  ;;  %v10672_v53 = vld [vmem:[#allocation17 + $0x2c] ss:$16 sps:$4 sm:$0xff]  }
 0x64d   :  { %5130 = vmatpush1.bf16.msra.mxu0 %v10580_v1  ;;  %5049 = vmatprep.subr.bf16.mxu1 %v10585_v2  ;;  %v10667_v1 = vld [vmem:[#allocation17 + $0x20] ss:$16 sps:$4 sm:$0xff]   ;;  %v10670_v2 = vld [vmem:[#allocation17 + $0x28] ss:$16 sps:$4 sm:$0xff]  }
 0x64e   :  { %5131 = vmatprep.subr.bf16.mxu0 %v10588_v56  ;;  %v10675_v56 = vld [vmem:[#allocation17 + $0x44] ss:$16 sps:$4 sm:$0xff]  }
 0x650   :  { %5050 = vmatpush1.bf16.msra.mxu1 %v10583_v4  ;;  %v10678_v4 = vld [vmem:[#allocation17 + $0x4c] ss:$16 sps:$4 sm:$0xff]  }
 0x651   :  { %5132 = vmatpush1.bf16.msra.mxu0 %v10586_v5  ;;  %5051 = vmatprep.subr.bf16.mxu1 %v10591_v20  ;;  %v10673_v5 = vld [vmem:[#allocation17 + $0x40] ss:$16 sps:$4 sm:$0xff]   ;;  %v10681_v20 = vld [vmem:[#allocation17 + $0x64] ss:$16 sps:$4 sm:$0xff]  }
 0x652   :  { %5133 = vmatprep.subr.bf16.mxu0 %v10594_v32  ;;  %v10684_v32 = vld [vmem:[#allocation17 + $0x6c] ss:$16 sps:$4 sm:$0xff]  }
 0x654   :  { %5052 = vmatpush1.bf16.msra.mxu1 %v10589_v58  ;;  %v10679_v58 = vld [vmem:[#allocation17 + $0x60] ss:$16 sps:$4 sm:$0xff]  }
 0x655   :  { %5134 = vmatpush1.bf16.msra.mxu0 %v10592_v47  ;;  %5053 = vmatprep.subr.bf16.mxu1 %v10597_v6  ;;  %v10682_v47 = vld [vmem:[#allocation17 + $0x68] ss:$16 sps:$4 sm:$0xff]   ;;  %v10687_v6 = vld [vmem:[#allocation17 + $0x84] ss:$16 sps:$4 sm:$0xff]  }
 0x656   :  { %5135 = vmatprep.subr.bf16.mxu0 %v10600_v9  ;;  %v10690_v9 = vld [vmem:[#allocation17 + $0x8c] ss:$16 sps:$4 sm:$0xff]  }
 0x658   :  { %5054 = vmatpush1.bf16.msra.mxu1 %v10595_v25  ;;  %v10685_v25 = vld [vmem:[#allocation17 + $0x80] ss:$16 sps:$4 sm:$0xff]  }
 0x659   :  { %5136 = vmatpush1.bf16.msra.mxu0 %v10598_v12  ;;  %5055 = vmatprep.subr.bf16.mxu1 %v10603_v24  ;;  %v10688_v12 = vld [vmem:[#allocation17 + $0x88] ss:$16 sps:$4 sm:$0xff]   ;;  %v10693_v24 = vld [vmem:[#allocation17 + $0xa4] ss:$16 sps:$4 sm:$0xff]  }
 0x65a   :  { %5137 = vmatprep.subr.bf16.mxu0 %v10606_v14  ;;  %v10696_v14 = vld [vmem:[#allocation17 + $0xac] ss:$16 sps:$4 sm:$0xff]  }
 0x65c   :  { %5056 = vmatpush1.bf16.msra.mxu1 %v10601_v15  ;;  %v10691_v15 = vld [vmem:[#allocation17 + $0xa0] ss:$16 sps:$4 sm:$0xff]  }
 0x65d   :  { %5138 = vmatpush1.bf16.msra.mxu0 %v10604_v16  ;;  %5057 = vmatprep.subr.bf16.mxu1 %v10609_v17  ;;  %v10694_v16 = vld [vmem:[#allocation17 + $0xa8] ss:$16 sps:$4 sm:$0xff]   ;;  %v10699_v17 = vld [vmem:[#allocation17 + $0xc4] ss:$16 sps:$4 sm:$0xff]  }
 0x65e   :  { %5139 = vmatprep.subr.bf16.mxu0 %v10612_v18  ;;  %v10702_v18 = vld [vmem:[#allocation17 + $0xcc] ss:$16 sps:$4 sm:$0xff]  }
 0x660   :  { %5058 = vmatpush1.bf16.msra.mxu1 %v10607_v19  ;;  %v10697_v19 = vld [vmem:[#allocation17 + $0xc0] ss:$16 sps:$4 sm:$0xff]  }
 0x661   :  { %5140 = vmatpush1.bf16.msra.mxu0 %v10610_v21  ;;  %5059 = vmatprep.subr.bf16.mxu1 %v10615_v22  ;;  %v10700_v21 = vld [vmem:[#allocation17 + $0xc8] ss:$16 sps:$4 sm:$0xff]   ;;  %v10705_v22 = vld [vmem:[#allocation17 + $0xe4] ss:$16 sps:$4 sm:$0xff]  }
 0x662   :  { %5141 = vmatprep.subr.bf16.mxu0 %v10618_v23  ;;  %v10708_v23 = vld [vmem:[#allocation17 + $0xec] ss:$16 sps:$4 sm:$0xff]  }
 0x664   :  { %5060 = vmatpush1.bf16.msra.mxu1 %v10613_v26  ;;  %v10703_v26 = vld [vmem:[#allocation17 + $0xe0] ss:$16 sps:$4 sm:$0xff]  }
 0x665   :  { %5142 = vmatpush1.bf16.msra.mxu0 %v10616_v29  ;;  %5061 = vmatprep.subr.bf16.mxu1 %v10621_v30  ;;  %v10706_v29 = vld [vmem:[#allocation17 + $0xe8] ss:$16 sps:$4 sm:$0xff]   ;;  %v10711_v30 = vld [vmem:[#allocation17 + $0x104] ss:$16 sps:$4 sm:$0xff]  }
 0x666   :  { %5143 = vmatprep.subr.bf16.mxu0 %v10624_v31  ;;  %v10714_v31 = vld [vmem:[#allocation17 + $0x10c] ss:$16 sps:$4 sm:$0xff]  }
 0x668   :  { %5062 = vmatpush1.bf16.msra.mxu1 %v10619_v34  ;;  %v10709_v34 = vld [vmem:[#allocation17 + $0x100] ss:$16 sps:$4 sm:$0xff]  }
 0x669   :  { %5144 = vmatpush1.bf16.msra.mxu0 %v10622_v35  ;;  %5063 = vmatprep.subr.bf16.mxu1 %v10627_v36  ;;  %v10712_v35 = vld [vmem:[#allocation17 + $0x108] ss:$16 sps:$4 sm:$0xff]   ;;  %v10717_v36 = vld [vmem:[#allocation17 + $0x124] ss:$16 sps:$4 sm:$0xff]  }
 0x66a   :  { %5145 = vmatprep.subr.bf16.mxu0 %v10630_v37  ;;  %v10720_v37 = vld [vmem:[#allocation17 + $0x12c] ss:$16 sps:$4 sm:$0xff]  }
 0x66c   :  { %5064 = vmatpush1.bf16.msra.mxu1 %v10625_v38  ;;  %v10715_v38 = vld [vmem:[#allocation17 + $0x120] ss:$16 sps:$4 sm:$0xff]  }
 0x66d   :  { %5146 = vmatpush1.bf16.msra.mxu0 %v10628_v39  ;;  %5065 = vmatprep.subr.bf16.mxu1 %v10633_v40  ;;  %v10718_v39 = vld [vmem:[#allocation17 + $0x128] ss:$16 sps:$4 sm:$0xff]   ;;  %v10723_v40 = vld [vmem:[#allocation17 + $0x144] ss:$16 sps:$4 sm:$0xff]  }
 0x66e   :  { %5147 = vmatprep.subr.bf16.mxu0 %v10636_v41  ;;  %v10726_v41 = vld [vmem:[#allocation17 + $0x14c] ss:$16 sps:$4 sm:$0xff]  }
 0x670   :  { %5066 = vmatpush1.bf16.msra.mxu1 %v10631_v42  ;;  %v10721_v42 = vld [vmem:[#allocation17 + $0x140] ss:$16 sps:$4 sm:$0xff]  }
 0x671   :  { %5148 = vmatpush1.bf16.msra.mxu0 %v10634_v44  ;;  %5067 = vmatprep.subr.bf16.mxu1 %v10639_v45  ;;  %v10724_v44 = vld [vmem:[#allocation17 + $0x148] ss:$16 sps:$4 sm:$0xff]   ;;  %v10729_v45 = vld [vmem:[#allocation17 + $0x164] ss:$16 sps:$4 sm:$0xff]  }
 0x672   :  { %5149 = vmatprep.subr.bf16.mxu0 %v10642_v46  ;;  %v10732_v46 = vld [vmem:[#allocation17 + $0x16c] ss:$16 sps:$4 sm:$0xff]  }
 0x674   :  { %5068 = vmatpush1.bf16.msra.mxu1 %v10637_v48  ;;  %v10727_v48 = vld [vmem:[#allocation17 + $0x160] ss:$16 sps:$4 sm:$0xff]  }
 0x675   :  { %5150 = vmatpush1.bf16.msra.mxu0 %v10640_v7  ;;  %5069 = vmatprep.subr.bf16.mxu1 %v10645_v49  ;;  %v10730_v7 = vld [vmem:[#allocation17 + $0x168] ss:$16 sps:$4 sm:$0xff]   ;;  %v10735_v49 = vld [vmem:[#allocation17 + $0x184] ss:$16 sps:$4 sm:$0xff]  }
 0x676   :  { %5151 = vmatprep.subr.bf16.mxu0 %v10648_v50  ;;  %v10738_v50 = vld [vmem:[#allocation17 + $0x18c] ss:$16 sps:$4 sm:$0xff]  }
 0x678   :  { %5070 = vmatpush1.bf16.msra.mxu1 %v10643_v51  ;;  %v10733_v51 = vld [vmem:[#allocation17 + $0x180] ss:$16 sps:$4 sm:$0xff]  }
 0x679   :  { %5152 = vmatpush1.bf16.msra.mxu0 %v10646_v8  ;;  %5071 = vmatprep.subr.bf16.mxu1 %v10651_v13  ;;  %v10736_v8 = vld [vmem:[#allocation17 + $0x188] ss:$16 sps:$4 sm:$0xff]   ;;  %v10741_v13 = vld [vmem:[#allocation17 + $0x1a4] ss:$16 sps:$4 sm:$0xff]  }
 0x67a   :  { %5153 = vmatprep.subr.bf16.mxu0 %v10654_v52  ;;  %v10744_v52 = vld [vmem:[#allocation17 + $0x1ac] ss:$16 sps:$4 sm:$0xff]  }
 0x67c   :  { %5072 = vmatpush1.bf16.msra.mxu1 %v10649_v54  ;;  %v10739_v54 = vld [vmem:[#allocation17 + $0x1a0] ss:$16 sps:$4 sm:$0xff]  }
 0x67d   :  { %5154 = vmatpush1.bf16.msra.mxu0 %v10652_v55  ;;  %5073 = vmatprep.subr.bf16.mxu1 %v10657_v57  ;;  %v10742_v55 = vld [vmem:[#allocation17 + $0x1a8] ss:$16 sps:$4 sm:$0xff]  }
 0x67e   :  { %5155 = vmatprep.subr.bf16.mxu0 %v10660_v27  ;;  %v3386_v57 = vld [vmem:[%s12164_s12] sm:$0xf] }
 0x67f   :  { %v4340_v27 = vld [vmem:[%s12166_s14] sm:$0xf] }
 0x680   :  { %5074 = vmatpush1.bf16.msra.mxu1 %v10655_v59  ;;  %v10745_v59 = vld [vmem:[#allocation17 + $0x1c0] ss:$16 sps:$4 sm:$0xff]  }
 0x681   :  { %5156 = vmatpush1.bf16.msra.mxu0 %v10658_v60  ;;  %5993 = vmatprep.subr.bf16.mxu1 %v10663_v33  ;;  %v10747_v60 = vld [vmem:[#allocation17 + $0x1c4] ss:$16 sps:$4 sm:$0xff]   ;;  %v10750_v33 = vld [vmem:[#allocation17 + $0x1cc] ss:$16 sps:$4 sm:$0xff]  }
 0x682   :  { %6075 = vmatprep.subr.bf16.mxu0 %v10666_v63  ;;  %v4345_v63 = vrot.slane %v4340_v27, %v11951_v10 }
 0x683   :  { %5076 = vmatmul.mubr.bf16.vlgmr.msra.gmra.mrb[12].mxu1 %v12028_v3 }
 0x684   :  { %5158 = vmatmul.mubr.bf16.vlgmr.msra.gmra.mrb[16].mxu0 %v12028_v3  ;;  %5994 = vmatpush1.bf16.msra.mxu1 %v10661_v61  ;;  %v10676_v3 = vld [vmem:[#allocation17 + $0x48] ss:$16 sps:$4 sm:$0xff]  }
 0x685   :  { %6076 = vmatpush1.bf16.msra.mxu0 %v10664_v62  ;;  %5995 = vmatprep.subr.bf16.mxu1 %v10669_v0  ;;  %v10748_v61 = vld [vmem:[#allocation17 + $0x1c8] ss:$16 sps:$4 sm:$0xff]   ;;  %v3391_v62 = vrot.slane %v3386_v57, %v11951_v10  ;;  %v3399_v0 = vrot.slane %v3386_v57, %v11983_v43 }
 0x686   :  { %6077 = vmatprep.subr.bf16.mxu0 %v10672_v53  ;;  %v4353_v53 = vrot.slane %v4340_v27, %v11983_v43 }
 0x688   :  { %5996 = vmatpush1.bf16.msra.mxu1 %v10667_v1  ;;  %v3395_v1 = vrot.slane %v3386_v57, %v11954_v11 }
 0x689   :  { %6078 = vmatpush1.bf16.msra.mxu0 %v10670_v2  ;;  %5997 = vmatprep.subr.bf16.mxu1 %v10675_v56  ;;  %v4349_v2 = vrot.slane %v4340_v27, %v11954_v11  ;;  %v10751_v56 = vld [vmem:[#allocation17 + $0x1e0] ss:$16 sps:$4 sm:$0xff]  }
 0x68a   :  { %6079 = vmatprep.subr.bf16.mxu0 %v10678_v4  ;;  %v10753_v4 = vld [vmem:[#allocation17 + $0x1e4] ss:$16 sps:$4 sm:$0xff]  }
 0x68c   :  { %5998 = vmatpush1.bf16.msra.mxu1 %v10673_v5  ;;  %v10754_v5 = vld [vmem:[#allocation17 + $0x1e8] ss:$16 sps:$4 sm:$0xff]  }
 0x68d   :  { %6080 = vmatpush1.bf16.msra.mxu0 %v10676_v3  ;;  %5999 = vmatprep.subr.bf16.mxu1 %v10681_v20  ;;  %v10756_v3 = vld [vmem:[#allocation17 + $0x1ec] ss:$16 sps:$4 sm:$0xff]   ;;  %v9566_v20 = vadd.f32 %v4345_v63, %v3391_v62  ;;  %v10777_v62 = vld [vmem:[#allocation17 + $0x264] ss:$16 sps:$4 sm:$0xff]  }
 0x68e   :  { %6081 = vmatprep.subr.bf16.mxu0 %v10684_v32  ;;  %v3403_v32 = vrot.slane %v3386_v57, %v11972_v28  ;;  %v10763_v57 = vld [vmem:[#allocation17 + $0x220] ss:$16 sps:$4 sm:$0xff]   ;;  %v10780_v63 = vld [vmem:[#allocation17 + $0x26c] ss:$16 sps:$4 sm:$0xff]  }
 0x690   :  { %6000 = vmatpush1.bf16.msra.mxu1 %v10679_v58  ;;  %v9570_v58 = vadd.f32 %v4353_v53, %v3399_v0  ;;  %v10775_v0 = vld [vmem:[#allocation17 + $0x260] ss:$16 sps:$4 sm:$0xff]   ;;  %v10778_v53 = vld [vmem:[#allocation17 + $0x268] ss:$16 sps:$4 sm:$0xff]  }
 0x691   :  { %6082 = vmatpush1.bf16.msra.mxu0 %v10682_v47  ;;  %6001 = vmatprep.subr.bf16.mxu1 %v10687_v6  ;;  %v9568_v47 = vadd.f32 %v4349_v2, %v3395_v1  ;;  %v4357_v6 = vrot.slane %v4340_v27, %v11972_v28  ;;  %v10766_v27 = vld [vmem:[#allocation17 + $0x228] ss:$16 sps:$4 sm:$0xff]   ;;  %v10783_v1 = vld [vmem:[#allocation17 + $0x284] ss:$16 sps:$4 sm:$0xff]   ;;  %v10786_v2 = vld [vmem:[#allocation17 + $0x28c] ss:$16 sps:$4 sm:$0xff]  }
 0x692   :  { %6083 = vmatprep.subr.bf16.mxu0 %v10690_v9 }
 0x694   :  { %6002 = vmatpush1.bf16.msra.mxu1 %v10685_v25 }
 0x695   :  { %6084 = vmatpush1.bf16.msra.mxu0 %v10688_v12  ;;  %6003 = vmatprep.subr.bf16.mxu1 %v10693_v24 }
 0x696   :  { %6085 = vmatprep.subr.bf16.mxu0 %v10696_v14 }
 0x698   :  { %6004 = vmatpush1.bf16.msra.mxu1 %v10691_v15 }
 0x699   :  { %6086 = vmatpush1.bf16.msra.mxu0 %v10694_v16  ;;  %6005 = vmatprep.subr.bf16.mxu1 %v10699_v17  ;;  %v9572_v17 = vadd.f32 %v4357_v6, %v3403_v32  ;;  %v10790_v32 = vld [vmem:[#allocation17 + $0x2a8] ss:$16 sps:$4 sm:$0xff]   ;;  %v10793_v6 = vld [vmem:[#allocation17 + $0x2c0] ss:$16 sps:$4 sm:$0xff]  }
 0x69a   :  { %6087 = vmatprep.subr.bf16.mxu0 %v10702_v18 }
 0x69c   :  { %6006 = vmatpush1.bf16.msra.mxu1 %v10697_v19  ;;  %v10759_v19 = vld [vmem:[#allocation17 + $0x204] ss:$16 sps:$4 sm:$0xff]  }
 0x69d   :  { %6088 = vmatpush1.bf16.msra.mxu0 %v10700_v21  ;;  %6007 = vmatprep.subr.bf16.mxu1 %v10705_v22 }
 0x69e   :  { %6089 = vmatprep.subr.bf16.mxu0 %v10708_v23 }
 0x6a0   :  { %6008 = vmatpush1.bf16.msra.mxu1 %v10703_v26 }
 0x6a1   :  { %6090 = vmatpush1.bf16.msra.mxu0 %v10706_v29  ;;  %6009 = vmatprep.subr.bf16.mxu1 %v10711_v30 }
 0x6a2   :  { %6091 = vmatprep.subr.bf16.mxu0 %v10714_v31  ;;  %v10762_v31 = vld [vmem:[#allocation17 + $0x20c] ss:$16 sps:$4 sm:$0xff]  }
 0x6a4   :  { %6010 = vmatpush1.bf16.msra.mxu1 %v10709_v34 }
 0x6a5   :  { %6092 = vmatpush1.bf16.msra.mxu0 %v10712_v35  ;;  %6011 = vmatprep.subr.bf16.mxu1 %v10717_v36 }
 0x6a6   :  { %6093 = vmatprep.subr.bf16.mxu0 %v10720_v37 }
 0x6a8   :  { %6012 = vmatpush1.bf16.msra.mxu1 %v10715_v38 }
 0x6a9   :  { %6094 = vmatpush1.bf16.msra.mxu0 %v10718_v39  ;;  %6013 = vmatprep.subr.bf16.mxu1 %v10723_v40 }
 0x6aa   :  { %6095 = vmatprep.subr.bf16.mxu0 %v10726_v41 }
 0x6ac   :  { %6014 = vmatpush1.bf16.msra.mxu1 %v10721_v42 }
 0x6ad   :  { %6096 = vmatpush1.bf16.msra.mxu0 %v10724_v44  ;;  %6015 = vmatprep.subr.bf16.mxu1 %v10729_v45 }
 0x6ae   :  { %6097 = vmatprep.subr.bf16.mxu0 %v10732_v46 }
 0x6b0   :  { %6016 = vmatpush1.bf16.msra.mxu1 %v10727_v48 }
 0x6b1   :  { %6098 = vmatpush1.bf16.msra.mxu0 %v10730_v7  ;;  %6017 = vmatprep.subr.bf16.mxu1 %v10735_v49 }
 0x6b2   :  { %6099 = vmatprep.subr.bf16.mxu0 %v10738_v50 }
 0x6b4   :  { %6018 = vmatpush1.bf16.msra.mxu1 %v10733_v51  ;;  %v10757_v51 = vld [vmem:[#allocation17 + $0x200] ss:$16 sps:$4 sm:$0xff]  }
 0x6b5   :  { %6100 = vmatpush1.bf16.msra.mxu0 %v10736_v8  ;;  %6019 = vmatprep.subr.bf16.mxu1 %v10741_v13  ;;  %v10760_v8 = vld [vmem:[#allocation17 + $0x208] ss:$16 sps:$4 sm:$0xff]  }
 0x6b6   :  { %6101 = vmatprep.subr.bf16.mxu0 %v10744_v52 }
 0x6b8   :  { %6020 = vmatpush1.bf16.msra.mxu1 %v10739_v54  ;;  %v10765_v54 = vld [vmem:[#allocation17 + $0x224] ss:$16 sps:$4 sm:$0xff]  }
 0x6b9   :  { %6102 = vmatpush1.bf16.msra.mxu0 %v10742_v55  ;;  %6021 = vmatprep.subr.bf16.mxu1 %v10747_v60  ;;  %v10768_v55 = vld [vmem:[#allocation17 + $0x22c] ss:$16 sps:$4 sm:$0xff]  }
 0x6ba   :  { %6103 = vmatprep.subr.bf16.mxu0 %v10750_v33  ;;  %v10774_v60 = vld [vmem:[#allocation17 + $0x24c] ss:$16 sps:$4 sm:$0xff]   ;;  %v10772_v33 = vld [vmem:[#allocation17 + $0x248] ss:$16 sps:$4 sm:$0xff]  }
 0x6bc   :  { %6022 = vmatpush1.bf16.msra.mxu1 %v10745_v59  ;;  %v10771_v59 = vld [vmem:[#allocation17 + $0x244] ss:$16 sps:$4 sm:$0xff]  }
 0x6bd   :  { %6104 = vmatpush1.bf16.msra.mxu0 %v10748_v61  ;;  %6023 = vmatprep.subr.bf16.mxu1 %v10753_v4  ;;  %v10769_v61 = vld [vmem:[#allocation17 + $0x240] ss:$16 sps:$4 sm:$0xff]   ;;  %v10784_v4 = vld [vmem:[#allocation17 + $0x288] ss:$16 sps:$4 sm:$0xff]  }
 0x6be   :  { %6105 = vmatprep.subr.bf16.mxu0 %v10756_v3  ;;  %v10792_v3 = vld [vmem:[#allocation17 + $0x2ac] ss:$16 sps:$4 sm:$0xff]  }
 0x6c0   :  { %6024 = vmatpush1.bf16.msra.mxu1 %v10751_v56  ;;  %v10781_v56 = vld [vmem:[#allocation17 + $0x280] ss:$16 sps:$4 sm:$0xff]  }
 0x6c1   :  { %6106 = vmatpush1.bf16.msra.mxu0 %v10754_v5  ;;  %6034 = vmatprep.subr.bf16.mxu1 %v10759_v19  ;;  %v10789_v5 = vld [vmem:[#allocation17 + $0x2a4] ss:$16 sps:$4 sm:$0xff]   ;;  %v10808_v19 = vld [vmem:[#allocation17 + $0x308] ss:$16 sps:$4 sm:$0xff]  }
 0x6c2   :  { %6116 = vmatprep.subr.bf16.mxu0 %v10762_v31  ;;  %v10822_v31 = vld [vmem:[#allocation17 + $0x34c] ss:$16 sps:$4 sm:$0xff]  }
 0x756   :  { %v5077_v9 = vpop.f32.mrb[12].mxu1 }
 0x757   :  { %v9567_v25 = vadd.f32 %v9566_v20, %v5077_v9  ;;  %v5159_v12 = vpop.f32.mrb[16].mxu0  ;;  %v5079_v24 = vpop.f32.mrb[13].mxu1  ;;  %v10787_v20 = vld [vmem:[#allocation17 + $0x2a0] ss:$16 sps:$4 sm:$0xff]   ;;  %v10796_v9 = vld [vmem:[#allocation17 + $0x2c8] ss:$16 sps:$4 sm:$0xff]  }
 0x758   :  { %v12070_v14 = vadd.f32 %v9570_v58, %v5159_v12  ;;  %v9569_v15 = vadd.f32 %v9568_v47, %v5079_v24  ;;  %v5161_v16 = vpop.f32.mrb[17].mxu0  ;;  %v5081_v18 = vpop.f32.mrb[14].mxu1  ;;  %v10795_v58 = vld [vmem:[#allocation17 + $0x2c4] ss:$16 sps:$4 sm:$0xff]   ;;  %v10798_v47 = vld [vmem:[#allocation17 + $0x2cc] ss:$16 sps:$4 sm:$0xff]  }
 0x759   :  { %v5170_v21 = vmax.f32 %v9567_v25, 0.0  ;;  %v5163_v22 = vpop.f32.mrb[18].mxu0  ;;  %v5082_v23 = vpop.f32.mrb[15].mxu1  ;;  %v9573_v34 = vadd.f32 %v9572_v17, %v5161_v16  ;;  %v10801_v25 = vld [vmem:[#allocation17 + $0x2e4] ss:$16 sps:$4 sm:$0xff]  }
 0x75a   :  { %v5172_v26 = vmax.f32 %v12070_v14, 0.0  ;;  %v5171_v29 = vmax.f32 %v9569_v15, 0.0  ;;  %v5164_v30 = vpop.f32.mrb[19].mxu0  ;;  %v10804_v12 = vld [vmem:[#allocation17 + $0x2ec] ss:$16 sps:$4 sm:$0xff]  }
 0x75b   :  { %5178 = vrot.lane.b32.xlu0 %v5170_v21, %s11610_s17  ;;  %v5173_v36 = vmax.f32 %v9573_v34, 0.0  ;;  %v10799_v24 = vld [vmem:[#allocation17 + $0x2e0] ss:$16 sps:$4 sm:$0xff]   ;;  %v10802_v15 = vld [vmem:[#allocation17 + $0x2e8] ss:$16 sps:$4 sm:$0xff]  }
 0x75c   :  { %v9693_v35 = vpack.i.bf16 %v5172_v26, %v5171_v29  ;;  %v10807_v16 = vld [vmem:[#allocation17 + $0x304] ss:$16 sps:$4 sm:$0xff]   ;;  %v10810_v17 = vld [vmem:[#allocation17 + $0x30c] ss:$16 sps:$4 sm:$0xff]   ;;  %v10805_v18 = vld [vmem:[#allocation17 + $0x300] ss:$16 sps:$4 sm:$0xff]  }
 0x75d   :  { %v10816_v22 = vld [vmem:[#allocation17 + $0x32c] ss:$16 sps:$4 sm:$0xff]   ;;  %v10811_v23 = vld [vmem:[#allocation17 + $0x320] ss:$16 sps:$4 sm:$0xff]   ;;  %v10819_v30 = vld [vmem:[#allocation17 + $0x344] ss:$16 sps:$4 sm:$0xff]  }
 0x75e   :  { %9694 = vrot.lane.b32.xlu1 %v9693_v35, %s11610_s17  ;;  %v10817_v34 = vld [vmem:[#allocation17 + $0x340] ss:$16 sps:$4 sm:$0xff]   ;;  %v10820_v35 = vld [vmem:[#allocation17 + $0x348] ss:$16 sps:$4 sm:$0xff]  }
 0x75f   :  { %v10859_v14 = vld [vmem:[#allocation19 + $0x20] ss:$16 sps:$4 sm:$0xff]  }
 0x762   :  { %5184 = vrot.lane.b32.xlu1 %v5173_v36, %s11610_s17  ;;  %s11555_s17 = scalar_lea.vmem %s8436_s2, 128 }
 0x763   :  { %p11556_p6 = scmp.ne.s32.totalorder %s8436_s2, %s11555_s17  ;;  %p11561_p8 = scmp.lt.s32.totalorder %s11555_s17, %s11555_s17 }
 0x765   :  { %p11562_p9 = por %p11561_p8, %p11560_p7 }
 0x767   :  { %p11563_p10 = pnand %p11562_p9, %p11556_p6 }
 0x7cd   :  { %v5179_v40 = vpop.permute.xlu0 %5178 }
 0x7d0   :  { %v9695_v37 = vpop.permute.xlu1 %9694 }
 0x7d1   :  { %v9697_v38 = vunpack.i.h.bf16 %v9695_v37  ;;  %v9696_v39 = vunpack.i.l.bf16 %v9695_v37  ;;  %v10828_v37 = vld [vmem:[#allocation17 + $0x36c] ss:$16 sps:$4 sm:$0xff]  }
 0x7d3   :  { %v5187_v41 = vsel %vm5186_vm2, %v5179_v40, %v9696_v39  ;;  %v5188_v42 = vsel %vm5186_vm2, %v9696_v39, %v9697_v38  ;;  %v10826_v39 = vld [vmem:[#allocation17 + $0x368] ss:$16 sps:$4 sm:$0xff]   ;;  %v10831_v40 = vld [vmem:[#allocation17 + $0x384] ss:$16 sps:$4 sm:$0xff]  }
 0x7d4   :  { %v5185_v44 = vpop.permute.xlu1 %5184  ;;  %v5196_v45 = vmax.f32 %v5171_v29, %v5188_v42  ;;  %v5195_v46 = vmax.f32 %v5170_v21, %v5187_v41  ;;  %v10813_v21 = vld [vmem:[#allocation17 + $0x324] ss:$16 sps:$4 sm:$0xff]   ;;  %v10814_v29 = vld [vmem:[#allocation17 + $0x328] ss:$16 sps:$4 sm:$0xff]   ;;  %v10834_v41 = vld [vmem:[#allocation17 + $0x38c] ss:$16 sps:$4 sm:$0xff]  }
 0x7d5   :  { %v12078_v48 = vsel %vm5186_vm2, %v9697_v38, %v5185_v44  ;;  %v5194_v7 = vsel %vm5186_vm2, %v5185_v44, 0.0  ;;  %v10823_v38 = vld [vmem:[#allocation17 + $0x360] ss:$16 sps:$4 sm:$0xff]   ;;  %v10832_v44 = vld [vmem:[#allocation17 + $0x388] ss:$16 sps:$4 sm:$0xff]  }
 0x7d6   :  { %v5198_v49 = vmax.f32 %v5173_v36, %v5194_v7  ;;  %v12080_v50 = vpack.c.bf16 %v5196_v45, %v5196_v45  ;;  %v12082_v13 = vpack.c.bf16 %v5195_v46, %v5195_v46  ;;  %v10825_v36 = vld [vmem:[#allocation17 + $0x364] ss:$16 sps:$4 sm:$0xff]   ;;  %v10829_v42 = vld [vmem:[#allocation17 + $0x380] ss:$16 sps:$4 sm:$0xff]   ;;  %v10840_v46 = vld [vmem:[#allocation17 + $0x3ac] ss:$16 sps:$4 sm:$0xff]  }
 0x7d7   :  { %v10837_v45 = vld [vmem:[#allocation17 + $0x3a4] ss:$16 sps:$4 sm:$0xff]   ;;  %v10835_v7 = vld [vmem:[#allocation17 + $0x3a0] ss:$16 sps:$4 sm:$0xff]  }
 0x7d8   :  { %v12084_v52 = vpack.c.bf16 %v5198_v49, %v5198_v49  ;;  %6025 = vmatprep.mubr.bf16.mxu1 %v12080_v50  ;;  %6107 = vmatprep.mubr.bf16.mxu0 %v12080_v50  ;;  %v10838_v49 = vld [vmem:[#allocation17 + $0x3a8] ss:$16 sps:$4 sm:$0xff]  }
 0x7d9   :  { %6026 = vmatmul.mubr.bf16.vlgmr.msra.gmra.mrb[16].mxu1 %v12082_v13  ;;  %6108 = vmatmul.mubr.bf16.vlgmr.msra.gmra.mrb[20].mxu0 %v12082_v13 }
 0x7da   :  { %6035 = vmatpush1.bf16.msra.mxu1 %v10757_v51  ;;  %6117 = vmatpush1.bf16.msra.mxu0 %v10760_v8  ;;  %v10843_v51 = vld [vmem:[#allocation17 + $0x3c4] ss:$16 sps:$4 sm:$0xff]   ;;  %v10846_v8 = vld [vmem:[#allocation17 + $0x3cc] ss:$16 sps:$4 sm:$0xff]  }
 0x7db   :  { %6066 = vmatprep.mubr.bf16.mxu1 %v12084_v52  ;;  %6148 = vmatprep.mubr.bf16.mxu0 %v12084_v52 }
 0x7dc   :  { %6036 = vmatprep.subr.bf16.mxu1 %v10765_v54  ;;  %6118 = vmatprep.subr.bf16.mxu0 %v10768_v55  ;;  %v10841_v54 = vld [vmem:[#allocation17 + $0x3c0] ss:$16 sps:$4 sm:$0xff]   ;;  %v10844_v55 = vld [vmem:[#allocation17 + $0x3c8] ss:$16 sps:$4 sm:$0xff]  }
 0x7de   :  { %6037 = vmatpush1.bf16.msra.mxu1 %v10763_v57  ;;  %6119 = vmatpush1.bf16.msra.mxu0 %v10766_v27  ;;  %v10849_v57 = vld [vmem:[#allocation17 + $0x3e4] ss:$16 sps:$4 sm:$0xff]   ;;  %v10852_v27 = vld [vmem:[#allocation17 + $0x3ec] ss:$16 sps:$4 sm:$0xff]  }
 0x7df   :  { %6038 = vmatprep.subr.bf16.mxu1 %v10771_v59  ;;  %6120 = vmatprep.subr.bf16.mxu0 %v10774_v60  ;;  %v10847_v59 = vld [vmem:[#allocation17 + $0x3e0] ss:$16 sps:$4 sm:$0xff]   ;;  %v10850_v60 = vld [vmem:[#allocation17 + $0x3e8] ss:$16 sps:$4 sm:$0xff]  }
 0x7e2   :  { %6039 = vmatpush1.bf16.msra.mxu1 %v10769_v61  ;;  %6121 = vmatpush1.bf16.msra.mxu0 %v10772_v33  ;;  %v5197_v61 = vmax.f32 %v5172_v26, %v12078_v48  ;;  %v10855_v33 = vld [vmem:[#allocation19 + $0x4] ss:$16 sps:$4 sm:$0xff]   ;;  %v10862_v26 = vld [vmem:[#allocation19 + $0x28] ss:$16 sps:$4 sm:$0xff]  }
 0x7e3   :  { %6040 = vmatprep.subr.bf16.mxu1 %v10777_v62  ;;  %6122 = vmatprep.subr.bf16.mxu0 %v10780_v63  ;;  %v10858_v62 = vld [vmem:[#allocation19 + $0xc] ss:$16 sps:$4 sm:$0xff]   ;;  %v10853_v63 = vld [vmem:[#allocation19] ss:$16 sps:$4 sm:$0xff]   ;;  %v10867_v48 = vld [vmem:[#allocation19 + $0x44] ss:$16 sps:$4 sm:$0xff]  }
 0x7e6   :  { %6041 = vmatpush1.bf16.msra.mxu1 %v10775_v0  ;;  %6123 = vmatpush1.bf16.msra.mxu0 %v10778_v53  ;;  %v10856_v0 = vld [vmem:[#allocation19 + $0x8] ss:$16 sps:$4 sm:$0xff]   ;;  %v12095_v53 = vpack.c.bf16 %v5197_v61, %v5197_v61 }
 0x7e7   :  { %6042 = vmatprep.subr.bf16.mxu1 %v10783_v1  ;;  %6124 = vmatprep.subr.bf16.mxu0 %v10786_v2  ;;  %v10861_v1 = vld [vmem:[#allocation19 + $0x24] ss:$16 sps:$4 sm:$0xff]   ;;  %v10864_v2 = vld [vmem:[#allocation19 + $0x2c] ss:$16 sps:$4 sm:$0xff]   ;;  %v10934_v61 = vld [vmem:[#allocation19 + $0x1a8] ss:$16 sps:$4 sm:$0xff]  }
 0x7ea   :  { %6043 = vmatpush1.bf16.msra.mxu1 %v10781_v56  ;;  %6125 = vmatpush1.bf16.msra.mxu0 %v10784_v4  ;;  %v10870_v56 = vld [vmem:[#allocation19 + $0x4c] ss:$16 sps:$4 sm:$0xff]   ;;  %v10865_v4 = vld [vmem:[#allocation19 + $0x40] ss:$16 sps:$4 sm:$0xff]  }
 0x7eb   :  { %6044 = vmatprep.subr.bf16.mxu1 %v10789_v5  ;;  %6126 = vmatprep.subr.bf16.mxu0 %v10792_v3  ;;  %v10868_v5 = vld [vmem:[#allocation19 + $0x48] ss:$16 sps:$4 sm:$0xff]   ;;  %v10873_v3 = vld [vmem:[#allocation19 + $0x64] ss:$16 sps:$4 sm:$0xff]  }
 0x7ee   :  { %6045 = vmatpush1.bf16.msra.mxu1 %v10787_v20  ;;  %6127 = vmatpush1.bf16.msra.mxu0 %v10790_v32  ;;  %v10876_v20 = vld [vmem:[#allocation19 + $0x6c] ss:$16 sps:$4 sm:$0xff]   ;;  %v10871_v32 = vld [vmem:[#allocation19 + $0x60] ss:$16 sps:$4 sm:$0xff]  }
 0x7ef   :  { %6046 = vmatprep.subr.bf16.mxu1 %v10795_v58  ;;  %6128 = vmatprep.subr.bf16.mxu0 %v10798_v47  ;;  %v10874_v58 = vld [vmem:[#allocation19 + $0x68] ss:$16 sps:$4 sm:$0xff]   ;;  %v10879_v47 = vld [vmem:[#allocation19 + $0x84] ss:$16 sps:$4 sm:$0xff]  }
 0x7f2   :  { %6047 = vmatpush1.bf16.msra.mxu1 %v10793_v6  ;;  %6129 = vmatpush1.bf16.msra.mxu0 %v10796_v9  ;;  %v10882_v6 = vld [vmem:[#allocation19 + $0x8c] ss:$16 sps:$4 sm:$0xff]   ;;  %v10877_v9 = vld [vmem:[#allocation19 + $0x80] ss:$16 sps:$4 sm:$0xff]  }
 0x7f3   :  { %6048 = vmatprep.subr.bf16.mxu1 %v10801_v25  ;;  %6130 = vmatprep.subr.bf16.mxu0 %v10804_v12  ;;  %v10880_v25 = vld [vmem:[#allocation19 + $0x88] ss:$16 sps:$4 sm:$0xff]   ;;  %v10885_v12 = vld [vmem:[#allocation19 + $0xa4] ss:$16 sps:$4 sm:$0xff]  }
 0x7f6   :  { %6049 = vmatpush1.bf16.msra.mxu1 %v10799_v24  ;;  %6131 = vmatpush1.bf16.msra.mxu0 %v10802_v15  ;;  %v10888_v24 = vld [vmem:[#allocation19 + $0xac] ss:$16 sps:$4 sm:$0xff]   ;;  %v10883_v15 = vld [vmem:[#allocation19 + $0xa0] ss:$16 sps:$4 sm:$0xff]  }
 0x7f7   :  { %6050 = vmatprep.subr.bf16.mxu1 %v10807_v16  ;;  %6132 = vmatprep.subr.bf16.mxu0 %v10810_v17  ;;  %v10886_v16 = vld [vmem:[#allocation19 + $0xa8] ss:$16 sps:$4 sm:$0xff]   ;;  %v10891_v17 = vld [vmem:[#allocation19 + $0xc4] ss:$16 sps:$4 sm:$0xff]  }
 0x7fa   :  { %6051 = vmatpush1.bf16.msra.mxu1 %v10805_v18  ;;  %6133 = vmatpush1.bf16.msra.mxu0 %v10808_v19  ;;  %v10894_v18 = vld [vmem:[#allocation19 + $0xcc] ss:$16 sps:$4 sm:$0xff]   ;;  %v10889_v19 = vld [vmem:[#allocation19 + $0xc0] ss:$16 sps:$4 sm:$0xff]  }
 0x7fb   :  { %6052 = vmatprep.subr.bf16.mxu1 %v10813_v21  ;;  %6134 = vmatprep.subr.bf16.mxu0 %v10816_v22  ;;  %v10892_v21 = vld [vmem:[#allocation19 + $0xc8] ss:$16 sps:$4 sm:$0xff]   ;;  %v10897_v22 = vld [vmem:[#allocation19 + $0xe4] ss:$16 sps:$4 sm:$0xff]  }
 0x7fe   :  { %6053 = vmatpush1.bf16.msra.mxu1 %v10811_v23  ;;  %6135 = vmatpush1.bf16.msra.mxu0 %v10814_v29  ;;  %v10900_v23 = vld [vmem:[#allocation19 + $0xec] ss:$16 sps:$4 sm:$0xff]   ;;  %v10895_v29 = vld [vmem:[#allocation19 + $0xe0] ss:$16 sps:$4 sm:$0xff]  }
 0x7ff   :  { %6054 = vmatprep.subr.bf16.mxu1 %v10819_v30  ;;  %6136 = vmatprep.subr.bf16.mxu0 %v10822_v31  ;;  %v10898_v30 = vld [vmem:[#allocation19 + $0xe8] ss:$16 sps:$4 sm:$0xff]   ;;  %v10903_v31 = vld [vmem:[#allocation19 + $0x104] ss:$16 sps:$4 sm:$0xff]  }
 0x802   :  { %6055 = vmatpush1.bf16.msra.mxu1 %v10817_v34  ;;  %6137 = vmatpush1.bf16.msra.mxu0 %v10820_v35  ;;  %v10906_v34 = vld [vmem:[#allocation19 + $0x10c] ss:$16 sps:$4 sm:$0xff]   ;;  %v10901_v35 = vld [vmem:[#allocation19 + $0x100] ss:$16 sps:$4 sm:$0xff]  }
 0x803   :  { %6056 = vmatprep.subr.bf16.mxu1 %v10825_v36  ;;  %6138 = vmatprep.subr.bf16.mxu0 %v10828_v37  ;;  %v10904_v36 = vld [vmem:[#allocation19 + $0x108] ss:$16 sps:$4 sm:$0xff]   ;;  %v10909_v37 = vld [vmem:[#allocation19 + $0x124] ss:$16 sps:$4 sm:$0xff]  }
 0x806   :  { %6057 = vmatpush1.bf16.msra.mxu1 %v10823_v38  ;;  %6139 = vmatpush1.bf16.msra.mxu0 %v10826_v39  ;;  %v10912_v38 = vld [vmem:[#allocation19 + $0x12c] ss:$16 sps:$4 sm:$0xff]   ;;  %v10907_v39 = vld [vmem:[#allocation19 + $0x120] ss:$16 sps:$4 sm:$0xff]  }
 0x807   :  { %6058 = vmatprep.subr.bf16.mxu1 %v10831_v40  ;;  %6140 = vmatprep.subr.bf16.mxu0 %v10834_v41  ;;  %v10910_v40 = vld [vmem:[#allocation19 + $0x128] ss:$16 sps:$4 sm:$0xff]   ;;  %v10915_v41 = vld [vmem:[#allocation19 + $0x144] ss:$16 sps:$4 sm:$0xff]  }
 0x80a   :  { %6059 = vmatpush1.bf16.msra.mxu1 %v10829_v42  ;;  %6141 = vmatpush1.bf16.msra.mxu0 %v10832_v44  ;;  %v10918_v42 = vld [vmem:[#allocation19 + $0x14c] ss:$16 sps:$4 sm:$0xff]   ;;  %v10913_v44 = vld [vmem:[#allocation19 + $0x140] ss:$16 sps:$4 sm:$0xff]  }
 0x80b   :  { %6060 = vmatprep.subr.bf16.mxu1 %v10837_v45  ;;  %6142 = vmatprep.subr.bf16.mxu0 %v10840_v46  ;;  %v10916_v45 = vld [vmem:[#allocation19 + $0x148] ss:$16 sps:$4 sm:$0xff]   ;;  %v10921_v46 = vld [vmem:[#allocation19 + $0x164] ss:$16 sps:$4 sm:$0xff]  }
 0x80e   :  { %6061 = vmatpush1.bf16.msra.mxu1 %v10835_v7  ;;  %6143 = vmatpush1.bf16.msra.mxu0 %v10838_v49  ;;  %v10924_v7 = vld [vmem:[#allocation19 + $0x16c] ss:$16 sps:$4 sm:$0xff]   ;;  %v10919_v49 = vld [vmem:[#allocation19 + $0x160] ss:$16 sps:$4 sm:$0xff]  }
 0x80f   :  { %6062 = vmatprep.subr.bf16.mxu1 %v10843_v51  ;;  %6144 = vmatprep.subr.bf16.mxu0 %v10846_v8  ;;  %v10922_v51 = vld [vmem:[#allocation19 + $0x168] ss:$16 sps:$4 sm:$0xff]   ;;  %v10927_v8 = vld [vmem:[#allocation19 + $0x184] ss:$16 sps:$4 sm:$0xff]  }
 0x812   :  { %6063 = vmatpush1.bf16.msra.mxu1 %v10841_v54  ;;  %6145 = vmatpush1.bf16.msra.mxu0 %v10844_v55  ;;  %v10930_v54 = vld [vmem:[#allocation19 + $0x18c] ss:$16 sps:$4 sm:$0xff]   ;;  %v10925_v55 = vld [vmem:[#allocation19 + $0x180] ss:$16 sps:$4 sm:$0xff]  }
 0x813   :  { %6064 = vmatprep.subr.bf16.mxu1 %v10849_v57  ;;  %6146 = vmatprep.subr.bf16.mxu0 %v10852_v27  ;;  %v10928_v57 = vld [vmem:[#allocation19 + $0x188] ss:$16 sps:$4 sm:$0xff]   ;;  %v10933_v27 = vld [vmem:[#allocation19 + $0x1a4] ss:$16 sps:$4 sm:$0xff]  }
 0x816   :  { %6065 = vmatpush1.bf16.msra.mxu1 %v10847_v59  ;;  %6147 = vmatpush1.bf16.msra.mxu0 %v10850_v60  ;;  %v10936_v59 = vld [vmem:[#allocation19 + $0x1ac] ss:$16 sps:$4 sm:$0xff]   ;;  %v10931_v60 = vld [vmem:[#allocation19 + $0x1a0] ss:$16 sps:$4 sm:$0xff]  }
 0x817   :  { %6955 = vmatprep.subr.bf16.mxu1 %v10855_v33  ;;  %7037 = vmatprep.subr.bf16.mxu0 %v10858_v62  ;;  %v10939_v33 = vld [vmem:[#allocation19 + $0x1c4] ss:$16 sps:$4 sm:$0xff]   ;;  %v10942_v62 = vld [vmem:[#allocation19 + $0x1cc] ss:$16 sps:$4 sm:$0xff]  }
 0x819   :  { %6067 = vmatmul.mubr.bf16.vlgmr.msra.gmra.mrb[16].mxu1 %v12095_v53  ;;  %6149 = vmatmul.mubr.bf16.vlgmr.msra.gmra.mrb[20].mxu0 %v12095_v53 }
 0x81a   :  { %6956 = vmatpush1.bf16.msra.mxu1 %v10853_v63  ;;  %7038 = vmatpush1.bf16.msra.mxu0 %v10856_v0  ;;  %v10937_v63 = vld [vmem:[#allocation19 + $0x1c0] ss:$16 sps:$4 sm:$0xff]   ;;  %v10940_v0 = vld [vmem:[#allocation19 + $0x1c8] ss:$16 sps:$4 sm:$0xff]  }
 0x81b   :  { %6957 = vmatprep.subr.bf16.mxu1 %v10861_v1  ;;  %7039 = vmatprep.subr.bf16.mxu0 %v10864_v2  ;;  %v10945_v1 = vld [vmem:[#allocation19 + $0x1e4] ss:$16 sps:$4 sm:$0xff]   ;;  %v10948_v2 = vld [vmem:[#allocation19 + $0x1ec] ss:$16 sps:$4 sm:$0xff]  }
 0x81e   :  { %6958 = vmatpush1.bf16.msra.mxu1 %v10859_v14  ;;  %7040 = vmatpush1.bf16.msra.mxu0 %v10862_v26  ;;  %v10943_v14 = vld [vmem:[#allocation19 + $0x1e0] ss:$16 sps:$4 sm:$0xff]   ;;  %v10946_v26 = vld [vmem:[#allocation19 + $0x1e8] ss:$16 sps:$4 sm:$0xff]  }
 0x81f   :  { %6959 = vmatprep.subr.bf16.mxu1 %v10867_v48  ;;  %7041 = vmatprep.subr.bf16.mxu0 %v10870_v56  ;;  %v10951_v48 = vld [vmem:[#allocation19 + $0x204] ss:$16 sps:$4 sm:$0xff]   ;;  %v10954_v56 = vld [vmem:[#allocation19 + $0x20c] ss:$16 sps:$4 sm:$0xff]  }
 0x822   :  { %6960 = vmatpush1.bf16.msra.mxu1 %v10865_v4  ;;  %7042 = vmatpush1.bf16.msra.mxu0 %v10868_v5  ;;  %v12102_v4 = vld [vmem:[%s12168_s16] sm:$0xf] }
 0x823   :  { %6961 = vmatprep.subr.bf16.mxu1 %v10873_v3  ;;  %7043 = vmatprep.subr.bf16.mxu0 %v10876_v20  ;;  %v5336_v5 = vrot.slane %v12102_v4, %v11951_v10  ;;  %v5340_v3 = vrot.slane %v12102_v4, %v11954_v11  ;;  %v5348_v20 = vrot.slane %v12102_v4, %v11972_v28 }
 0x826   :  { %6962 = vmatpush1.bf16.msra.mxu1 %v10871_v32  ;;  %7044 = vmatpush1.bf16.msra.mxu0 %v10874_v58 }
 0x827   :  { %6963 = vmatprep.subr.bf16.mxu1 %v10879_v47  ;;  %7045 = vmatprep.subr.bf16.mxu0 %v10882_v6 }
 0x82a   :  { %6964 = vmatpush1.bf16.msra.mxu1 %v10877_v9  ;;  %7046 = vmatpush1.bf16.msra.mxu0 %v10880_v25 }
 0x82b   :  { %6965 = vmatprep.subr.bf16.mxu1 %v10885_v12  ;;  %7047 = vmatprep.subr.bf16.mxu0 %v10888_v24 }
 0x82e   :  { %6966 = vmatpush1.bf16.msra.mxu1 %v10883_v15  ;;  %7048 = vmatpush1.bf16.msra.mxu0 %v10886_v16 }
 0x82f   :  { %6967 = vmatprep.subr.bf16.mxu1 %v10891_v17  ;;  %7049 = vmatprep.subr.bf16.mxu0 %v10894_v18 }
 0x832   :  { %6968 = vmatpush1.bf16.msra.mxu1 %v10889_v19  ;;  %7050 = vmatpush1.bf16.msra.mxu0 %v10892_v21 }
 0x833   :  { %6969 = vmatprep.subr.bf16.mxu1 %v10897_v22  ;;  %7051 = vmatprep.subr.bf16.mxu0 %v10900_v23  ;;  %v10949_v23 = vld [vmem:[#allocation19 + $0x200] ss:$16 sps:$4 sm:$0xff]  }
 0x836   :  { %6970 = vmatpush1.bf16.msra.mxu1 %v10895_v29  ;;  %7052 = vmatpush1.bf16.msra.mxu0 %v10898_v30  ;;  %v10952_v29 = vld [vmem:[#allocation19 + $0x208] ss:$16 sps:$4 sm:$0xff]  }
 0x837   :  { %6971 = vmatprep.subr.bf16.mxu1 %v10903_v31  ;;  %7053 = vmatprep.subr.bf16.mxu0 %v10906_v34  ;;  %v10957_v31 = vld [vmem:[#allocation19 + $0x224] ss:$16 sps:$4 sm:$0xff]   ;;  %v10960_v34 = vld [vmem:[#allocation19 + $0x22c] ss:$16 sps:$4 sm:$0xff]  }
 0x83a   :  { %6972 = vmatpush1.bf16.msra.mxu1 %v10901_v35  ;;  %7054 = vmatpush1.bf16.msra.mxu0 %v10904_v36  ;;  %v10955_v36 = vld [vmem:[#allocation19 + $0x220] ss:$16 sps:$4 sm:$0xff]  }
 0x83b   :  { %6973 = vmatprep.subr.bf16.mxu1 %v10909_v37  ;;  %7055 = vmatprep.subr.bf16.mxu0 %v10912_v38  ;;  %v10958_v37 = vld [vmem:[#allocation19 + $0x228] ss:$16 sps:$4 sm:$0xff]   ;;  %v10963_v38 = vld [vmem:[#allocation19 + $0x244] ss:$16 sps:$4 sm:$0xff]  }
 0x83e   :  { %6974 = vmatpush1.bf16.msra.mxu1 %v10907_v39  ;;  %7056 = vmatpush1.bf16.msra.mxu0 %v10910_v40  ;;  %v10966_v39 = vld [vmem:[#allocation19 + $0x24c] ss:$16 sps:$4 sm:$0xff]   ;;  %v10961_v40 = vld [vmem:[#allocation19 + $0x240] ss:$16 sps:$4 sm:$0xff]  }
 0x83f   :  { %6975 = vmatprep.subr.bf16.mxu1 %v10915_v41  ;;  %7057 = vmatprep.subr.bf16.mxu0 %v10918_v42  ;;  %v10964_v41 = vld [vmem:[#allocation19 + $0x248] ss:$16 sps:$4 sm:$0xff]   ;;  %v10969_v42 = vld [vmem:[#allocation19 + $0x264] ss:$16 sps:$4 sm:$0xff]  }
 0x842   :  { %6976 = vmatpush1.bf16.msra.mxu1 %v10913_v44  ;;  %7058 = vmatpush1.bf16.msra.mxu0 %v10916_v45  ;;  %v10972_v44 = vld [vmem:[#allocation19 + $0x26c] ss:$16 sps:$4 sm:$0xff]   ;;  %v10967_v45 = vld [vmem:[#allocation19 + $0x260] ss:$16 sps:$4 sm:$0xff]  }
 0x843   :  { %6977 = vmatprep.subr.bf16.mxu1 %v10921_v46  ;;  %7059 = vmatprep.subr.bf16.mxu0 %v10924_v7  ;;  %v10970_v46 = vld [vmem:[#allocation19 + $0x268] ss:$16 sps:$4 sm:$0xff]   ;;  %v10975_v7 = vld [vmem:[#allocation19 + $0x284] ss:$16 sps:$4 sm:$0xff]  }
 0x846   :  { %6978 = vmatpush1.bf16.msra.mxu1 %v10919_v49  ;;  %7060 = vmatpush1.bf16.msra.mxu0 %v10922_v51  ;;  %v10978_v49 = vld [vmem:[#allocation19 + $0x28c] ss:$16 sps:$4 sm:$0xff]   ;;  %v10973_v51 = vld [vmem:[#allocation19 + $0x280] ss:$16 sps:$4 sm:$0xff]  }
 0x847   :  { %6979 = vmatprep.subr.bf16.mxu1 %v10927_v8  ;;  %7061 = vmatprep.subr.bf16.mxu0 %v10930_v54  ;;  %v10976_v8 = vld [vmem:[#allocation19 + $0x288] ss:$16 sps:$4 sm:$0xff]   ;;  %v10981_v54 = vld [vmem:[#allocation19 + $0x2a4] ss:$16 sps:$4 sm:$0xff]  }
 0x84a   :  { %6980 = vmatpush1.bf16.msra.mxu1 %v10925_v55  ;;  %7062 = vmatpush1.bf16.msra.mxu0 %v10928_v57  ;;  %v10984_v55 = vld [vmem:[#allocation19 + $0x2ac] ss:$16 sps:$4 sm:$0xff]   ;;  %v10979_v57 = vld [vmem:[#allocation19 + $0x2a0] ss:$16 sps:$4 sm:$0xff]  }
 0x84b   :  { %6981 = vmatprep.subr.bf16.mxu1 %v10933_v27  ;;  %7063 = vmatprep.subr.bf16.mxu0 %v10936_v59  ;;  %v10982_v27 = vld [vmem:[#allocation19 + $0x2a8] ss:$16 sps:$4 sm:$0xff]   ;;  %v10987_v59 = vld [vmem:[#allocation19 + $0x2c4] ss:$16 sps:$4 sm:$0xff]  }
 0x84e   :  { %6982 = vmatpush1.bf16.msra.mxu1 %v10931_v60  ;;  %7064 = vmatpush1.bf16.msra.mxu0 %v10934_v61  ;;  %v10990_v60 = vld [vmem:[#allocation19 + $0x2cc] ss:$16 sps:$4 sm:$0xff]   ;;  %v10985_v61 = vld [vmem:[#allocation19 + $0x2c0] ss:$16 sps:$4 sm:$0xff]  }
 0x84f   :  { %6983 = vmatprep.subr.bf16.mxu1 %v10939_v33  ;;  %7065 = vmatprep.subr.bf16.mxu0 %v10942_v62  ;;  %v10988_v33 = vld [vmem:[#allocation19 + $0x2c8] ss:$16 sps:$4 sm:$0xff]   ;;  %v10993_v62 = vld [vmem:[#allocation19 + $0x2e4] ss:$16 sps:$4 sm:$0xff]  }
 0x852   :  { %6984 = vmatpush1.bf16.msra.mxu1 %v10937_v63  ;;  %7066 = vmatpush1.bf16.msra.mxu0 %v10940_v0  ;;  %v10996_v63 = vld [vmem:[#allocation19 + $0x2ec] ss:$16 sps:$4 sm:$0xff]   ;;  %v10991_v0 = vld [vmem:[#allocation19 + $0x2e0] ss:$16 sps:$4 sm:$0xff]  }
 0x853   :  { %6985 = vmatprep.subr.bf16.mxu1 %v10945_v1  ;;  %7067 = vmatprep.subr.bf16.mxu0 %v10948_v2  ;;  %v10994_v1 = vld [vmem:[#allocation19 + $0x2e8] ss:$16 sps:$4 sm:$0xff]   ;;  %v10999_v2 = vld [vmem:[#allocation19 + $0x304] ss:$16 sps:$4 sm:$0xff]  }
 0x856   :  { %6986 = vmatpush1.bf16.msra.mxu1 %v10943_v14  ;;  %7068 = vmatpush1.bf16.msra.mxu0 %v10946_v26  ;;  %v11002_v14 = vld [vmem:[#allocation19 + $0x30c] ss:$16 sps:$4 sm:$0xff]   ;;  %v10997_v26 = vld [vmem:[#allocation19 + $0x300] ss:$16 sps:$4 sm:$0xff]  }
 0x857   :  { %6996 = vmatprep.subr.bf16.mxu1 %v10951_v48  ;;  %7078 = vmatprep.subr.bf16.mxu0 %v10954_v56  ;;  %v11000_v48 = vld [vmem:[#allocation19 + $0x308] ss:$16 sps:$4 sm:$0xff]   ;;  %v11005_v56 = vld [vmem:[#allocation19 + $0x324] ss:$16 sps:$4 sm:$0xff]  }
 0x8ec   :  { %v6068_v32 = vpop.f32.mrb[16].mxu1  ;;  %v12110_v58 = vpop.f32.mrb[20].mxu0 }
 0x8ed   :  { %v9574_v47 = vadd.f32 %v6068_v32, %v5336_v5  ;;  %v6070_v6 = vpop.f32.mrb[17].mxu1  ;;  %v6152_v9 = vpop.f32.mrb[21].mxu0  ;;  %v11008_v5 = vld [vmem:[#allocation19 + $0x32c] ss:$16 sps:$4 sm:$0xff]   ;;  %v11011_v32 = vld [vmem:[#allocation19 + $0x344] ss:$16 sps:$4 sm:$0xff]  }
 0x8ee   :  { %v9575_v25 = vadd.f32 %v6070_v6, %v5340_v3  ;;  %v9577_v12 = vadd.f32 %v6152_v9, %v5348_v20  ;;  %v6072_v24 = vpop.f32.mrb[18].mxu1  ;;  %v6154_v15 = vpop.f32.mrb[22].mxu0  ;;  %v11003_v3 = vld [vmem:[#allocation19 + $0x320] ss:$16 sps:$4 sm:$0xff]   ;;  %v11006_v20 = vld [vmem:[#allocation19 + $0x328] ss:$16 sps:$4 sm:$0xff]  }
 0x8ef   :  { %v6157_v16 = vmax.f32 %v9574_v47, 0.0  ;;  %v6073_v17 = vpop.f32.mrb[19].mxu1  ;;  %v6155_v18 = vpop.f32.mrb[23].mxu0  ;;  %v11014_v47 = vld [vmem:[#allocation19 + $0x34c] ss:$16 sps:$4 sm:$0xff]  }
 0x8f0   :  { %v6158_v19 = vmax.f32 %v9575_v25, 0.0  ;;  %v6160_v21 = vmax.f32 %v9577_v12, 0.0  ;;  %v11009_v6 = vld [vmem:[#allocation19 + $0x340] ss:$16 sps:$4 sm:$0xff]   ;;  %v11012_v9 = vld [vmem:[#allocation19 + $0x348] ss:$16 sps:$4 sm:$0xff]  }
 0x8f1   :  { %v6161_v30 = vpack.c.bf16 %v6157_v16, %v6157_v16  ;;  %v11017_v25 = vld [vmem:[#allocation19 + $0x364] ss:$16 sps:$4 sm:$0xff]   ;;  %v11020_v12 = vld [vmem:[#allocation19 + $0x36c] ss:$16 sps:$4 sm:$0xff]   ;;  %v11015_v24 = vld [vmem:[#allocation19 + $0x360] ss:$16 sps:$4 sm:$0xff]  }
 0x8f2   :  { %v6162_v22 = vpack.c.bf16 %v6158_v19, %v6158_v19  ;;  %v6164_v35 = vpack.c.bf16 %v6160_v21, %v6160_v21  ;;  %v11018_v15 = vld [vmem:[#allocation19 + $0x368] ss:$16 sps:$4 sm:$0xff]   ;;  %v11023_v16 = vld [vmem:[#allocation19 + $0x384] ss:$16 sps:$4 sm:$0xff]   ;;  %v11026_v17 = vld [vmem:[#allocation19 + $0x38c] ss:$16 sps:$4 sm:$0xff]  }
 0x8f3   :  { %v11021_v18 = vld [vmem:[#allocation19 + $0x380] ss:$16 sps:$4 sm:$0xff]   ;;  %v11024_v19 = vld [vmem:[#allocation19 + $0x388] ss:$16 sps:$4 sm:$0xff]   ;;  %v11029_v21 = vld [vmem:[#allocation19 + $0x3a4] ss:$16 sps:$4 sm:$0xff]  }
 0x8f4   :  { %6987 = vmatprep.mubr.bf16.mxu1 %v6162_v22  ;;  %7069 = vmatprep.mubr.bf16.mxu0 %v6162_v22  ;;  %v11032_v22 = vld [vmem:[#allocation19 + $0x3ac] ss:$16 sps:$4 sm:$0xff]  }
 0x8f5   :  { %6988 = vmatmul.mubr.bf16.vlgmr.msra.gmra.mrb[20].mxu1 %v6161_v30  ;;  %7070 = vmatmul.mubr.bf16.vlgmr.msra.gmra.mrb[24].mxu0 %v6161_v30  ;;  %v5344_v30 = vrot.slane %v12102_v4, %v11983_v43  ;;  %v11047_v4 = vld [vmem:[#allocation20 + $0x4] ss:$16 sps:$4 sm:$0xff]  }
 0x8f6   :  { %6997 = vmatpush1.bf16.msra.mxu1 %v10949_v23  ;;  %7079 = vmatpush1.bf16.msra.mxu0 %v10952_v29  ;;  %v11027_v23 = vld [vmem:[#allocation19 + $0x3a0] ss:$16 sps:$4 sm:$0xff]   ;;  %v11030_v29 = vld [vmem:[#allocation19 + $0x3a8] ss:$16 sps:$4 sm:$0xff]  }
 0x8f7   :  { %7028 = vmatprep.mubr.bf16.mxu1 %v6164_v35  ;;  %7110 = vmatprep.mubr.bf16.mxu0 %v6164_v35  ;;  %v11033_v35 = vld [vmem:[#allocation19 + $0x3c0] ss:$16 sps:$4 sm:$0xff]  }
 0x8f8   :  { %6998 = vmatprep.subr.bf16.mxu1 %v10957_v31  ;;  %7080 = vmatprep.subr.bf16.mxu0 %v10960_v34  ;;  %v11035_v31 = vld [vmem:[#allocation19 + $0x3c4] ss:$16 sps:$4 sm:$0xff]   ;;  %v11038_v34 = vld [vmem:[#allocation19 + $0x3cc] ss:$16 sps:$4 sm:$0xff]  }
 0x8fa   :  { %6999 = vmatpush1.bf16.msra.mxu1 %v10955_v36  ;;  %7081 = vmatpush1.bf16.msra.mxu0 %v10958_v37  ;;  %v11036_v36 = vld [vmem:[#allocation19 + $0x3c8] ss:$16 sps:$4 sm:$0xff]   ;;  %v9576_v37 = vadd.f32 %v12110_v58, %v5344_v30  ;;  %v11053_v58 = vld [vmem:[#allocation20 + $0x24] ss:$16 sps:$4 sm:$0xff]   ;;  %v11116_v30 = vld [vmem:[#allocation20 + $0x16c] ss:$16 sps:$4 sm:$0xff]  }
 0x8fb   :  { %7000 = vmatprep.subr.bf16.mxu1 %v10963_v38  ;;  %7082 = vmatprep.subr.bf16.mxu0 %v10966_v39  ;;  %v11041_v38 = vld [vmem:[#allocation19 + $0x3e4] ss:$16 sps:$4 sm:$0xff]   ;;  %v11044_v39 = vld [vmem:[#allocation19 + $0x3ec] ss:$16 sps:$4 sm:$0xff]  }
 0x8fe   :  { %7001 = vmatpush1.bf16.msra.mxu1 %v10961_v40  ;;  %7083 = vmatpush1.bf16.msra.mxu0 %v10964_v41  ;;  %v11039_v40 = vld [vmem:[#allocation19 + $0x3e0] ss:$16 sps:$4 sm:$0xff]   ;;  %v11042_v41 = vld [vmem:[#allocation19 + $0x3e8] ss:$16 sps:$4 sm:$0xff]  }
 0x8ff   :  { %7002 = vmatprep.subr.bf16.mxu1 %v10969_v42  ;;  %7084 = vmatprep.subr.bf16.mxu0 %v10972_v44  ;;  %v6159_v42 = vmax.f32 %v9576_v37, 0.0  ;;  %v11050_v44 = vld [vmem:[#allocation20 + $0xc] ss:$16 sps:$4 sm:$0xff]   ;;  %v11117_v37 = vld [vmem:[#allocation20 + $0x180] ss:$16 sps:$4 sm:$0xff]  }
 0x902   :  { %7003 = vmatpush1.bf16.msra.mxu1 %v10967_v45  ;;  %7085 = vmatpush1.bf16.msra.mxu0 %v10970_v46  ;;  %v11045_v45 = vld [vmem:[#allocation20] ss:$16 sps:$4 sm:$0xff]   ;;  %v6163_v46 = vpack.c.bf16 %v6159_v42, %v6159_v42  ;;  %v11126_v42 = vld [vmem:[#allocation20 + $0x1a8] ss:$16 sps:$4 sm:$0xff]  }
 0x903   :  { %7004 = vmatprep.subr.bf16.mxu1 %v10975_v7  ;;  %7086 = vmatprep.subr.bf16.mxu0 %v10978_v49  ;;  %v11048_v7 = vld [vmem:[#allocation20 + $0x8] ss:$16 sps:$4 sm:$0xff]   ;;  %v11056_v49 = vld [vmem:[#allocation20 + $0x2c] ss:$16 sps:$4 sm:$0xff]  }
 0x906   :  { %7005 = vmatpush1.bf16.msra.mxu1 %v10973_v51  ;;  %7087 = vmatpush1.bf16.msra.mxu0 %v10976_v8  ;;  %v11051_v51 = vld [vmem:[#allocation20 + $0x20] ss:$16 sps:$4 sm:$0xff]   ;;  %v11054_v8 = vld [vmem:[#allocation20 + $0x28] ss:$16 sps:$4 sm:$0xff]  }
 0x907   :  { %7006 = vmatprep.subr.bf16.mxu1 %v10981_v54  ;;  %7088 = vmatprep.subr.bf16.mxu0 %v10984_v55  ;;  %v11059_v54 = vld [vmem:[#allocation20 + $0x44] ss:$16 sps:$4 sm:$0xff]   ;;  %v11062_v55 = vld [vmem:[#allocation20 + $0x4c] ss:$16 sps:$4 sm:$0xff]  }
 0x90a   :  { %7007 = vmatpush1.bf16.msra.mxu1 %v10979_v57  ;;  %7089 = vmatpush1.bf16.msra.mxu0 %v10982_v27  ;;  %v11057_v57 = vld [vmem:[#allocation20 + $0x40] ss:$16 sps:$4 sm:$0xff]   ;;  %v11060_v27 = vld [vmem:[#allocation20 + $0x48] ss:$16 sps:$4 sm:$0xff]  }
 0x90b   :  { %7008 = vmatprep.subr.bf16.mxu1 %v10987_v59  ;;  %7090 = vmatprep.subr.bf16.mxu0 %v10990_v60  ;;  %v11065_v59 = vld [vmem:[#allocation20 + $0x64] ss:$16 sps:$4 sm:$0xff]   ;;  %v11068_v60 = vld [vmem:[#allocation20 + $0x6c] ss:$16 sps:$4 sm:$0xff]  }
 0x90e   :  { %7009 = vmatpush1.bf16.msra.mxu1 %v10985_v61  ;;  %7091 = vmatpush1.bf16.msra.mxu0 %v10988_v33  ;;  %v11063_v61 = vld [vmem:[#allocation20 + $0x60] ss:$16 sps:$4 sm:$0xff]   ;;  %v11066_v33 = vld [vmem:[#allocation20 + $0x68] ss:$16 sps:$4 sm:$0xff]  }
 0x90f   :  { %7010 = vmatprep.subr.bf16.mxu1 %v10993_v62  ;;  %7092 = vmatprep.subr.bf16.mxu0 %v10996_v63  ;;  %v11071_v62 = vld [vmem:[#allocation20 + $0x84] ss:$16 sps:$4 sm:$0xff]   ;;  %v11069_v63 = vld [vmem:[#allocation20 + $0x80] ss:$16 sps:$4 sm:$0xff]  }
 0x912   :  { %7011 = vmatpush1.bf16.msra.mxu1 %v10991_v0  ;;  %7093 = vmatpush1.bf16.msra.mxu0 %v10994_v1  ;;  %v11072_v0 = vld [vmem:[#allocation20 + $0x88] ss:$16 sps:$4 sm:$0xff]   ;;  %v11077_v1 = vld [vmem:[#allocation20 + $0xa4] ss:$16 sps:$4 sm:$0xff]  }
 0x913   :  { %7012 = vmatprep.subr.bf16.mxu1 %v10999_v2  ;;  %7094 = vmatprep.subr.bf16.mxu0 %v11002_v14  ;;  %v11080_v2 = vld [vmem:[#allocation20 + $0xac] ss:$16 sps:$4 sm:$0xff]   ;;  %v11075_v14 = vld [vmem:[#allocation20 + $0xa0] ss:$16 sps:$4 sm:$0xff]  }
 0x916   :  { %7013 = vmatpush1.bf16.msra.mxu1 %v10997_v26  ;;  %7095 = vmatpush1.bf16.msra.mxu0 %v11000_v48  ;;  %v11078_v26 = vld [vmem:[#allocation20 + $0xa8] ss:$16 sps:$4 sm:$0xff]   ;;  %v11083_v48 = vld [vmem:[#allocation20 + $0xc4] ss:$16 sps:$4 sm:$0xff]  }
 0x917   :  { %7014 = vmatprep.subr.bf16.mxu1 %v11005_v56  ;;  %7096 = vmatprep.subr.bf16.mxu0 %v11008_v5  ;;  %v11086_v56 = vld [vmem:[#allocation20 + $0xcc] ss:$16 sps:$4 sm:$0xff]   ;;  %v11081_v5 = vld [vmem:[#allocation20 + $0xc0] ss:$16 sps:$4 sm:$0xff]  }
 0x91a   :  { %7015 = vmatpush1.bf16.msra.mxu1 %v11003_v3  ;;  %7097 = vmatpush1.bf16.msra.mxu0 %v11006_v20  ;;  %v11084_v3 = vld [vmem:[#allocation20 + $0xc8] ss:$16 sps:$4 sm:$0xff]   ;;  %v11089_v20 = vld [vmem:[#allocation20 + $0xe4] ss:$16 sps:$4 sm:$0xff]  }
 0x91b   :  { %7016 = vmatprep.subr.bf16.mxu1 %v11011_v32  ;;  %7098 = vmatprep.subr.bf16.mxu0 %v11014_v47  ;;  %v11092_v32 = vld [vmem:[#allocation20 + $0xec] ss:$16 sps:$4 sm:$0xff]   ;;  %v11087_v47 = vld [vmem:[#allocation20 + $0xe0] ss:$16 sps:$4 sm:$0xff]  }
 0x91e   :  { %7017 = vmatpush1.bf16.msra.mxu1 %v11009_v6  ;;  %7099 = vmatpush1.bf16.msra.mxu0 %v11012_v9  ;;  %v11090_v6 = vld [vmem:[#allocation20 + $0xe8] ss:$16 sps:$4 sm:$0xff]   ;;  %v11095_v9 = vld [vmem:[#allocation20 + $0x104] ss:$16 sps:$4 sm:$0xff]  }
 0x91f   :  { %7018 = vmatprep.subr.bf16.mxu1 %v11017_v25  ;;  %7100 = vmatprep.subr.bf16.mxu0 %v11020_v12  ;;  %v11098_v25 = vld [vmem:[#allocation20 + $0x10c] ss:$16 sps:$4 sm:$0xff]   ;;  %v11093_v12 = vld [vmem:[#allocation20 + $0x100] ss:$16 sps:$4 sm:$0xff]  }
 0x922   :  { %7019 = vmatpush1.bf16.msra.mxu1 %v11015_v24  ;;  %7101 = vmatpush1.bf16.msra.mxu0 %v11018_v15  ;;  %v11096_v24 = vld [vmem:[#allocation20 + $0x108] ss:$16 sps:$4 sm:$0xff]   ;;  %v11101_v15 = vld [vmem:[#allocation20 + $0x124] ss:$16 sps:$4 sm:$0xff]  }
 0x923   :  { %7020 = vmatprep.subr.bf16.mxu1 %v11023_v16  ;;  %7102 = vmatprep.subr.bf16.mxu0 %v11026_v17  ;;  %v11104_v16 = vld [vmem:[#allocation20 + $0x12c] ss:$16 sps:$4 sm:$0xff]   ;;  %v11099_v17 = vld [vmem:[#allocation20 + $0x120] ss:$16 sps:$4 sm:$0xff]  }
 0x926   :  { %7021 = vmatpush1.bf16.msra.mxu1 %v11021_v18  ;;  %7103 = vmatpush1.bf16.msra.mxu0 %v11024_v19  ;;  %v11102_v18 = vld [vmem:[#allocation20 + $0x128] ss:$16 sps:$4 sm:$0xff]   ;;  %v11107_v19 = vld [vmem:[#allocation20 + $0x144] ss:$16 sps:$4 sm:$0xff]  }
 0x927   :  { %7022 = vmatprep.subr.bf16.mxu1 %v11029_v21  ;;  %7104 = vmatprep.subr.bf16.mxu0 %v11032_v22  ;;  %v11110_v21 = vld [vmem:[#allocation20 + $0x14c] ss:$16 sps:$4 sm:$0xff]   ;;  %v11105_v22 = vld [vmem:[#allocation20 + $0x140] ss:$16 sps:$4 sm:$0xff]  }
 0x92a   :  { %7023 = vmatpush1.bf16.msra.mxu1 %v11027_v23  ;;  %7105 = vmatpush1.bf16.msra.mxu0 %v11030_v29  ;;  %v11108_v23 = vld [vmem:[#allocation20 + $0x148] ss:$16 sps:$4 sm:$0xff]   ;;  %v11113_v29 = vld [vmem:[#allocation20 + $0x164] ss:$16 sps:$4 sm:$0xff]  }
 0x92b   :  { %7024 = vmatprep.subr.bf16.mxu1 %v11035_v31  ;;  %7106 = vmatprep.subr.bf16.mxu0 %v11038_v34  ;;  %v11111_v31 = vld [vmem:[#allocation20 + $0x160] ss:$16 sps:$4 sm:$0xff]   ;;  %v11114_v34 = vld [vmem:[#allocation20 + $0x168] ss:$16 sps:$4 sm:$0xff]  }
 0x92e   :  { %7025 = vmatpush1.bf16.msra.mxu1 %v11033_v35  ;;  %7107 = vmatpush1.bf16.msra.mxu0 %v11036_v36  ;;  %v11119_v35 = vld [vmem:[#allocation20 + $0x184] ss:$16 sps:$4 sm:$0xff]   ;;  %v11122_v36 = vld [vmem:[#allocation20 + $0x18c] ss:$16 sps:$4 sm:$0xff]  }
 0x92f   :  { %7026 = vmatprep.subr.bf16.mxu1 %v11041_v38  ;;  %7108 = vmatprep.subr.bf16.mxu0 %v11044_v39  ;;  %v11120_v38 = vld [vmem:[#allocation20 + $0x188] ss:$16 sps:$4 sm:$0xff]   ;;  %v11125_v39 = vld [vmem:[#allocation20 + $0x1a4] ss:$16 sps:$4 sm:$0xff]  }
 0x932   :  { %7027 = vmatpush1.bf16.msra.mxu1 %v11039_v40  ;;  %7109 = vmatpush1.bf16.msra.mxu0 %v11042_v41  ;;  %v11128_v40 = vld [vmem:[#allocation20 + $0x1ac] ss:$16 sps:$4 sm:$0xff]   ;;  %v11123_v41 = vld [vmem:[#allocation20 + $0x1a0] ss:$16 sps:$4 sm:$0xff]  }
 0x933   :  { %7909 = vmatprep.subr.bf16.mxu1 %v11047_v4  ;;  %7991 = vmatprep.subr.bf16.mxu0 %v11050_v44  ;;  %v11131_v4 = vld [vmem:[#allocation20 + $0x1c4] ss:$16 sps:$4 sm:$0xff]   ;;  %v11134_v44 = vld [vmem:[#allocation20 + $0x1cc] ss:$16 sps:$4 sm:$0xff]  }
 0x935   :  { %7029 = vmatmul.mubr.bf16.vlgmr.msra.gmra.mrb[20].mxu1 %v6163_v46  ;;  %7111 = vmatmul.mubr.bf16.vlgmr.msra.gmra.mrb[24].mxu0 %v6163_v46  ;;  %v11132_v46 = vld [vmem:[#allocation20 + $0x1c8] ss:$16 sps:$4 sm:$0xff]  }
 0x936   :  { %7910 = vmatpush1.bf16.msra.mxu1 %v11045_v45  ;;  %7941 = vmatprep.mubr.bf16.mxu1 %v12080_v50  ;;  %v11129_v45 = vld [vmem:[#allocation20 + $0x1c0] ss:$16 sps:$4 sm:$0xff]  }
 0x937   :  { %7992 = vmatpush1.bf16.msra.mxu0 %v11048_v7  ;;  %8023 = vmatprep.mubr.bf16.mxu0 %v12080_v50  ;;  %v11074_v50 = vld [vmem:[#allocation20 + $0x8c] ss:$16 sps:$4 sm:$0xff]   ;;  %v11137_v7 = vld [vmem:[#allocation20 + $0x1e4] ss:$16 sps:$4 sm:$0xff]  }
 0x938   :  { %7911 = vmatprep.subr.bf16.mxu1 %v11053_v58  ;;  %7993 = vmatprep.subr.bf16.mxu0 %v11056_v49  ;;  %v11140_v58 = vld [vmem:[#allocation20 + $0x1ec] ss:$16 sps:$4 sm:$0xff]   ;;  %v11135_v49 = vld [vmem:[#allocation20 + $0x1e0] ss:$16 sps:$4 sm:$0xff]  }
 0x93a   :  { %7912 = vmatpush1.bf16.msra.mxu1 %v11051_v51  ;;  %v11138_v51 = vld [vmem:[#allocation20 + $0x1e8] ss:$16 sps:$4 sm:$0xff]  }
 0x93b   :  { %7994 = vmatpush1.bf16.msra.mxu0 %v11054_v8  ;;  %7913 = vmatprep.subr.bf16.mxu1 %v11059_v54  ;;  %v11143_v8 = vld [vmem:[#allocation20 + $0x204] ss:$16 sps:$4 sm:$0xff]   ;;  %v11146_v54 = vld [vmem:[#allocation20 + $0x20c] ss:$16 sps:$4 sm:$0xff]  }
 0x93c   :  { %7995 = vmatprep.subr.bf16.mxu0 %v11062_v55  ;;  %v11141_v55 = vld [vmem:[#allocation20 + $0x200] ss:$16 sps:$4 sm:$0xff]  }
 0x93e   :  { %7914 = vmatpush1.bf16.msra.mxu1 %v11057_v57  ;;  %v11144_v57 = vld [vmem:[#allocation20 + $0x208] ss:$16 sps:$4 sm:$0xff]  }
 0x93f   :  { %7996 = vmatpush1.bf16.msra.mxu0 %v11060_v27  ;;  %7915 = vmatprep.subr.bf16.mxu1 %v11065_v59  ;;  %v11149_v27 = vld [vmem:[#allocation20 + $0x224] ss:$16 sps:$4 sm:$0xff]   ;;  %v11152_v59 = vld [vmem:[#allocation20 + $0x22c] ss:$16 sps:$4 sm:$0xff]  }
 0x940   :  { %7997 = vmatprep.subr.bf16.mxu0 %v11068_v60  ;;  %v11147_v60 = vld [vmem:[#allocation20 + $0x220] ss:$16 sps:$4 sm:$0xff]  }
 0x942   :  { %7916 = vmatpush1.bf16.msra.mxu1 %v11063_v61  ;;  %v11150_v61 = vld [vmem:[#allocation20 + $0x228] ss:$16 sps:$4 sm:$0xff]  }
 0x943   :  { %7998 = vmatpush1.bf16.msra.mxu0 %v11066_v33  ;;  %7917 = vmatprep.subr.bf16.mxu1 %v11071_v62  ;;  %v11155_v33 = vld [vmem:[#allocation20 + $0x244] ss:$16 sps:$4 sm:$0xff]   ;;  %v11158_v62 = vld [vmem:[#allocation20 + $0x24c] ss:$16 sps:$4 sm:$0xff]  }
 0x944   :  { %7999 = vmatprep.subr.bf16.mxu0 %v11074_v50  ;;  %v11153_v50 = vld [vmem:[#allocation20 + $0x240] ss:$16 sps:$4 sm:$0xff]  }
 0x946   :  { %7918 = vmatpush1.bf16.msra.mxu1 %v11069_v63  ;;  %v11156_v63 = vld [vmem:[#allocation20 + $0x248] ss:$16 sps:$4 sm:$0xff]  }
 0x947   :  { %8000 = vmatpush1.bf16.msra.mxu0 %v11072_v0  ;;  %7919 = vmatprep.subr.bf16.mxu1 %v11077_v1  ;;  %v11161_v0 = vld [vmem:[#allocation20 + $0x264] ss:$16 sps:$4 sm:$0xff]   ;;  %v11159_v1 = vld [vmem:[#allocation20 + $0x260] ss:$16 sps:$4 sm:$0xff]  }
 0x948   :  { %8001 = vmatprep.subr.bf16.mxu0 %v11080_v2  ;;  %v11162_v2 = vld [vmem:[#allocation20 + $0x268] ss:$16 sps:$4 sm:$0xff]  }
 0x94a   :  { %7920 = vmatpush1.bf16.msra.mxu1 %v11075_v14  ;;  %v11167_v14 = vld [vmem:[#allocation20 + $0x284] ss:$16 sps:$4 sm:$0xff]  }
 0x94b   :  { %8002 = vmatpush1.bf16.msra.mxu0 %v11078_v26  ;;  %7921 = vmatprep.subr.bf16.mxu1 %v11083_v48  ;;  %v11170_v26 = vld [vmem:[#allocation20 + $0x28c] ss:$16 sps:$4 sm:$0xff]   ;;  %v11168_v48 = vld [vmem:[#allocation20 + $0x288] ss:$16 sps:$4 sm:$0xff]  }
 0x94c   :  { %8003 = vmatprep.subr.bf16.mxu0 %v11086_v56  ;;  %v11173_v56 = vld [vmem:[#allocation20 + $0x2a4] ss:$16 sps:$4 sm:$0xff]  }
 0x94e   :  { %7922 = vmatpush1.bf16.msra.mxu1 %v11081_v5  ;;  %v11176_v5 = vld [vmem:[#allocation20 + $0x2ac] ss:$16 sps:$4 sm:$0xff]  }
 0x94f   :  { %8004 = vmatpush1.bf16.msra.mxu0 %v11084_v3  ;;  %7923 = vmatprep.subr.bf16.mxu1 %v11089_v20  ;;  %v11171_v3 = vld [vmem:[#allocation20 + $0x2a0] ss:$16 sps:$4 sm:$0xff]   ;;  %v11174_v20 = vld [vmem:[#allocation20 + $0x2a8] ss:$16 sps:$4 sm:$0xff]  }
 0x950   :  { %8005 = vmatprep.subr.bf16.mxu0 %v11092_v32  ;;  %v11179_v32 = vld [vmem:[#allocation20 + $0x2c4] ss:$16 sps:$4 sm:$0xff]  }
 0x952   :  { %7924 = vmatpush1.bf16.msra.mxu1 %v11087_v47  ;;  %v11182_v47 = vld [vmem:[#allocation20 + $0x2cc] ss:$16 sps:$4 sm:$0xff]  }
 0x953   :  { %8006 = vmatpush1.bf16.msra.mxu0 %v11090_v6  ;;  %7925 = vmatprep.subr.bf16.mxu1 %v11095_v9  ;;  %v11177_v6 = vld [vmem:[#allocation20 + $0x2c0] ss:$16 sps:$4 sm:$0xff]   ;;  %v11180_v9 = vld [vmem:[#allocation20 + $0x2c8] ss:$16 sps:$4 sm:$0xff]  }
 0x954   :  { %8007 = vmatprep.subr.bf16.mxu0 %v11098_v25  ;;  %v11185_v25 = vld [vmem:[#allocation20 + $0x2e4] ss:$16 sps:$4 sm:$0xff]  }
 0x956   :  { %7926 = vmatpush1.bf16.msra.mxu1 %v11093_v12  ;;  %v11188_v12 = vld [vmem:[#allocation20 + $0x2ec] ss:$16 sps:$4 sm:$0xff]  }
 0x957   :  { %8008 = vmatpush1.bf16.msra.mxu0 %v11096_v24  ;;  %7927 = vmatprep.subr.bf16.mxu1 %v11101_v15  ;;  %v11183_v24 = vld [vmem:[#allocation20 + $0x2e0] ss:$16 sps:$4 sm:$0xff]   ;;  %v11186_v15 = vld [vmem:[#allocation20 + $0x2e8] ss:$16 sps:$4 sm:$0xff]  }
 0x958   :  { %8009 = vmatprep.subr.bf16.mxu0 %v11104_v16  ;;  %v11191_v16 = vld [vmem:[#allocation20 + $0x304] ss:$16 sps:$4 sm:$0xff]  }
 0x95a   :  { %7928 = vmatpush1.bf16.msra.mxu1 %v11099_v17  ;;  %v11194_v17 = vld [vmem:[#allocation20 + $0x30c] ss:$16 sps:$4 sm:$0xff]  }
 0x95b   :  { %8010 = vmatpush1.bf16.msra.mxu0 %v11102_v18  ;;  %7929 = vmatprep.subr.bf16.mxu1 %v11107_v19  ;;  %v11189_v18 = vld [vmem:[#allocation20 + $0x300] ss:$16 sps:$4 sm:$0xff]   ;;  %v11192_v19 = vld [vmem:[#allocation20 + $0x308] ss:$16 sps:$4 sm:$0xff]  }
 0x95c   :  { %8011 = vmatprep.subr.bf16.mxu0 %v11110_v21  ;;  %v11197_v21 = vld [vmem:[#allocation20 + $0x324] ss:$16 sps:$4 sm:$0xff]  }
 0x95e   :  { %7930 = vmatpush1.bf16.msra.mxu1 %v11105_v22  ;;  %v11200_v22 = vld [vmem:[#allocation20 + $0x32c] ss:$16 sps:$4 sm:$0xff]  }
 0x95f   :  { %8012 = vmatpush1.bf16.msra.mxu0 %v11108_v23  ;;  %7931 = vmatprep.subr.bf16.mxu1 %v11113_v29  ;;  %v11195_v23 = vld [vmem:[#allocation20 + $0x320] ss:$16 sps:$4 sm:$0xff]   ;;  %v11198_v29 = vld [vmem:[#allocation20 + $0x328] ss:$16 sps:$4 sm:$0xff]  }
 0x960   :  { %8013 = vmatprep.subr.bf16.mxu0 %v11116_v30  ;;  %v11203_v30 = vld [vmem:[#allocation20 + $0x344] ss:$16 sps:$4 sm:$0xff]  }
 0x962   :  { %7932 = vmatpush1.bf16.msra.mxu1 %v11111_v31  ;;  %v11206_v31 = vld [vmem:[#allocation20 + $0x34c] ss:$16 sps:$4 sm:$0xff]  }
 0x963   :  { %8014 = vmatpush1.bf16.msra.mxu0 %v11114_v34  ;;  %7933 = vmatprep.subr.bf16.mxu1 %v11119_v35  ;;  %v11201_v34 = vld [vmem:[#allocation20 + $0x340] ss:$16 sps:$4 sm:$0xff]   ;;  %v11204_v35 = vld [vmem:[#allocation20 + $0x348] ss:$16 sps:$4 sm:$0xff]  }
 0x964   :  { %8015 = vmatprep.subr.bf16.mxu0 %v11122_v36  ;;  %v11209_v36 = vld [vmem:[#allocation20 + $0x364] ss:$16 sps:$4 sm:$0xff]  }
 0x966   :  { %7934 = vmatpush1.bf16.msra.mxu1 %v11117_v37  ;;  %v11212_v37 = vld [vmem:[#allocation20 + $0x36c] ss:$16 sps:$4 sm:$0xff]  }
 0x967   :  { %8016 = vmatpush1.bf16.msra.mxu0 %v11120_v38  ;;  %7935 = vmatprep.subr.bf16.mxu1 %v11125_v39  ;;  %v11207_v38 = vld [vmem:[#allocation20 + $0x360] ss:$16 sps:$4 sm:$0xff]   ;;  %v11210_v39 = vld [vmem:[#allocation20 + $0x368] ss:$16 sps:$4 sm:$0xff]  }
 0x968   :  { %8017 = vmatprep.subr.bf16.mxu0 %v11128_v40  ;;  %v11215_v40 = vld [vmem:[#allocation20 + $0x384] ss:$16 sps:$4 sm:$0xff]  }
 0x96a   :  { %7936 = vmatpush1.bf16.msra.mxu1 %v11123_v41  ;;  %v11218_v41 = vld [vmem:[#allocation20 + $0x38c] ss:$16 sps:$4 sm:$0xff]  }
 0x96b   :  { %8018 = vmatpush1.bf16.msra.mxu0 %v11126_v42  ;;  %7937 = vmatprep.subr.bf16.mxu1 %v11131_v4  ;;  %v11213_v42 = vld [vmem:[#allocation20 + $0x380] ss:$16 sps:$4 sm:$0xff]   ;;  %v11216_v4 = vld [vmem:[#allocation20 + $0x388] ss:$16 sps:$4 sm:$0xff]  }
 0x96c   :  { %8019 = vmatprep.subr.bf16.mxu0 %v11134_v44  ;;  %v11221_v44 = vld [vmem:[#allocation20 + $0x3a4] ss:$16 sps:$4 sm:$0xff]  }
 0x96e   :  { %7938 = vmatpush1.bf16.msra.mxu1 %v11129_v45  ;;  %v11224_v45 = vld [vmem:[#allocation20 + $0x3ac] ss:$16 sps:$4 sm:$0xff]  }
 0x96f   :  { %8020 = vmatpush1.bf16.msra.mxu0 %v11132_v46  ;;  %7939 = vmatprep.subr.bf16.mxu1 %v11137_v7  ;;  %v11219_v46 = vld [vmem:[#allocation20 + $0x3a0] ss:$16 sps:$4 sm:$0xff]   ;;  %v11222_v7 = vld [vmem:[#allocation20 + $0x3a8] ss:$16 sps:$4 sm:$0xff]  }
 0x970   :  { %8021 = vmatprep.subr.bf16.mxu0 %v11140_v58  ;;  %v11227_v58 = vld [vmem:[#allocation20 + $0x3c4] ss:$16 sps:$4 sm:$0xff]  }
 0x972   :  { %7940 = vmatpush1.bf16.msra.mxu1 %v11135_v49  ;;  %v11230_v49 = vld [vmem:[#allocation20 + $0x3cc] ss:$16 sps:$4 sm:$0xff]  }
 0x973   :  { %8022 = vmatpush1.bf16.msra.mxu0 %v11138_v51  ;;  %7950 = vmatprep.subr.bf16.mxu1 %v11143_v8  ;;  %v11225_v51 = vld [vmem:[#allocation20 + $0x3c0] ss:$16 sps:$4 sm:$0xff]   ;;  %v11228_v8 = vld [vmem:[#allocation20 + $0x3c8] ss:$16 sps:$4 sm:$0xff]  }
 0x974   :  { %8032 = vmatprep.subr.bf16.mxu0 %v11146_v54  ;;  %v11233_v54 = vld [vmem:[#allocation20 + $0x3e4] ss:$16 sps:$4 sm:$0xff]  }
 0x975   :  { %7942 = vmatmul.mubr.bf16.vlgmr.msra.gmra.mrb[20].mxu1 %v12082_v13 }
 0x976   :  { %8024 = vmatmul.mubr.bf16.vlgmr.msra.gmra.mrb[24].mxu0 %v12082_v13  ;;  %7951 = vmatpush1.bf16.msra.mxu1 %v11141_v55  ;;  %v11164_v13 = vld [vmem:[#allocation20 + $0x26c] ss:$16 sps:$4 sm:$0xff]  }
 0x977   :  { %7982 = vmatprep.mubr.bf16.mxu1 %v12084_v52  ;;  %8033 = vmatpush1.bf16.msra.mxu0 %v11144_v57  ;;  %v11236_v55 = vld [vmem:[#allocation20 + $0x3ec] ss:$16 sps:$4 sm:$0xff]   ;;  %v11231_v57 = vld [vmem:[#allocation20 + $0x3e0] ss:$16 sps:$4 sm:$0xff]  }
 0x978   :  { %8064 = vmatprep.mubr.bf16.mxu0 %v12084_v52  ;;  %7952 = vmatprep.subr.bf16.mxu1 %v11149_v27  ;;  %v11165_v52 = vld [vmem:[#allocation20 + $0x280] ss:$16 sps:$4 sm:$0xff]   ;;  %v11234_v27 = vld [vmem:[#allocation20 + $0x3e8] ss:$16 sps:$4 sm:$0xff]  }
 0x979   :  { %8034 = vmatprep.subr.bf16.mxu0 %v11152_v59  ;;  %v11237_v59 = vld [vmem:[#allocation22 + $0x40] sm:$0xff]  }
 0x97a   :  { %7953 = vmatpush1.bf16.msra.mxu1 %v11147_v60  ;;  %v11238_v60 = vld [vmem:[#allocation22 + $0xc0] sm:$0xff]  }
 0x97b   :  { %8035 = vmatpush1.bf16.msra.mxu0 %v11150_v61  ;;  %7954 = vmatprep.subr.bf16.mxu1 %v11155_v33  ;;  %v11239_v61 = vld [vmem:[#allocation22] sm:$0xff]  }
 0x97c   :  { %8036 = vmatprep.subr.bf16.mxu0 %v11158_v62  ;;  %v11240_v33 = vld [vmem:[#allocation22 + $0x80] sm:$0xff]   ;;  %v11241_v62 = vld [vmem:[#allocation22 + $0x48] sm:$0xff]  }
 0x97e   :  { %7955 = vmatpush1.bf16.msra.mxu1 %v11153_v50  ;;  %v11242_v50 = vld [vmem:[#allocation22 + $0xc8] sm:$0xff]  }
 0x97f   :  { %8037 = vmatpush1.bf16.msra.mxu0 %v11156_v63  ;;  %7956 = vmatprep.subr.bf16.mxu1 %v11161_v0  ;;  %v11243_v63 = vld [vmem:[#allocation22 + $0x8] sm:$0xff]  }
 0x980   :  { %8038 = vmatprep.subr.bf16.mxu0 %v11164_v13  ;;  %v11244_v0 = vld [vmem:[#allocation22 + $0x88] sm:$0xff]   ;;  %v11245_v13 = vld [vmem:[#allocation22 + $0x50] sm:$0xff]  }
 0x982   :  { %7957 = vmatpush1.bf16.msra.mxu1 %v11159_v1  ;;  %v11246_v1 = vld [vmem:[#allocation22 + $0xd0] sm:$0xff]  }
 0x983   :  { %8039 = vmatpush1.bf16.msra.mxu0 %v11162_v2  ;;  %7958 = vmatprep.subr.bf16.mxu1 %v11167_v14  ;;  %v11247_v2 = vld [vmem:[#allocation22 + $0x10] sm:$0xff]  }
 0x984   :  { %8040 = vmatprep.subr.bf16.mxu0 %v11170_v26  ;;  %v11248_v14 = vld [vmem:[#allocation22 + $0x90] sm:$0xff]   ;;  %v11249_v26 = vld [vmem:[#allocation22 + $0x58] sm:$0xff]  }
 0x986   :  { %7959 = vmatpush1.bf16.msra.mxu1 %v11165_v52  ;;  %v11250_v52 = vld [vmem:[#allocation22 + $0xd8] sm:$0xff]  }
 0x987   :  { %8041 = vmatpush1.bf16.msra.mxu0 %v11168_v48  ;;  %7960 = vmatprep.subr.bf16.mxu1 %v11173_v56  ;;  %v11251_v48 = vld [vmem:[#allocation22 + $0x18] sm:$0xff]   ;;  %v11253_v56 = vld [vmem:[#allocation22 + $0x60] sm:$0xff]  }
 0x988   :  { %8042 = vmatprep.subr.bf16.mxu0 %v11176_v5  ;;  %v11254_v5 = vld [vmem:[#allocation22 + $0xe0] sm:$0xff]  }
 0x98a   :  { %7961 = vmatpush1.bf16.msra.mxu1 %v11171_v3  ;;  %v11255_v3 = vld [vmem:[#allocation22 + $0x20] sm:$0xff]  }
 0x98b   :  { %8043 = vmatpush1.bf16.msra.mxu0 %v11174_v20  ;;  %7962 = vmatprep.subr.bf16.mxu1 %v11179_v32  ;;  %v11256_v20 = vld [vmem:[#allocation22 + $0xa0] sm:$0xff]   ;;  %v11257_v32 = vld [vmem:[#allocation22 + $0x68] sm:$0xff]  }
 0x98c   :  { %8044 = vmatprep.subr.bf16.mxu0 %v11182_v47  ;;  %v11258_v47 = vld [vmem:[#allocation22 + $0xe8] sm:$0xff]  }
 0x98e   :  { %7963 = vmatpush1.bf16.msra.mxu1 %v11177_v6  ;;  %v11259_v6 = vld [vmem:[#allocation22 + $0x28] sm:$0xff]  }
 0x98f   :  { %8045 = vmatpush1.bf16.msra.mxu0 %v11180_v9  ;;  %7964 = vmatprep.subr.bf16.mxu1 %v11185_v25  ;;  %v11260_v9 = vld [vmem:[#allocation22 + $0xa8] sm:$0xff]   ;;  %v11261_v25 = vld [vmem:[#allocation22 + $0x70] sm:$0xff]  }
 0x990   :  { %8046 = vmatprep.subr.bf16.mxu0 %v11188_v12  ;;  %v11262_v12 = vld [vmem:[#allocation22 + $0xf0] sm:$0xff]  }
 0x992   :  { %7965 = vmatpush1.bf16.msra.mxu1 %v11183_v24  ;;  %v11263_v24 = vld [vmem:[#allocation22 + $0x30] sm:$0xff]  }
 0x993   :  { %8047 = vmatpush1.bf16.msra.mxu0 %v11186_v15  ;;  %7966 = vmatprep.subr.bf16.mxu1 %v11191_v16  ;;  %v11264_v15 = vld [vmem:[#allocation22 + $0xb0] sm:$0xff]   ;;  %v11265_v16 = vld [vmem:[#allocation22 + $0x78] sm:$0xff]  }
 0x994   :  { %8048 = vmatprep.subr.bf16.mxu0 %v11194_v17  ;;  %v11266_v17 = vld [vmem:[#allocation22 + $0xf8] sm:$0xff]  }
 0x996   :  { %7967 = vmatpush1.bf16.msra.mxu1 %v11189_v18  ;;  %v11267_v18 = vld [vmem:[#allocation22 + $0x38] sm:$0xff]  }
 0x997   :  { %8049 = vmatpush1.bf16.msra.mxu0 %v11192_v19  ;;  %7968 = vmatprep.subr.bf16.mxu1 %v11197_v21  ;;  %v11268_v19 = vld [vmem:[#allocation22 + $0xb8] sm:$0xff]   ;;  %v6293_v21 = vld [vmem:[%s12170_s18] sm:$0xf] }
 0x998   :  { %8050 = vmatprep.subr.bf16.mxu0 %v11200_v22  ;;  %v7247_v22 = vld [vmem:[%s12202_s6] sm:$0xf] }
 0x99a   :  { %7969 = vmatpush1.bf16.msra.mxu1 %v11195_v23  ;;  %v6298_v23 = vrot.slane %v6293_v21, %v11951_v10 }
 0x99b   :  { %8051 = vmatpush1.bf16.msra.mxu0 %v11198_v29  ;;  %7970 = vmatprep.subr.bf16.mxu1 %v11203_v30  ;;  %v7252_v29 = vrot.slane %v7247_v22, %v11951_v10  ;;  %v6306_v30 = vrot.slane %v6293_v21, %v11983_v43 }
 0x99c   :  { %8052 = vmatprep.subr.bf16.mxu0 %v11206_v31  ;;  %v7260_v31 = vrot.slane %v7247_v22, %v11983_v43 }
 0x99e   :  { %7971 = vmatpush1.bf16.msra.mxu1 %v11201_v34  ;;  %v6302_v34 = vrot.slane %v6293_v21, %v11954_v11 }
 0x99f   :  { %8053 = vmatpush1.bf16.msra.mxu0 %v11204_v35  ;;  %7972 = vmatprep.subr.bf16.mxu1 %v11209_v36  ;;  %v7256_v35 = vrot.slane %v7247_v22, %v11954_v11  ;;  %v6310_v36 = vrot.slane %v6293_v21, %v11972_v28 }
 0x9a0   :  { %8054 = vmatprep.subr.bf16.mxu0 %v11212_v37  ;;  %v7264_v37 = vrot.slane %v7247_v22, %v11972_v28 }
 0x9a2   :  { %7973 = vmatpush1.bf16.msra.mxu1 %v11207_v38  ;;  %v9578_v38 = vadd.f32 %v7252_v29, %v6298_v23 }
 0x9a3   :  { %8055 = vmatpush1.bf16.msra.mxu0 %v11210_v39  ;;  %7974 = vmatprep.subr.bf16.mxu1 %v11215_v40  ;;  %v9582_v39 = vadd.f32 %v7260_v31, %v6306_v30  ;;  %v9580_v40 = vadd.f32 %v7256_v35, %v6302_v34 }
 0x9a4   :  { %8056 = vmatprep.subr.bf16.mxu0 %v11218_v41  ;;  %v9584_v41 = vadd.f32 %v7264_v37, %v6310_v36 }
 0x9a6   :  { %7975 = vmatpush1.bf16.msra.mxu1 %v11213_v42 }
 0x9a7   :  { %8057 = vmatpush1.bf16.msra.mxu0 %v11216_v4  ;;  %7976 = vmatprep.subr.bf16.mxu1 %v11221_v44 }
 0x9a8   :  { %8058 = vmatprep.subr.bf16.mxu0 %v11224_v45 }
 0x9aa   :  { %7977 = vmatpush1.bf16.msra.mxu1 %v11219_v46 }
 0x9ab   :  { %8059 = vmatpush1.bf16.msra.mxu0 %v11222_v7  ;;  %7978 = vmatprep.subr.bf16.mxu1 %v11227_v58 }
 0x9ac   :  { %8060 = vmatprep.subr.bf16.mxu0 %v11230_v49 }
 0x9ae   :  { %7979 = vmatpush1.bf16.msra.mxu1 %v11225_v51 }
 0x9af   :  { %8061 = vmatpush1.bf16.msra.mxu0 %v11228_v8  ;;  %7980 = vmatprep.subr.bf16.mxu1 %v11233_v54 }
 0x9b0   :  { %8062 = vmatprep.subr.bf16.mxu0 %v11236_v55 }
 0x9b2   :  { %7981 = vmatpush1.bf16.msra.mxu1 %v11231_v57 }
 0x9b3   :  { %8063 = vmatpush1.bf16.msra.mxu0 %v11234_v27  ;;  %9510 = vmatprep.subr.bf16.mxu1 %v11237_v59 }
 0x9b4   :  { %9532 = vmatprep.subr.bf16.mxu0 %v11238_v60 }
 0x9b5   :  { %7983 = vmatmul.mubr.bf16.vlgmr.msra.gmra.mrb[20].mxu1 %v12095_v53 }
 0x9b6   :  { %8065 = vmatmul.mubr.bf16.vlgmr.msra.gmra.mrb[24].mxu0 %v12095_v53  ;;  %9511 = vmatpush3.bf16.msra.mxu1 %v11239_v61  ;;  %v11252_v53 = vld [vmem:[#allocation22 + $0x98] sm:$0xff]  }
 0x9b7   :  { %9533 = vmatpush3.bf16.msra.mxu0 %v11240_v33  ;;  %9512 = vmatprep.subr.bf16.mxu1 %v11241_v62  ;;  %v9477_v62 = vld [vmem:[%s12203_s9] ss:$0 sm:$0xff] }
 0x9b8   :  { %9534 = vmatprep.subr.bf16.mxu0 %v11242_v50 }
 0x9ba   :  { %9513 = vmatpush3.bf16.msra.mxu1 %v11243_v63 }
 0x9bb   :  { %9535 = vmatpush3.bf16.msra.mxu0 %v11244_v0  ;;  %9514 = vmatprep.subr.bf16.mxu1 %v11245_v13 }
 0x9bc   :  { %9536 = vmatprep.subr.bf16.mxu0 %v11246_v1 }
 0x9be   :  { %9515 = vmatpush3.bf16.msra.mxu1 %v11247_v2 }
 0x9bf   :  { %9537 = vmatpush3.bf16.msra.mxu0 %v11248_v14  ;;  %9516 = vmatprep.subr.bf16.mxu1 %v11249_v26 }
 0x9c0   :  { %9538 = vmatprep.subr.bf16.mxu0 %v11250_v52 }
 0x9c2   :  { %9517 = vmatpush3.bf16.msra.mxu1 %v11251_v48 }
 0x9c3   :  { %9539 = vmatpush3.bf16.msra.mxu0 %v11252_v53  ;;  %9518 = vmatprep.subr.bf16.mxu1 %v11253_v56 }
 0x9c4   :  { %9540 = vmatprep.subr.bf16.mxu0 %v11254_v5 }
 0x9c6   :  { %9519 = vmatpush3.bf16.msra.mxu1 %v11255_v3 }
 0x9c7   :  { %9541 = vmatpush3.bf16.msra.mxu0 %v11256_v20  ;;  %9520 = vmatprep.subr.bf16.mxu1 %v11257_v32 }
 0x9c8   :  { %9542 = vmatprep.subr.bf16.mxu0 %v11258_v47 }
 0x9ca   :  { %9521 = vmatpush3.bf16.msra.mxu1 %v11259_v6 }
 0x9cb   :  { %9543 = vmatpush3.bf16.msra.mxu0 %v11260_v9  ;;  %9522 = vmatprep.subr.bf16.mxu1 %v11261_v25 }
 0x9cc   :  { %9544 = vmatprep.subr.bf16.mxu0 %v11262_v12 }
 0x9ce   :  { %9523 = vmatpush3.bf16.msra.mxu1 %v11263_v24 }
 0x9cf   :  { %9545 = vmatpush3.bf16.msra.mxu0 %v11264_v15  ;;  %9524 = vmatprep.subr.bf16.mxu1 %v11265_v16 }
 0x9d0   :  { %9546 = vmatprep.subr.bf16.mxu0 %v11266_v17 }
 0x9d2   :  { %9525 = vmatpush3.bf16.msra.mxu1 %v11267_v18 }
 0x9d3   :  { %9547 = vmatpush3.bf16.msra.mxu0 %v11268_v19 }
 0xa88   :  { %v7984_v42 = vpop.f32.mrb[20].mxu1 }
 0xa89   :  { %v9579_v4 = vadd.f32 %v9578_v38, %v7984_v42  ;;  %v8066_v44 = vpop.f32.mrb[24].mxu0  ;;  %v7986_v10 = vpop.f32.mrb[21].mxu1 }
 0xa8a   :  { %v9583_v45 = vadd.f32 %v9582_v39, %v8066_v44  ;;  %v9581_v46 = vadd.f32 %v9580_v40, %v7986_v10  ;;  %v8068_v7 = vpop.f32.mrb[25].mxu0  ;;  %v7988_v43 = vpop.f32.mrb[22].mxu1 }
 0xa8b   :  { %v8077_v58 = vmax.f32 %v9579_v4, 0.0  ;;  %v9585_v49 = vadd.f32 %v9584_v41, %v8068_v7  ;;  %v8070_v51 = vpop.f32.mrb[26].mxu0  ;;  %v7989_v11 = vpop.f32.mrb[23].mxu1 }
 0xa8c   :  { %v8079_v8 = vmax.f32 %v9583_v45, 0.0  ;;  %v8078_v54 = vmax.f32 %v9581_v46, 0.0  ;;  %v8071_v55 = vpop.f32.mrb[27].mxu0 }
 0xa8d   :  { %v8080_v28 = vmax.f32 %v9585_v49, 0.0  ;;  %v8081_v27 = vpack.c.bf16 %v8077_v58, %v8077_v58 }
 0xa8e   :  { %v8082_v57 = vpack.c.bf16 %v8078_v54, %v8078_v54  ;;  %v8083_v60 = vpack.c.bf16 %v8079_v8, %v8079_v8 }
 0xa8f   :  { %v8084_v59 = vpack.c.bf16 %v8080_v28, %v8080_v28 }
 0xa90   :  { %8380 = vmatprep.mubr.bf16.mxu1 %v8082_v57 }
 0xa91   :  { %8420 = vmatprep.mubr.bf16.mxu0 %v8084_v59  ;;  %8381 = vmatmul.mubr.bf16.vlgmr.msra.gmra.mrb[24].mxu1 %v8081_v27 }
 0xa92   :  { %8421 = vmatmul.mubr.bf16.vlgmr.msra.gmra.mrb[28].mxu0 %v8083_v60 }
 0xb64   :  { %v9526_v61 = vpop.f32.mrb[24].mxu1 }
 0xb65   :  { %v9548_v33 = vpop.f32.mrb[28].mxu0  ;;  %v9527_v50 = vpop.f32.mrb[25].mxu1 }
 0xb66   :  { %v9528_v63 = vadd.f32 %v9527_v50, %v9526_v61  ;;  %v9549_v0 = vpop.f32.mrb[29].mxu0  ;;  %v9529_v13 = vpop.f32.mrb[26].mxu1 }
 0xb67   :  { %v9550_v1 = vadd.f32 %v9549_v0, %v9548_v33  ;;  %v9551_v2 = vpop.f32.mrb[30].mxu0  ;;  %v9530_v14 = vpop.f32.mrb[27].mxu1 }
 0xb68   :  { %v8383_v26 = vadd.f32 %v9528_v63, %v9477_v62  ;;  %v9552_v52 = vpop.f32.mrb[31].mxu0 }
 0xb6a   :  { %v8423_v48 = vadd.f32 %v9550_v1, %v8383_v26 }
 0xb6c   :  { %8428 = vst [vmem:[#allocation23] sm:$0xff] %v8423_v48 }
 0xb6d   :  { %11566 = shalt.err (!%p11563_p10)
}
 0xb6e   :  { %s12204_s20 = sld [smem:[#allocation42_spill]] }
 0xb74   :  { %s11567_s21 = scalar_lea.hbm %s12204_s20, 128 }
 0xb75   :  { %p11568_p11 = scmp.ne.s32.totalorder %s12204_s20, %s11567_s21  ;;  %p11571_p12 = scmp.lt.u32.totalorder %s11567_s21, %s12204_s20 }
 0xb77   :  { %p11573_p13 = pnand %p11571_p12, %p11568_p11 }
 0xb79   :  { %11576 = shalt.err (!%p11573_p13)
}
 0xb7a   :  { %8438 = dma.vmem_to_hbm [thread:$0]  %s8436_s2, 128, %s12204_s20, [#allocation4]  }
 0xb7b   :  { %11591 = dma.done.wait [#allocation4], 128  }
 0xb7c   :  { %11592 = vsyncadd [#allocation4], 4294967168 }
 0xb7d   :  { %8442 = vsyncpa [#allocation3], 1 }
 0xb7e   :  { %8443 = vsyncpa [#allocation6], 1 }
 0xb7f   :  { %8444 = vsyncpa [#allocation9], 1 }
 0xb80   :  { %8445 = vsyncpa [#allocation12], 1 }
 0xb81   :  { %8446 = vsyncpa [#allocation15], 1 }
 0xb82   :  { %8447 = vsyncpa [#allocation18], 1 }
 0xb83   :  { %8448 = vsyncpa [#allocation21], 1 }
 0xb84   :  { %8449 = vsyncpa [#allocation4], 1 }

</bundles_post_ra>
